<compile_context>
chip_gen: v5e
topology: v5e:2x2
jax: 0.10.0
libtpu: 0.0.40
codegen_flags: <defaults>
</compile_context>

<pallas_src>
import jax
import jax.numpy as jnp
import numpy as np
from jax import lax
from jax.experimental import pallas as pl
from jax.experimental.pallas import tpu as pltpu


def _pnet_dims(H, W):
    H1, W1 = H - 2, W - 2                      # conv1 (3x3, valid)
    P1h, P1w = -(-H1 // 2), -(-W1 // 2)        # maxpool 2x2 s2, ceil_mode=True
    H2, W2 = P1h - 2, P1w - 2                  # conv2 (3x3, valid)
    H3, W3 = H2 - 2, W2 - 2                    # conv3 (3x3, valid)
    M2, M3 = H2 * P1w, H3 * P1w                # flattened conv2/conv3 out rows
    LP = ((P1h * P1w + 2 + 7) // 8) * 8        # pooled scratch rows (+pad>=2)
    LT2 = ((M2 + 2 + 7) // 8) * 8              # conv2 scratch rows (+pad>=2)
    HWp = ((H * W + 2 + 7) // 8) * 8           # padded flattened input rows
    return H1, W1, P1h, P1w, H2, W2, H3, W3, M2, M3, LP, LT2, HWp


def make_pnet_kernel(H, W):
    """Build the fused PNet kernel for a static input spatial size (H, W)."""
    (H1, W1, P1h, P1w, H2, W2, H3, W3, M2, M3, LP, LT2, _) = _pnet_dims(H, W)
    # conv1 output-row block: keep the f32 accumulator (RB*W sublanes x 10
    # lanes -> RB*W/8 vregs) at <= ~32 vregs.
    RB = max(8, min(32, 256 // W))

    def kernel(x_ref,
               w1_ref, b1_ref, a1_ref,
               w2_ref, b2_ref, a2_ref,
               w3_ref, b3_ref, a3_ref,
               wh_ref, bh_ref,
               out_ref,
               t1_ref, p1_ref, t2_ref):
        # zero the scratch padding rows once (they only ever feed garbage
        # output columns, but keep them finite / deterministic)
        p1_ref[P1h * P1w:, :] = jnp.zeros((LP - P1h * P1w, 10), jnp.float32)
        t2_ref[M2:, :] = jnp.zeros((LT2 - M2, 16), jnp.float32)

        # ---- conv1 (3->10, 3x3 valid) + PReLU1: flattened, row-blocked ----
        # TODO(synk): at pyramid sizes convert this layer chain to a
        # row-tiled ("parallel") grid axis with a 2-row halo.
        w1 = w1_ref[...]
        b1 = b1_ref[...]
        a1 = a1_ref[...]
        for r0 in range(0, H1, RB):
            rb = min(RB, H1 - r0)
            m = rb * W                                   # M of this block
            acc = jnp.zeros((m, 10), jnp.float32)
            for t in range(9):
                off = r0 * W + (t // 3) * W + (t % 3)
                acc = acc + jnp.dot(x_ref[0, off:off + m, :], w1[t],
                                    preferred_element_type=jnp.float32)
            y = acc + b1
            t1_ref[r0 * W:r0 * W + m, :] = jnp.where(y > 0, y, a1 * y)

        # ---- maxpool 2x2 stride 2 (ceil_mode=True): pure load/VPU ----
        # strided sublane loads select even/odd columns of each source row
        # pair; no MXU work.  Odd W1 -> last odd column is wrap-around
        # garbage and is masked out (ceil-mode takes the lone even column).
        if W1 % 2 == 1:
            ci = lax.broadcasted_iota(jnp.int32, (P1w, 10), 0)
            odd_ok = (2 * ci + 1) < W1
        for pi in range(P1h):
            r = 2 * pi
            e = t1_ref[pl.ds(r * W, P1w, stride=2), :]
            o = t1_ref[pl.ds(r * W + 1, P1w, stride=2), :]
            if r + 1 < H1:                               # ceil-mode bottom edge
                e = jnp.maximum(e, t1_ref[pl.ds((r + 1) * W, P1w, stride=2), :])
                o = jnp.maximum(o, t1_ref[pl.ds((r + 1) * W + 1, P1w, stride=2), :])
            if W1 % 2 == 1:
                res = jnp.where(odd_ok, jnp.maximum(e, o), e)
            else:
                res = jnp.maximum(e, o)
            p1_ref[pi * P1w:(pi + 1) * P1w, :] = res

        # ---- conv2 (10->16) + PReLU2: 9 whole-layer dots ----
        w2 = w2_ref[...]
        b2 = b2_ref[...]
        a2 = a2_ref[...]
        acc = jnp.zeros((M2, 16), jnp.float32)
        for t in range(9):
            off = (t // 3) * P1w + (t % 3)
            acc = acc + jnp.dot(p1_ref[off:off + M2, :], w2[t],
                                preferred_element_type=jnp.float32)
        y = acc + b2
        t2_ref[0:M2, :] = jnp.where(y > 0, y, a2 * y)

        # ---- conv3 (16->32) + PReLU3: 9 whole-layer dots ----
        w3 = w3_ref[...]
        b3 = b3_ref[...]
        a3 = a3_ref[...]
        acc = jnp.zeros((M3, 32), jnp.float32)
        for t in range(9):
            off = (t // 3) * P1w + (t % 3)
            acc = acc + jnp.dot(t2_ref[off:off + M3, :], w3[t],
                                preferred_element_type=jnp.float32)
        y = acc + b3
        t3 = jnp.where(y > 0, y, a3 * y)                 # (M3, 32)

        # ---- fused heads: single (32, 6) matmul; cols 0:2 = conv4_1 logits,
        # cols 2:6 = conv4_2 bbox.  2-class softmax as a sigmoid (no
        # cross-lane reductions); one lane-concatenated store.
        z = jnp.dot(t3, wh_ref[...],
                    preferred_element_type=jnp.float32) + bh_ref[...]
        p0 = 1.0 / (1.0 + jnp.exp(z[:, 1:2] - z[:, 0:1]))
        out_ref[0] = jnp.concatenate([p0, 1.0 - p0, z[:, 2:6]], axis=-1)

    return kernel


# ----------------------------------------------------------------------------
# wrapper (layout plumbing + pallas_call)
# ----------------------------------------------------------------------------
def pnet_forward(x_nchw, params):
    N, C, H, W = x_nchw.shape
    assert C == 3 and H >= 12 and W >= 12
    (H1, W1, P1h, P1w, H2, W2, H3, W3, M2, M3, LP, LT2, HWp) = _pnet_dims(H, W)

    # NCHW -> NHWC -> flattened (N, H*W, 3) with >=2 zero pad rows.
    # TODO(synk): for tiny pyramid levels pack several images per grid step
    # along this row axis to amortize the ~0.35us per-step overhead.
    x = jnp.transpose(x_nchw, (0, 2, 3, 1)).astype(jnp.float32)
    x = x.reshape(N, H * W, 3)
    x = jnp.pad(x, ((0, 0), (0, HWp - H * W), (0, 0)))

    def conv_taps(w):  # torch (O, I, 3, 3) -> (9, I, O), tap t = kh*3 + kw
        o, i = w.shape[0], w.shape[1]
        return jnp.transpose(w, (2, 3, 1, 0)).reshape(9, i, o).astype(jnp.float32)

    # fuse the two 1x1 heads into one (32, 6) matmul (cols 0:2 prob logits,
    # cols 2:6 bbox)
    w_heads = jnp.concatenate([params["conv4_1.weight"].reshape(2, 32).T,
                               params["conv4_2.weight"].reshape(4, 32).T], axis=1)
    b_heads = jnp.concatenate([params["conv4_1.bias"].reshape(1, -1),
                               params["conv4_2.bias"].reshape(1, -1)], axis=1)

    plist = [
        conv_taps(params["conv1.weight"]), params["conv1.bias"].reshape(1, -1),
        params["prelu1.weight"].reshape(1, -1),
        conv_taps(params["conv2.weight"]), params["conv2.bias"].reshape(1, -1),
        params["prelu2.weight"].reshape(1, -1),
        conv_taps(params["conv3.weight"]), params["conv3.bias"].reshape(1, -1),
        params["prelu3.weight"].reshape(1, -1),
        w_heads, b_heads,
    ]
    plist = [p.astype(jnp.float32) for p in plist]
    # TODO(synk): cast activations/weights to bf16 (f32 accumulation) for
    # v6e/v7x production and loosen tolerances accordingly.

    kernel = make_pnet_kernel(H, W)

    def full_spec(arr):
        nd = arr.ndim
        return pl.BlockSpec(arr.shape, lambda n, _nd=nd: (0,) * _nd)

    x_spec = pl.BlockSpec((1, HWp, 3), lambda n: (n, 0, 0))
    out_spec = pl.BlockSpec((1, M3, 6), lambda n: (n, 0, 0))

    out = pl.pallas_call(
        kernel,
        out_shape=jax.ShapeDtypeStruct((N, M3, 6), jnp.float32),
        grid=(N,),
        in_specs=[x_spec] + [full_spec(p) for p in plist],
        out_specs=out_spec,
        scratch_shapes=[
            pltpu.VMEM((H1 * W, 10), jnp.float32),   # conv1/prelu1 (pitch W)
            pltpu.VMEM((LP, 10), jnp.float32),       # pooled (pitch P1w) + pad
            pltpu.VMEM((LT2, 16), jnp.float32),      # conv2/prelu2 (pitch P1w)
        ],
        compiler_params=pltpu.CompilerParams(
            dimension_semantics=("parallel",)),      # batch across TCs (v7x)
    )(x, *plist)

    # drop the garbage right-margin columns, back to PyTorch NCHW: (b, a)
    out = out.reshape(N, H3, P1w, 6)[:, :, :W3, :]
    a = jnp.transpose(out[..., 0:2], (0, 3, 1, 2))   # softmax(conv4_1)
    b = jnp.transpose(out[..., 2:6], (0, 3, 1, 2))   # conv4_2 (bbox)
    return b, a


# ----------------------------------------------------------------------------
# pure-JAX reference (for correctness check only)
# ----------------------------------------------------------------------------
def pnet_reference(x_nchw, params):
    x = jnp.transpose(x_nchw, (0, 2, 3, 1)).astype(jnp.float32)

    def conv(y, w, b):
        wh = jnp.transpose(w, (2, 3, 1, 0))
        z = lax.conv_general_dilated(y, wh, (1, 1), "VALID",
                                     dimension_numbers=("NHWC", "HWIO", "NHWC"))
        return z + b.reshape(1, 1, 1, -1)

    def prelu(y, a):
        a = a.reshape(1, 1, 1, -1)
        return jnp.where(y > 0, y, a * y)

    def maxpool_ceil(y):
        _, Hh, Ww, _ = y.shape
        ph, pw = Hh % 2, Ww % 2
        if ph or pw:
            y = jnp.pad(y, ((0, 0), (0, ph), (0, pw), (0, 0)),
                        constant_values=-jnp.inf)
        return lax.reduce_window(y, -jnp.inf, lax.max,
                                 (1, 2, 2, 1), (1, 2, 2, 1), "VALID")

    y = prelu(conv(x, params["conv1.weight"], params["conv1.bias"]),
              params["prelu1.weight"])
    y = maxpool_ceil(y)
    y = prelu(conv(y, params["conv2.weight"], params["conv2.bias"]),
              params["prelu2.weight"])
    y = prelu(conv(y, params["conv3.weight"], params["conv3.bias"]),
              params["prelu3.weight"])
    a = jax.nn.softmax(conv(y, params["conv4_1.weight"], params["conv4_1.bias"]),
                       axis=-1)
    b = conv(y, params["conv4_2.weight"], params["conv4_2.bias"])
    return jnp.transpose(b, (0, 3, 1, 2)), jnp.transpose(a, (0, 3, 1, 2))


# ----------------------------------------------------------------------------
# deterministic parameter init (shapes from PNet.__init__; no checkpoint load)
# ----------------------------------------------------------------------------
def init_params(key):
    ks = jax.random.split(key, 16)
    f32 = jnp.float32
    return {
        "conv1.weight": 0.2 * jax.random.normal(ks[0], (10, 3, 3, 3), f32),
        "conv1.bias": 0.1 * jax.random.normal(ks[1], (10,), f32),
        "prelu1.weight": 0.25 + 0.05 * jax.random.normal(ks[2], (10,), f32),
        "conv2.weight": 0.2 * jax.random.normal(ks[3], (16, 10, 3, 3), f32),
        "conv2.bias": 0.1 * jax.random.normal(ks[4], (16,), f32),
        "prelu2.weight": 0.25 + 0.05 * jax.random.normal(ks[5], (16,), f32),
        "conv3.weight": 0.2 * jax.random.normal(ks[6], (32, 16, 3, 3), f32),
        "conv3.bias": 0.1 * jax.random.normal(ks[7], (32,), f32),
        "prelu3.weight": 0.25 + 0.05 * jax.random.normal(ks[8], (32,), f32),
        "conv4_1.weight": 0.2 * jax.random.normal(ks[9], (2, 32, 1, 1), f32),
        "conv4_1.bias": 0.1 * jax.random.normal(ks[10], (2,), f32),
        "conv4_2.weight": 0.2 * jax.random.normal(ks[11], (4, 32, 1, 1), f32),
        "conv4_2.bias": 0.1 * jax.random.normal(ks[12], (4,), f32),
    }


if __name__ == "__main__":
    key = jax.random.PRNGKey(0)
    kp, kx1, kx2 = jax.random.split(key, 3)
    params = init_params(kp)

    # even spatial dims + an odd-sized level (exercises ceil-mode edges and
    # the odd-column pool mask)
    for shape, kx in (((2, 3, 16, 16), kx1), ((1, 3, 15, 17), kx2)):
        x = jax.random.normal(kx, shape, jnp.float32)
        b_k, a_k = pnet_forward(x, params)
        jax.block_until_ready((b_k, a_k))
        b_r, a_r = pnet_reference(x, params)
        np.testing.assert_allclose(np.asarray(b_k), np.asarray(b_r),
                                   atol=3e-4, rtol=3e-4)
        np.testing.assert_allclose(np.asarray(a_k), np.asarray(a_r),
                                   atol=3e-4, rtol=3e-4)
    print("KERNEL_OK")
</pallas_src>

<mosaic_0001>
module attributes {stable_mosaic.version = 11 : i64} {
  func.func @kernel(%arg0: i32, %arg1: memref<1x264x3xf32, #tpu.memory_space<vmem>>, %arg2: memref<9x3x10xf32, #tpu.memory_space<vmem>>, %arg3: memref<1x10xf32, #tpu.memory_space<vmem>>, %arg4: memref<1x10xf32, #tpu.memory_space<vmem>>, %arg5: memref<9x10x16xf32, #tpu.memory_space<vmem>>, %arg6: memref<1x16xf32, #tpu.memory_space<vmem>>, %arg7: memref<1x16xf32, #tpu.memory_space<vmem>>, %arg8: memref<9x16x32xf32, #tpu.memory_space<vmem>>, %arg9: memref<1x32xf32, #tpu.memory_space<vmem>>, %arg10: memref<1x32xf32, #tpu.memory_space<vmem>>, %arg11: memref<32x6xf32, #tpu.memory_space<vmem>>, %arg12: memref<1x6xf32, #tpu.memory_space<vmem>>, %arg13: memref<1x21x6xf32, #tpu.memory_space<vmem>>, %arg14: memref<224x10xf32, #tpu.memory_space<vmem>>, %arg15: memref<56x10xf32, #tpu.memory_space<vmem>>, %arg16: memref<40x16xf32, #tpu.memory_space<vmem>>) attributes {dimension_semantics = [#tpu.dimension_semantics<parallel>], iteration_bounds = array<i64: 2>, scalar_prefetch = 0 : i64, scratch_operands = 3 : i64, tpu.core_type = #tpu.core_type<tc>, window_params = [{transform_indices = @transform_0, window_bounds = array<i64: 1, 264, 3>}, {pipeline_mode = #tpu.pipeline_mode<synchronous>, transform_indices = @transform_1, window_bounds = array<i64: 9, 3, 10>}, {pipeline_mode = #tpu.pipeline_mode<synchronous>, transform_indices = @transform_2, window_bounds = array<i64: 1, 10>}, {pipeline_mode = #tpu.pipeline_mode<synchronous>, transform_indices = @transform_3, window_bounds = array<i64: 1, 10>}, {pipeline_mode = #tpu.pipeline_mode<synchronous>, transform_indices = @transform_4, window_bounds = array<i64: 9, 10, 16>}, {pipeline_mode = #tpu.pipeline_mode<synchronous>, transform_indices = @transform_5, window_bounds = array<i64: 1, 16>}, {pipeline_mode = #tpu.pipeline_mode<synchronous>, transform_indices = @transform_6, window_bounds = array<i64: 1, 16>}, {pipeline_mode = #tpu.pipeline_mode<synchronous>, transform_indices = @transform_7, window_bounds = array<i64: 9, 16, 32>}, {pipeline_mode = #tpu.pipeline_mode<synchronous>, transform_indices = @transform_8, window_bounds = array<i64: 1, 32>}, {pipeline_mode = #tpu.pipeline_mode<synchronous>, transform_indices = @transform_9, window_bounds = array<i64: 1, 32>}, {pipeline_mode = #tpu.pipeline_mode<synchronous>, transform_indices = @transform_10, window_bounds = array<i64: 32, 6>}, {pipeline_mode = #tpu.pipeline_mode<synchronous>, transform_indices = @transform_11, window_bounds = array<i64: 1, 6>}, {transform_indices = @transform_12, window_bounds = array<i64: 1, 21, 6>}]} {
    %cst = arith.constant 0.000000e+00 : f32
    %0 = vector.broadcast %cst : f32 to vector<7x10xf32>
    %c49 = arith.constant 49 : index
    %c0 = arith.constant 0 : index
    %1 = vector.load %arg15[%c49, %c0] : memref<56x10xf32, #tpu.memory_space<vmem>>, vector<7x10xf32>
    tpu.vector_store %arg15[%c49, %c0], %0 {strides = array<i32>} : memref<56x10xf32, #tpu.memory_space<vmem>>, vector<7x10xf32>,
    %cst_0 = arith.constant 0.000000e+00 : f32
    %2 = vector.broadcast %cst_0 : f32 to vector<5x16xf32>
    %c35 = arith.constant 35 : index
    %c0_1 = arith.constant 0 : index
    %3 = vector.load %arg16[%c35, %c0_1] : memref<40x16xf32, #tpu.memory_space<vmem>>, vector<5x16xf32>
    tpu.vector_store %arg16[%c35, %c0_1], %2 {strides = array<i32>} : memref<40x16xf32, #tpu.memory_space<vmem>>, vector<5x16xf32>,
    %c0_2 = arith.constant 0 : index
    %c0_3 = arith.constant 0 : index
    %c0_4 = arith.constant 0 : index
    %4 = vector.load %arg2[%c0_2, %c0_3, %c0_4] : memref<9x3x10xf32, #tpu.memory_space<vmem>>, vector<9x3x10xf32>
    %c0_5 = arith.constant 0 : index
    %c0_6 = arith.constant 0 : index
    %5 = vector.load %arg3[%c0_5, %c0_6] : memref<1x10xf32, #tpu.memory_space<vmem>>, vector<1x10xf32>
    %c0_7 = arith.constant 0 : index
    %c0_8 = arith.constant 0 : index
    %6 = vector.load %arg4[%c0_7, %c0_8] : memref<1x10xf32, #tpu.memory_space<vmem>>, vector<1x10xf32>
    %cst_9 = arith.constant 0.000000e+00 : f32
    %7 = vector.broadcast %cst_9 : f32 to vector<224x10xf32>
    %c0_10 = arith.constant 0 : index
    %c0_11 = arith.constant 0 : index
    %c0_12 = arith.constant 0 : index
    %8 = vector.load %arg1[%c0_10, %c0_11, %c0_12] : memref<1x264x3xf32, #tpu.memory_space<vmem>>, vector<1x224x3xf32>
    %9 = vector.shape_cast %8 : vector<1x224x3xf32> to vector<224x3xf32>
    %10 = vector.extract_strided_slice %4 {offsets = [0, 0, 0], sizes = [1, 3, 10], strides = [1, 1, 1]} : vector<9x3x10xf32> to vector<1x3x10xf32>
    %11 = vector.shape_cast %10 : vector<1x3x10xf32> to vector<3x10xf32>
    %cst_13 = arith.constant dense<0.000000e+00> : vector<224x10xf32>
    %12 = tpu.matmul %9, %11, %cst_13 {dimension_numbers = #tpu.dot_dimension_numbers<[1], [0], [0], [1], [0, 0, 1, 1], [], []>} : vector<224x3xf32>, vector<3x10xf32>, vector<224x10xf32> -> vector<224x10xf32>
    %13 = arith.addf %7, %12 : vector<224x10xf32>
    %c0_14 = arith.constant 0 : index
    %c1 = arith.constant 1 : index
    %c0_15 = arith.constant 0 : index
    %14 = vector.load %arg1[%c0_14, %c1, %c0_15] : memref<1x264x3xf32, #tpu.memory_space<vmem>>, vector<1x224x3xf32>
    %15 = vector.shape_cast %14 : vector<1x224x3xf32> to vector<224x3xf32>
    %16 = vector.extract_strided_slice %4 {offsets = [1, 0, 0], sizes = [1, 3, 10], strides = [1, 1, 1]} : vector<9x3x10xf32> to vector<1x3x10xf32>
    %17 = vector.shape_cast %16 : vector<1x3x10xf32> to vector<3x10xf32>
    %cst_16 = arith.constant dense<0.000000e+00> : vector<224x10xf32>
    %18 = tpu.matmul %15, %17, %cst_16 {dimension_numbers = #tpu.dot_dimension_numbers<[1], [0], [0], [1], [0, 0, 1, 1], [], []>} : vector<224x3xf32>, vector<3x10xf32>, vector<224x10xf32> -> vector<224x10xf32>
    %19 = arith.addf %13, %18 : vector<224x10xf32>
    %c0_17 = arith.constant 0 : index
    %c2 = arith.constant 2 : index
    %c0_18 = arith.constant 0 : index
    %20 = vector.load %arg1[%c0_17, %c2, %c0_18] : memref<1x264x3xf32, #tpu.memory_space<vmem>>, vector<1x224x3xf32>
    %21 = vector.shape_cast %20 : vector<1x224x3xf32> to vector<224x3xf32>
    %22 = vector.extract_strided_slice %4 {offsets = [2, 0, 0], sizes = [1, 3, 10], strides = [1, 1, 1]} : vector<9x3x10xf32> to vector<1x3x10xf32>
    %23 = vector.shape_cast %22 : vector<1x3x10xf32> to vector<3x10xf32>
    %cst_19 = arith.constant dense<0.000000e+00> : vector<224x10xf32>
    %24 = tpu.matmul %21, %23, %cst_19 {dimension_numbers = #tpu.dot_dimension_numbers<[1], [0], [0], [1], [0, 0, 1, 1], [], []>} : vector<224x3xf32>, vector<3x10xf32>, vector<224x10xf32> -> vector<224x10xf32>
    %25 = arith.addf %19, %24 : vector<224x10xf32>
    %c0_20 = arith.constant 0 : index
    %c16 = arith.constant 16 : index
    %c0_21 = arith.constant 0 : index
    %26 = vector.load %arg1[%c0_20, %c16, %c0_21] : memref<1x264x3xf32, #tpu.memory_space<vmem>>, vector<1x224x3xf32>
    %27 = vector.shape_cast %26 : vector<1x224x3xf32> to vector<224x3xf32>
    %28 = vector.extract_strided_slice %4 {offsets = [3, 0, 0], sizes = [1, 3, 10], strides = [1, 1, 1]} : vector<9x3x10xf32> to vector<1x3x10xf32>
    %29 = vector.shape_cast %28 : vector<1x3x10xf32> to vector<3x10xf32>
    %cst_22 = arith.constant dense<0.000000e+00> : vector<224x10xf32>
    %30 = tpu.matmul %27, %29, %cst_22 {dimension_numbers = #tpu.dot_dimension_numbers<[1], [0], [0], [1], [0, 0, 1, 1], [], []>} : vector<224x3xf32>, vector<3x10xf32>, vector<224x10xf32> -> vector<224x10xf32>
    %31 = arith.addf %25, %30 : vector<224x10xf32>
    %c0_23 = arith.constant 0 : index
    %c17 = arith.constant 17 : index
    %c0_24 = arith.constant 0 : index
    %32 = vector.load %arg1[%c0_23, %c17, %c0_24] : memref<1x264x3xf32, #tpu.memory_space<vmem>>, vector<1x224x3xf32>
    %33 = vector.shape_cast %32 : vector<1x224x3xf32> to vector<224x3xf32>
    %34 = vector.extract_strided_slice %4 {offsets = [4, 0, 0], sizes = [1, 3, 10], strides = [1, 1, 1]} : vector<9x3x10xf32> to vector<1x3x10xf32>
    %35 = vector.shape_cast %34 : vector<1x3x10xf32> to vector<3x10xf32>
    %cst_25 = arith.constant dense<0.000000e+00> : vector<224x10xf32>
    %36 = tpu.matmul %33, %35, %cst_25 {dimension_numbers = #tpu.dot_dimension_numbers<[1], [0], [0], [1], [0, 0, 1, 1], [], []>} : vector<224x3xf32>, vector<3x10xf32>, vector<224x10xf32> -> vector<224x10xf32>
    %37 = arith.addf %31, %36 : vector<224x10xf32>
    %c0_26 = arith.constant 0 : index
    %c18 = arith.constant 18 : index
    %c0_27 = arith.constant 0 : index
    %38 = vector.load %arg1[%c0_26, %c18, %c0_27] : memref<1x264x3xf32, #tpu.memory_space<vmem>>, vector<1x224x3xf32>
    %39 = vector.shape_cast %38 : vector<1x224x3xf32> to vector<224x3xf32>
    %40 = vector.extract_strided_slice %4 {offsets = [5, 0, 0], sizes = [1, 3, 10], strides = [1, 1, 1]} : vector<9x3x10xf32> to vector<1x3x10xf32>
    %41 = vector.shape_cast %40 : vector<1x3x10xf32> to vector<3x10xf32>
    %cst_28 = arith.constant dense<0.000000e+00> : vector<224x10xf32>
    %42 = tpu.matmul %39, %41, %cst_28 {dimension_numbers = #tpu.dot_dimension_numbers<[1], [0], [0], [1], [0, 0, 1, 1], [], []>} : vector<224x3xf32>, vector<3x10xf32>, vector<224x10xf32> -> vector<224x10xf32>
    %43 = arith.addf %37, %42 : vector<224x10xf32>
    %c0_29 = arith.constant 0 : index
    %c32 = arith.constant 32 : index
    %c0_30 = arith.constant 0 : index
    %44 = vector.load %arg1[%c0_29, %c32, %c0_30] : memref<1x264x3xf32, #tpu.memory_space<vmem>>, vector<1x224x3xf32>
    %45 = vector.shape_cast %44 : vector<1x224x3xf32> to vector<224x3xf32>
    %46 = vector.extract_strided_slice %4 {offsets = [6, 0, 0], sizes = [1, 3, 10], strides = [1, 1, 1]} : vector<9x3x10xf32> to vector<1x3x10xf32>
    %47 = vector.shape_cast %46 : vector<1x3x10xf32> to vector<3x10xf32>
    %cst_31 = arith.constant dense<0.000000e+00> : vector<224x10xf32>
    %48 = tpu.matmul %45, %47, %cst_31 {dimension_numbers = #tpu.dot_dimension_numbers<[1], [0], [0], [1], [0, 0, 1, 1], [], []>} : vector<224x3xf32>, vector<3x10xf32>, vector<224x10xf32> -> vector<224x10xf32>
    %49 = arith.addf %43, %48 : vector<224x10xf32>
    %c0_32 = arith.constant 0 : index
    %c33 = arith.constant 33 : index
    %c0_33 = arith.constant 0 : index
    %50 = vector.load %arg1[%c0_32, %c33, %c0_33] : memref<1x264x3xf32, #tpu.memory_space<vmem>>, vector<1x224x3xf32>
    %51 = vector.shape_cast %50 : vector<1x224x3xf32> to vector<224x3xf32>
    %52 = vector.extract_strided_slice %4 {offsets = [7, 0, 0], sizes = [1, 3, 10], strides = [1, 1, 1]} : vector<9x3x10xf32> to vector<1x3x10xf32>
    %53 = vector.shape_cast %52 : vector<1x3x10xf32> to vector<3x10xf32>
    %cst_34 = arith.constant dense<0.000000e+00> : vector<224x10xf32>
    %54 = tpu.matmul %51, %53, %cst_34 {dimension_numbers = #tpu.dot_dimension_numbers<[1], [0], [0], [1], [0, 0, 1, 1], [], []>} : vector<224x3xf32>, vector<3x10xf32>, vector<224x10xf32> -> vector<224x10xf32>
    %55 = arith.addf %49, %54 : vector<224x10xf32>
    %c0_35 = arith.constant 0 : index
    %c34 = arith.constant 34 : index
    %c0_36 = arith.constant 0 : index
    %56 = vector.load %arg1[%c0_35, %c34, %c0_36] : memref<1x264x3xf32, #tpu.memory_space<vmem>>, vector<1x224x3xf32>
    %57 = vector.shape_cast %56 : vector<1x224x3xf32> to vector<224x3xf32>
    %58 = vector.extract_strided_slice %4 {offsets = [8, 0, 0], sizes = [1, 3, 10], strides = [1, 1, 1]} : vector<9x3x10xf32> to vector<1x3x10xf32>
    %59 = vector.shape_cast %58 : vector<1x3x10xf32> to vector<3x10xf32>
    %cst_37 = arith.constant dense<0.000000e+00> : vector<224x10xf32>
    %60 = tpu.matmul %57, %59, %cst_37 {dimension_numbers = #tpu.dot_dimension_numbers<[1], [0], [0], [1], [0, 0, 1, 1], [], []>} : vector<224x3xf32>, vector<3x10xf32>, vector<224x10xf32> -> vector<224x10xf32>
    %61 = arith.addf %55, %60 : vector<224x10xf32>
    %62 = vector.broadcast %5 : vector<1x10xf32> to vector<224x10xf32>
    %63 = arith.addf %61, %62 : vector<224x10xf32>
    %cst_38 = arith.constant 0.000000e+00 : f32
    %64 = vector.broadcast %cst_38 : f32 to vector<224x10xf32>
    %65 = arith.cmpf ogt, %63, %64 : vector<224x10xf32>
    %66 = vector.broadcast %6 : vector<1x10xf32> to vector<224x10xf32>
    %67 = arith.mulf %66, %63 : vector<224x10xf32>
    %68 = arith.select %65, %63, %67 : vector<224x10xi1>, vector<224x10xf32>
    %c0_39 = arith.constant 0 : index
    %c0_40 = arith.constant 0 : index
    %69 = vector.load %arg14[%c0_39, %c0_40] : memref<224x10xf32, #tpu.memory_space<vmem>>, vector<224x10xf32>
    tpu.vector_store %arg14[%c0_39, %c0_40], %68 {strides = array<i32>} : memref<224x10xf32, #tpu.memory_space<vmem>>, vector<224x10xf32>,
    %c0_41 = arith.constant 0 : index
    %c0_42 = arith.constant 0 : index
    %70 = tpu.strided_load %arg14[%c0_41, %c0_42] {strides = array<i32: 2, 1>} : memref<224x10xf32, #tpu.memory_space<vmem>>, vector<7x10xf32>
    %c1_43 = arith.constant 1 : index
    %c0_44 = arith.constant 0 : index
    %71 = tpu.strided_load %arg14[%c1_43, %c0_44] {strides = array<i32: 2, 1>} : memref<224x10xf32, #tpu.memory_space<vmem>>, vector<7x10xf32>
    %c16_45 = arith.constant 16 : index
    %c0_46 = arith.constant 0 : index
    %72 = tpu.strided_load %arg14[%c16_45, %c0_46] {strides = array<i32: 2, 1>} : memref<224x10xf32, #tpu.memory_space<vmem>>, vector<7x10xf32>
    %73 = arith.maximumf %70, %72 : vector<7x10xf32>
    %c17_47 = arith.constant 17 : index
    %c0_48 = arith.constant 0 : index
    %74 = tpu.strided_load %arg14[%c17_47, %c0_48] {strides = array<i32: 2, 1>} : memref<224x10xf32, #tpu.memory_space<vmem>>, vector<7x10xf32>
    %75 = arith.maximumf %71, %74 : vector<7x10xf32>
    %76 = arith.maximumf %73, %75 : vector<7x10xf32>
    %c0_49 = arith.constant 0 : index
    %c0_50 = arith.constant 0 : index
    %77 = vector.load %arg15[%c0_49, %c0_50] : memref<56x10xf32, #tpu.memory_space<vmem>>, vector<7x10xf32>
    tpu.vector_store %arg15[%c0_49, %c0_50], %76 {strides = array<i32>} : memref<56x10xf32, #tpu.memory_space<vmem>>, vector<7x10xf32>,
    %c32_51 = arith.constant 32 : index
    %c0_52 = arith.constant 0 : index
    %78 = tpu.strided_load %arg14[%c32_51, %c0_52] {strides = array<i32: 2, 1>} : memref<224x10xf32, #tpu.memory_space<vmem>>, vector<7x10xf32>
    %c33_53 = arith.constant 33 : index
    %c0_54 = arith.constant 0 : index
    %79 = tpu.strided_load %arg14[%c33_53, %c0_54] {strides = array<i32: 2, 1>} : memref<224x10xf32, #tpu.memory_space<vmem>>, vector<7x10xf32>
    %c48 = arith.constant 48 : index
    %c0_55 = arith.constant 0 : index
    %80 = tpu.strided_load %arg14[%c48, %c0_55] {strides = array<i32: 2, 1>} : memref<224x10xf32, #tpu.memory_space<vmem>>, vector<7x10xf32>
    %81 = arith.maximumf %78, %80 : vector<7x10xf32>
    %c49_56 = arith.constant 49 : index
    %c0_57 = arith.constant 0 : index
    %82 = tpu.strided_load %arg14[%c49_56, %c0_57] {strides = array<i32: 2, 1>} : memref<224x10xf32, #tpu.memory_space<vmem>>, vector<7x10xf32>
    %83 = arith.maximumf %79, %82 : vector<7x10xf32>
    %84 = arith.maximumf %81, %83 : vector<7x10xf32>
    %c7 = arith.constant 7 : index
    %c0_58 = arith.constant 0 : index
    %85 = vector.load %arg15[%c7, %c0_58] : memref<56x10xf32, #tpu.memory_space<vmem>>, vector<7x10xf32>
    tpu.vector_store %arg15[%c7, %c0_58], %84 {strides = array<i32>} : memref<56x10xf32, #tpu.memory_space<vmem>>, vector<7x10xf32>,
    %c64 = arith.constant 64 : index
    %c0_59 = arith.constant 0 : index
    %86 = tpu.strided_load %arg14[%c64, %c0_59] {strides = array<i32: 2, 1>} : memref<224x10xf32, #tpu.memory_space<vmem>>, vector<7x10xf32>
    %c65 = arith.constant 65 : index
    %c0_60 = arith.constant 0 : index
    %87 = tpu.strided_load %arg14[%c65, %c0_60] {strides = array<i32: 2, 1>} : memref<224x10xf32, #tpu.memory_space<vmem>>, vector<7x10xf32>
    %c80 = arith.constant 80 : index
    %c0_61 = arith.constant 0 : index
    %88 = tpu.strided_load %arg14[%c80, %c0_61] {strides = array<i32: 2, 1>} : memref<224x10xf32, #tpu.memory_space<vmem>>, vector<7x10xf32>
    %89 = arith.maximumf %86, %88 : vector<7x10xf32>
    %c81 = arith.constant 81 : index
    %c0_62 = arith.constant 0 : index
    %90 = tpu.strided_load %arg14[%c81, %c0_62] {strides = array<i32: 2, 1>} : memref<224x10xf32, #tpu.memory_space<vmem>>, vector<7x10xf32>
    %91 = arith.maximumf %87, %90 : vector<7x10xf32>
    %92 = arith.maximumf %89, %91 : vector<7x10xf32>
    %c14 = arith.constant 14 : index
    %c0_63 = arith.constant 0 : index
    %93 = vector.load %arg15[%c14, %c0_63] : memref<56x10xf32, #tpu.memory_space<vmem>>, vector<7x10xf32>
    tpu.vector_store %arg15[%c14, %c0_63], %92 {strides = array<i32>} : memref<56x10xf32, #tpu.memory_space<vmem>>, vector<7x10xf32>,
    %c96 = arith.constant 96 : index
    %c0_64 = arith.constant 0 : index
    %94 = tpu.strided_load %arg14[%c96, %c0_64] {strides = array<i32: 2, 1>} : memref<224x10xf32, #tpu.memory_space<vmem>>, vector<7x10xf32>
    %c97 = arith.constant 97 : index
    %c0_65 = arith.constant 0 : index
    %95 = tpu.strided_load %arg14[%c97, %c0_65] {strides = array<i32: 2, 1>} : memref<224x10xf32, #tpu.memory_space<vmem>>, vector<7x10xf32>
    %c112 = arith.constant 112 : index
    %c0_66 = arith.constant 0 : index
    %96 = tpu.strided_load %arg14[%c112, %c0_66] {strides = array<i32: 2, 1>} : memref<224x10xf32, #tpu.memory_space<vmem>>, vector<7x10xf32>
    %97 = arith.maximumf %94, %96 : vector<7x10xf32>
    %c113 = arith.constant 113 : index
    %c0_67 = arith.constant 0 : index
    %98 = tpu.strided_load %arg14[%c113, %c0_67] {strides = array<i32: 2, 1>} : memref<224x10xf32, #tpu.memory_space<vmem>>, vector<7x10xf32>
    %99 = arith.maximumf %95, %98 : vector<7x10xf32>
    %100 = arith.maximumf %97, %99 : vector<7x10xf32>
    %c21 = arith.constant 21 : index
    %c0_68 = arith.constant 0 : index
    %101 = vector.load %arg15[%c21, %c0_68] : memref<56x10xf32, #tpu.memory_space<vmem>>, vector<7x10xf32>
    tpu.vector_store %arg15[%c21, %c0_68], %100 {strides = array<i32>} : memref<56x10xf32, #tpu.memory_space<vmem>>, vector<7x10xf32>,
    %c128 = arith.constant 128 : index
    %c0_69 = arith.constant 0 : index
    %102 = tpu.strided_load %arg14[%c128, %c0_69] {strides = array<i32: 2, 1>} : memref<224x10xf32, #tpu.memory_space<vmem>>, vector<7x10xf32>
    %c129 = arith.constant 129 : index
    %c0_70 = arith.constant 0 : index
    %103 = tpu.strided_load %arg14[%c129, %c0_70] {strides = array<i32: 2, 1>} : memref<224x10xf32, #tpu.memory_space<vmem>>, vector<7x10xf32>
    %c144 = arith.constant 144 : index
    %c0_71 = arith.constant 0 : index
    %104 = tpu.strided_load %arg14[%c144, %c0_71] {strides = array<i32: 2, 1>} : memref<224x10xf32, #tpu.memory_space<vmem>>, vector<7x10xf32>
    %105 = arith.maximumf %102, %104 : vector<7x10xf32>
    %c145 = arith.constant 145 : index
    %c0_72 = arith.constant 0 : index
    %106 = tpu.strided_load %arg14[%c145, %c0_72] {strides = array<i32: 2, 1>} : memref<224x10xf32, #tpu.memory_space<vmem>>, vector<7x10xf32>
    %107 = arith.maximumf %103, %106 : vector<7x10xf32>
    %108 = arith.maximumf %105, %107 : vector<7x10xf32>
    %c28 = arith.constant 28 : index
    %c0_73 = arith.constant 0 : index
    %109 = vector.load %arg15[%c28, %c0_73] : memref<56x10xf32, #tpu.memory_space<vmem>>, vector<7x10xf32>
    tpu.vector_store %arg15[%c28, %c0_73], %108 {strides = array<i32>} : memref<56x10xf32, #tpu.memory_space<vmem>>, vector<7x10xf32>,
    %c160 = arith.constant 160 : index
    %c0_74 = arith.constant 0 : index
    %110 = tpu.strided_load %arg14[%c160, %c0_74] {strides = array<i32: 2, 1>} : memref<224x10xf32, #tpu.memory_space<vmem>>, vector<7x10xf32>
    %c161 = arith.constant 161 : index
    %c0_75 = arith.constant 0 : index
    %111 = tpu.strided_load %arg14[%c161, %c0_75] {strides = array<i32: 2, 1>} : memref<224x10xf32, #tpu.memory_space<vmem>>, vector<7x10xf32>
    %c176 = arith.constant 176 : index
    %c0_76 = arith.constant 0 : index
    %112 = tpu.strided_load %arg14[%c176, %c0_76] {strides = array<i32: 2, 1>} : memref<224x10xf32, #tpu.memory_space<vmem>>, vector<7x10xf32>
    %113 = arith.maximumf %110, %112 : vector<7x10xf32>
    %c177 = arith.constant 177 : index
    %c0_77 = arith.constant 0 : index
    %114 = tpu.strided_load %arg14[%c177, %c0_77] {strides = array<i32: 2, 1>} : memref<224x10xf32, #tpu.memory_space<vmem>>, vector<7x10xf32>
    %115 = arith.maximumf %111, %114 : vector<7x10xf32>
    %116 = arith.maximumf %113, %115 : vector<7x10xf32>
    %c35_78 = arith.constant 35 : index
    %c0_79 = arith.constant 0 : index
    %117 = vector.load %arg15[%c35_78, %c0_79] : memref<56x10xf32, #tpu.memory_space<vmem>>, vector<7x10xf32>
    tpu.vector_store %arg15[%c35_78, %c0_79], %116 {strides = array<i32>} : memref<56x10xf32, #tpu.memory_space<vmem>>, vector<7x10xf32>,
    %c192 = arith.constant 192 : index
    %c0_80 = arith.constant 0 : index
    %118 = tpu.strided_load %arg14[%c192, %c0_80] {strides = array<i32: 2, 1>} : memref<224x10xf32, #tpu.memory_space<vmem>>, vector<7x10xf32>
    %c193 = arith.constant 193 : index
    %c0_81 = arith.constant 0 : index
    %119 = tpu.strided_load %arg14[%c193, %c0_81] {strides = array<i32: 2, 1>} : memref<224x10xf32, #tpu.memory_space<vmem>>, vector<7x10xf32>
    %c208 = arith.constant 208 : index
    %c0_82 = arith.constant 0 : index
    %120 = tpu.strided_load %arg14[%c208, %c0_82] {strides = array<i32: 2, 1>} : memref<224x10xf32, #tpu.memory_space<vmem>>, vector<7x10xf32>
    %121 = arith.maximumf %118, %120 : vector<7x10xf32>
    %c209 = arith.constant 209 : index
    %c0_83 = arith.constant 0 : index
    %122 = tpu.strided_load %arg14[%c209, %c0_83] {strides = array<i32: 2, 1>} : memref<224x10xf32, #tpu.memory_space<vmem>>, vector<7x10xf32>
    %123 = arith.maximumf %119, %122 : vector<7x10xf32>
    %124 = arith.maximumf %121, %123 : vector<7x10xf32>
    %c42 = arith.constant 42 : index
    %c0_84 = arith.constant 0 : index
    %125 = vector.load %arg15[%c42, %c0_84] : memref<56x10xf32, #tpu.memory_space<vmem>>, vector<7x10xf32>
    tpu.vector_store %arg15[%c42, %c0_84], %124 {strides = array<i32>} : memref<56x10xf32, #tpu.memory_space<vmem>>, vector<7x10xf32>,
    %c0_85 = arith.constant 0 : index
    %c0_86 = arith.constant 0 : index
    %c0_87 = arith.constant 0 : index
    %126 = vector.load %arg5[%c0_85, %c0_86, %c0_87] : memref<9x10x16xf32, #tpu.memory_space<vmem>>, vector<9x10x16xf32>
    %c0_88 = arith.constant 0 : index
    %c0_89 = arith.constant 0 : index
    %127 = vector.load %arg6[%c0_88, %c0_89] : memref<1x16xf32, #tpu.memory_space<vmem>>, vector<1x16xf32>
    %c0_90 = arith.constant 0 : index
    %c0_91 = arith.constant 0 : index
    %128 = vector.load %arg7[%c0_90, %c0_91] : memref<1x16xf32, #tpu.memory_space<vmem>>, vector<1x16xf32>
    %cst_92 = arith.constant 0.000000e+00 : f32
    %129 = vector.broadcast %cst_92 : f32 to vector<35x16xf32>
    %c0_93 = arith.constant 0 : index
    %c0_94 = arith.constant 0 : index
    %130 = vector.load %arg15[%c0_93, %c0_94] : memref<56x10xf32, #tpu.memory_space<vmem>>, vector<35x10xf32>
    %131 = vector.extract_strided_slice %126 {offsets = [0, 0, 0], sizes = [1, 10, 16], strides = [1, 1, 1]} : vector<9x10x16xf32> to vector<1x10x16xf32>
    %132 = vector.shape_cast %131 : vector<1x10x16xf32> to vector<10x16xf32>
    %cst_95 = arith.constant dense<0.000000e+00> : vector<35x16xf32>
    %133 = tpu.matmul %130, %132, %cst_95 {dimension_numbers = #tpu.dot_dimension_numbers<[1], [0], [0], [1], [0, 0, 1, 1], [], []>} : vector<35x10xf32>, vector<10x16xf32>, vector<35x16xf32> -> vector<35x16xf32>
    %134 = arith.addf %129, %133 : vector<35x16xf32>
    %c1_96 = arith.constant 1 : index
    %c0_97 = arith.constant 0 : index
    %135 = vector.load %arg15[%c1_96, %c0_97] : memref<56x10xf32, #tpu.memory_space<vmem>>, vector<35x10xf32>
    %136 = vector.extract_strided_slice %126 {offsets = [1, 0, 0], sizes = [1, 10, 16], strides = [1, 1, 1]} : vector<9x10x16xf32> to vector<1x10x16xf32>
    %137 = vector.shape_cast %136 : vector<1x10x16xf32> to vector<10x16xf32>
    %cst_98 = arith.constant dense<0.000000e+00> : vector<35x16xf32>
    %138 = tpu.matmul %135, %137, %cst_98 {dimension_numbers = #tpu.dot_dimension_numbers<[1], [0], [0], [1], [0, 0, 1, 1], [], []>} : vector<35x10xf32>, vector<10x16xf32>, vector<35x16xf32> -> vector<35x16xf32>
    %139 = arith.addf %134, %138 : vector<35x16xf32>
    %c2_99 = arith.constant 2 : index
    %c0_100 = arith.constant 0 : index
    %140 = vector.load %arg15[%c2_99, %c0_100] : memref<56x10xf32, #tpu.memory_space<vmem>>, vector<35x10xf32>
    %141 = vector.extract_strided_slice %126 {offsets = [2, 0, 0], sizes = [1, 10, 16], strides = [1, 1, 1]} : vector<9x10x16xf32> to vector<1x10x16xf32>
    %142 = vector.shape_cast %141 : vector<1x10x16xf32> to vector<10x16xf32>
    %cst_101 = arith.constant dense<0.000000e+00> : vector<35x16xf32>
    %143 = tpu.matmul %140, %142, %cst_101 {dimension_numbers = #tpu.dot_dimension_numbers<[1], [0], [0], [1], [0, 0, 1, 1], [], []>} : vector<35x10xf32>, vector<10x16xf32>, vector<35x16xf32> -> vector<35x16xf32>
    %144 = arith.addf %139, %143 : vector<35x16xf32>
    %c7_102 = arith.constant 7 : index
    %c0_103 = arith.constant 0 : index
    %145 = vector.load %arg15[%c7_102, %c0_103] : memref<56x10xf32, #tpu.memory_space<vmem>>, vector<35x10xf32>
    %146 = vector.extract_strided_slice %126 {offsets = [3, 0, 0], sizes = [1, 10, 16], strides = [1, 1, 1]} : vector<9x10x16xf32> to vector<1x10x16xf32>
    %147 = vector.shape_cast %146 : vector<1x10x16xf32> to vector<10x16xf32>
    %cst_104 = arith.constant dense<0.000000e+00> : vector<35x16xf32>
    %148 = tpu.matmul %145, %147, %cst_104 {dimension_numbers = #tpu.dot_dimension_numbers<[1], [0], [0], [1], [0, 0, 1, 1], [], []>} : vector<35x10xf32>, vector<10x16xf32>, vector<35x16xf32> -> vector<35x16xf32>
    %149 = arith.addf %144, %148 : vector<35x16xf32>
    %c8 = arith.constant 8 : index
    %c0_105 = arith.constant 0 : index
    %150 = vector.load %arg15[%c8, %c0_105] : memref<56x10xf32, #tpu.memory_space<vmem>>, vector<35x10xf32>
    %151 = vector.extract_strided_slice %126 {offsets = [4, 0, 0], sizes = [1, 10, 16], strides = [1, 1, 1]} : vector<9x10x16xf32> to vector<1x10x16xf32>
    %152 = vector.shape_cast %151 : vector<1x10x16xf32> to vector<10x16xf32>
    %cst_106 = arith.constant dense<0.000000e+00> : vector<35x16xf32>
    %153 = tpu.matmul %150, %152, %cst_106 {dimension_numbers = #tpu.dot_dimension_numbers<[1], [0], [0], [1], [0, 0, 1, 1], [], []>} : vector<35x10xf32>, vector<10x16xf32>, vector<35x16xf32> -> vector<35x16xf32>
    %154 = arith.addf %149, %153 : vector<35x16xf32>
    %c9 = arith.constant 9 : index
    %c0_107 = arith.constant 0 : index
    %155 = vector.load %arg15[%c9, %c0_107] : memref<56x10xf32, #tpu.memory_space<vmem>>, vector<35x10xf32>
    %156 = vector.extract_strided_slice %126 {offsets = [5, 0, 0], sizes = [1, 10, 16], strides = [1, 1, 1]} : vector<9x10x16xf32> to vector<1x10x16xf32>
    %157 = vector.shape_cast %156 : vector<1x10x16xf32> to vector<10x16xf32>
    %cst_108 = arith.constant dense<0.000000e+00> : vector<35x16xf32>
    %158 = tpu.matmul %155, %157, %cst_108 {dimension_numbers = #tpu.dot_dimension_numbers<[1], [0], [0], [1], [0, 0, 1, 1], [], []>} : vector<35x10xf32>, vector<10x16xf32>, vector<35x16xf32> -> vector<35x16xf32>
    %159 = arith.addf %154, %158 : vector<35x16xf32>
    %c14_109 = arith.constant 14 : index
    %c0_110 = arith.constant 0 : index
    %160 = vector.load %arg15[%c14_109, %c0_110] : memref<56x10xf32, #tpu.memory_space<vmem>>, vector<35x10xf32>
    %161 = vector.extract_strided_slice %126 {offsets = [6, 0, 0], sizes = [1, 10, 16], strides = [1, 1, 1]} : vector<9x10x16xf32> to vector<1x10x16xf32>
    %162 = vector.shape_cast %161 : vector<1x10x16xf32> to vector<10x16xf32>
    %cst_111 = arith.constant dense<0.000000e+00> : vector<35x16xf32>
    %163 = tpu.matmul %160, %162, %cst_111 {dimension_numbers = #tpu.dot_dimension_numbers<[1], [0], [0], [1], [0, 0, 1, 1], [], []>} : vector<35x10xf32>, vector<10x16xf32>, vector<35x16xf32> -> vector<35x16xf32>
    %164 = arith.addf %159, %163 : vector<35x16xf32>
    %c15 = arith.constant 15 : index
    %c0_112 = arith.constant 0 : index
    %165 = vector.load %arg15[%c15, %c0_112] : memref<56x10xf32, #tpu.memory_space<vmem>>, vector<35x10xf32>
    %166 = vector.extract_strided_slice %126 {offsets = [7, 0, 0], sizes = [1, 10, 16], strides = [1, 1, 1]} : vector<9x10x16xf32> to vector<1x10x16xf32>
    %167 = vector.shape_cast %166 : vector<1x10x16xf32> to vector<10x16xf32>
    %cst_113 = arith.constant dense<0.000000e+00> : vector<35x16xf32>
    %168 = tpu.matmul %165, %167, %cst_113 {dimension_numbers = #tpu.dot_dimension_numbers<[1], [0], [0], [1], [0, 0, 1, 1], [], []>} : vector<35x10xf32>, vector<10x16xf32>, vector<35x16xf32> -> vector<35x16xf32>
    %169 = arith.addf %164, %168 : vector<35x16xf32>
    %c16_114 = arith.constant 16 : index
    %c0_115 = arith.constant 0 : index
    %170 = vector.load %arg15[%c16_114, %c0_115] : memref<56x10xf32, #tpu.memory_space<vmem>>, vector<35x10xf32>
    %171 = vector.extract_strided_slice %126 {offsets = [8, 0, 0], sizes = [1, 10, 16], strides = [1, 1, 1]} : vector<9x10x16xf32> to vector<1x10x16xf32>
    %172 = vector.shape_cast %171 : vector<1x10x16xf32> to vector<10x16xf32>
    %cst_116 = arith.constant dense<0.000000e+00> : vector<35x16xf32>
    %173 = tpu.matmul %170, %172, %cst_116 {dimension_numbers = #tpu.dot_dimension_numbers<[1], [0], [0], [1], [0, 0, 1, 1], [], []>} : vector<35x10xf32>, vector<10x16xf32>, vector<35x16xf32> -> vector<35x16xf32>
    %174 = arith.addf %169, %173 : vector<35x16xf32>
    %175 = vector.broadcast %127 : vector<1x16xf32> to vector<35x16xf32>
    %176 = arith.addf %174, %175 : vector<35x16xf32>
    %cst_117 = arith.constant 0.000000e+00 : f32
    %177 = vector.broadcast %cst_117 : f32 to vector<35x16xf32>
    %178 = arith.cmpf ogt, %176, %177 : vector<35x16xf32>
    %179 = vector.broadcast %128 : vector<1x16xf32> to vector<35x16xf32>
    %180 = arith.mulf %179, %176 : vector<35x16xf32>
    %181 = arith.select %178, %176, %180 : vector<35x16xi1>, vector<35x16xf32>
    %c0_118 = arith.constant 0 : index
    %c0_119 = arith.constant 0 : index
    %182 = vector.load %arg16[%c0_118, %c0_119] : memref<40x16xf32, #tpu.memory_space<vmem>>, vector<35x16xf32>
    tpu.vector_store %arg16[%c0_118, %c0_119], %181 {strides = array<i32>} : memref<40x16xf32, #tpu.memory_space<vmem>>, vector<35x16xf32>,
    %c0_120 = arith.constant 0 : index
    %c0_121 = arith.constant 0 : index
    %c0_122 = arith.constant 0 : index
    %183 = vector.load %arg8[%c0_120, %c0_121, %c0_122] : memref<9x16x32xf32, #tpu.memory_space<vmem>>, vector<9x16x32xf32>
    %c0_123 = arith.constant 0 : index
    %c0_124 = arith.constant 0 : index
    %184 = vector.load %arg9[%c0_123, %c0_124] : memref<1x32xf32, #tpu.memory_space<vmem>>, vector<1x32xf32>
    %c0_125 = arith.constant 0 : index
    %c0_126 = arith.constant 0 : index
    %185 = vector.load %arg10[%c0_125, %c0_126] : memref<1x32xf32, #tpu.memory_space<vmem>>, vector<1x32xf32>
    %cst_127 = arith.constant 0.000000e+00 : f32
    %186 = vector.broadcast %cst_127 : f32 to vector<21x32xf32>
    %c0_128 = arith.constant 0 : index
    %c0_129 = arith.constant 0 : index
    %187 = vector.load %arg16[%c0_128, %c0_129] : memref<40x16xf32, #tpu.memory_space<vmem>>, vector<21x16xf32>
    %188 = vector.extract_strided_slice %183 {offsets = [0, 0, 0], sizes = [1, 16, 32], strides = [1, 1, 1]} : vector<9x16x32xf32> to vector<1x16x32xf32>
    %189 = vector.shape_cast %188 : vector<1x16x32xf32> to vector<16x32xf32>
    %cst_130 = arith.constant dense<0.000000e+00> : vector<21x32xf32>
    %190 = tpu.matmul %187, %189, %cst_130 {dimension_numbers = #tpu.dot_dimension_numbers<[1], [0], [0], [1], [0, 0, 1, 1], [], []>} : vector<21x16xf32>, vector<16x32xf32>, vector<21x32xf32> -> vector<21x32xf32>
    %191 = arith.addf %186, %190 : vector<21x32xf32>
    %c1_131 = arith.constant 1 : index
    %c0_132 = arith.constant 0 : index
    %192 = vector.load %arg16[%c1_131, %c0_132] : memref<40x16xf32, #tpu.memory_space<vmem>>, vector<21x16xf32>
    %193 = vector.extract_strided_slice %183 {offsets = [1, 0, 0], sizes = [1, 16, 32], strides = [1, 1, 1]} : vector<9x16x32xf32> to vector<1x16x32xf32>
    %194 = vector.shape_cast %193 : vector<1x16x32xf32> to vector<16x32xf32>
    %cst_133 = arith.constant dense<0.000000e+00> : vector<21x32xf32>
    %195 = tpu.matmul %192, %194, %cst_133 {dimension_numbers = #tpu.dot_dimension_numbers<[1], [0], [0], [1], [0, 0, 1, 1], [], []>} : vector<21x16xf32>, vector<16x32xf32>, vector<21x32xf32> -> vector<21x32xf32>
    %196 = arith.addf %191, %195 : vector<21x32xf32>
    %c2_134 = arith.constant 2 : index
    %c0_135 = arith.constant 0 : index
    %197 = vector.load %arg16[%c2_134, %c0_135] : memref<40x16xf32, #tpu.memory_space<vmem>>, vector<21x16xf32>
    %198 = vector.extract_strided_slice %183 {offsets = [2, 0, 0], sizes = [1, 16, 32], strides = [1, 1, 1]} : vector<9x16x32xf32> to vector<1x16x32xf32>
    %199 = vector.shape_cast %198 : vector<1x16x32xf32> to vector<16x32xf32>
    %cst_136 = arith.constant dense<0.000000e+00> : vector<21x32xf32>
    %200 = tpu.matmul %197, %199, %cst_136 {dimension_numbers = #tpu.dot_dimension_numbers<[1], [0], [0], [1], [0, 0, 1, 1], [], []>} : vector<21x16xf32>, vector<16x32xf32>, vector<21x32xf32> -> vector<21x32xf32>
    %201 = arith.addf %196, %200 : vector<21x32xf32>
    %c7_137 = arith.constant 7 : index
    %c0_138 = arith.constant 0 : index
    %202 = vector.load %arg16[%c7_137, %c0_138] : memref<40x16xf32, #tpu.memory_space<vmem>>, vector<21x16xf32>
    %203 = vector.extract_strided_slice %183 {offsets = [3, 0, 0], sizes = [1, 16, 32], strides = [1, 1, 1]} : vector<9x16x32xf32> to vector<1x16x32xf32>
    %204 = vector.shape_cast %203 : vector<1x16x32xf32> to vector<16x32xf32>
    %cst_139 = arith.constant dense<0.000000e+00> : vector<21x32xf32>
    %205 = tpu.matmul %202, %204, %cst_139 {dimension_numbers = #tpu.dot_dimension_numbers<[1], [0], [0], [1], [0, 0, 1, 1], [], []>} : vector<21x16xf32>, vector<16x32xf32>, vector<21x32xf32> -> vector<21x32xf32>
    %206 = arith.addf %201, %205 : vector<21x32xf32>
    %c8_140 = arith.constant 8 : index
    %c0_141 = arith.constant 0 : index
    %207 = vector.load %arg16[%c8_140, %c0_141] : memref<40x16xf32, #tpu.memory_space<vmem>>, vector<21x16xf32>
    %208 = vector.extract_strided_slice %183 {offsets = [4, 0, 0], sizes = [1, 16, 32], strides = [1, 1, 1]} : vector<9x16x32xf32> to vector<1x16x32xf32>
    %209 = vector.shape_cast %208 : vector<1x16x32xf32> to vector<16x32xf32>
    %cst_142 = arith.constant dense<0.000000e+00> : vector<21x32xf32>
    %210 = tpu.matmul %207, %209, %cst_142 {dimension_numbers = #tpu.dot_dimension_numbers<[1], [0], [0], [1], [0, 0, 1, 1], [], []>} : vector<21x16xf32>, vector<16x32xf32>, vector<21x32xf32> -> vector<21x32xf32>
    %211 = arith.addf %206, %210 : vector<21x32xf32>
    %c9_143 = arith.constant 9 : index
    %c0_144 = arith.constant 0 : index
    %212 = vector.load %arg16[%c9_143, %c0_144] : memref<40x16xf32, #tpu.memory_space<vmem>>, vector<21x16xf32>
    %213 = vector.extract_strided_slice %183 {offsets = [5, 0, 0], sizes = [1, 16, 32], strides = [1, 1, 1]} : vector<9x16x32xf32> to vector<1x16x32xf32>
    %214 = vector.shape_cast %213 : vector<1x16x32xf32> to vector<16x32xf32>
    %cst_145 = arith.constant dense<0.000000e+00> : vector<21x32xf32>
    %215 = tpu.matmul %212, %214, %cst_145 {dimension_numbers = #tpu.dot_dimension_numbers<[1], [0], [0], [1], [0, 0, 1, 1], [], []>} : vector<21x16xf32>, vector<16x32xf32>, vector<21x32xf32> -> vector<21x32xf32>
    %216 = arith.addf %211, %215 : vector<21x32xf32>
    %c14_146 = arith.constant 14 : index
    %c0_147 = arith.constant 0 : index
    %217 = vector.load %arg16[%c14_146, %c0_147] : memref<40x16xf32, #tpu.memory_space<vmem>>, vector<21x16xf32>
    %218 = vector.extract_strided_slice %183 {offsets = [6, 0, 0], sizes = [1, 16, 32], strides = [1, 1, 1]} : vector<9x16x32xf32> to vector<1x16x32xf32>
    %219 = vector.shape_cast %218 : vector<1x16x32xf32> to vector<16x32xf32>
    %cst_148 = arith.constant dense<0.000000e+00> : vector<21x32xf32>
    %220 = tpu.matmul %217, %219, %cst_148 {dimension_numbers = #tpu.dot_dimension_numbers<[1], [0], [0], [1], [0, 0, 1, 1], [], []>} : vector<21x16xf32>, vector<16x32xf32>, vector<21x32xf32> -> vector<21x32xf32>
    %221 = arith.addf %216, %220 : vector<21x32xf32>
    %c15_149 = arith.constant 15 : index
    %c0_150 = arith.constant 0 : index
    %222 = vector.load %arg16[%c15_149, %c0_150] : memref<40x16xf32, #tpu.memory_space<vmem>>, vector<21x16xf32>
    %223 = vector.extract_strided_slice %183 {offsets = [7, 0, 0], sizes = [1, 16, 32], strides = [1, 1, 1]} : vector<9x16x32xf32> to vector<1x16x32xf32>
    %224 = vector.shape_cast %223 : vector<1x16x32xf32> to vector<16x32xf32>
    %cst_151 = arith.constant dense<0.000000e+00> : vector<21x32xf32>
    %225 = tpu.matmul %222, %224, %cst_151 {dimension_numbers = #tpu.dot_dimension_numbers<[1], [0], [0], [1], [0, 0, 1, 1], [], []>} : vector<21x16xf32>, vector<16x32xf32>, vector<21x32xf32> -> vector<21x32xf32>
    %226 = arith.addf %221, %225 : vector<21x32xf32>
    %c16_152 = arith.constant 16 : index
    %c0_153 = arith.constant 0 : index
    %227 = vector.load %arg16[%c16_152, %c0_153] : memref<40x16xf32, #tpu.memory_space<vmem>>, vector<21x16xf32>
    %228 = vector.extract_strided_slice %183 {offsets = [8, 0, 0], sizes = [1, 16, 32], strides = [1, 1, 1]} : vector<9x16x32xf32> to vector<1x16x32xf32>
    %229 = vector.shape_cast %228 : vector<1x16x32xf32> to vector<16x32xf32>
    %cst_154 = arith.constant dense<0.000000e+00> : vector<21x32xf32>
    %230 = tpu.matmul %227, %229, %cst_154 {dimension_numbers = #tpu.dot_dimension_numbers<[1], [0], [0], [1], [0, 0, 1, 1], [], []>} : vector<21x16xf32>, vector<16x32xf32>, vector<21x32xf32> -> vector<21x32xf32>
    %231 = arith.addf %226, %230 : vector<21x32xf32>
    %232 = vector.broadcast %184 : vector<1x32xf32> to vector<21x32xf32>
    %233 = arith.addf %231, %232 : vector<21x32xf32>
    %cst_155 = arith.constant 0.000000e+00 : f32
    %234 = vector.broadcast %cst_155 : f32 to vector<21x32xf32>
    %235 = arith.cmpf ogt, %233, %234 : vector<21x32xf32>
    %236 = vector.broadcast %185 : vector<1x32xf32> to vector<21x32xf32>
    %237 = arith.mulf %236, %233 : vector<21x32xf32>
    %238 = arith.select %235, %233, %237 : vector<21x32xi1>, vector<21x32xf32>
    %c0_156 = arith.constant 0 : index
    %c0_157 = arith.constant 0 : index
    %239 = vector.load %arg11[%c0_156, %c0_157] : memref<32x6xf32, #tpu.memory_space<vmem>>, vector<32x6xf32>
    %cst_158 = arith.constant dense<0.000000e+00> : vector<21x6xf32>
    %240 = tpu.matmul %238, %239, %cst_158 {dimension_numbers = #tpu.dot_dimension_numbers<[1], [0], [0], [1], [0, 0, 1, 1], [], []>} : vector<21x32xf32>, vector<32x6xf32>, vector<21x6xf32> -> vector<21x6xf32>
    %c0_159 = arith.constant 0 : index
    %c0_160 = arith.constant 0 : index
    %241 = vector.load %arg12[%c0_159, %c0_160] : memref<1x6xf32, #tpu.memory_space<vmem>>, vector<1x6xf32>
    %242 = vector.broadcast %241 : vector<1x6xf32> to vector<21x6xf32>
    %243 = arith.addf %240, %242 : vector<21x6xf32>
    %244 = vector.extract_strided_slice %243 {offsets = [0, 1], sizes = [21, 1], strides = [1, 1]} : vector<21x6xf32> to vector<21x1xf32>
    %245 = vector.extract_strided_slice %243 {offsets = [0, 0], sizes = [21, 1], strides = [1, 1]} : vector<21x6xf32> to vector<21x1xf32>
    %246 = arith.subf %244, %245 : vector<21x1xf32>
    %247 = math.exp %246 : vector<21x1xf32>
    %cst_161 = arith.constant 1.000000e+00 : f32
    %248 = vector.broadcast %cst_161 : f32 to vector<21x1xf32>
    %249 = arith.addf %248, %247 : vector<21x1xf32>
    %cst_162 = arith.constant 1.000000e+00 : f32
    %250 = vector.broadcast %cst_162 : f32 to vector<21x1xf32>
    %251 = arith.divf %250, %249 : vector<21x1xf32>
    %cst_163 = arith.constant 1.000000e+00 : f32
    %252 = vector.broadcast %cst_163 : f32 to vector<21x1xf32>
    %253 = arith.subf %252, %251 : vector<21x1xf32>
    %254 = vector.extract_strided_slice %243 {offsets = [0, 2], sizes = [21, 4], strides = [1, 1]} : vector<21x6xf32> to vector<21x4xf32>
    %255 = tpu.concatenate %251, %253, %254 in 1 : vector<21x1xf32>, vector<21x1xf32>, vector<21x4xf32> -> vector<21x6xf32>
    %c0_164 = arith.constant 0 : index
    %c0_165 = arith.constant 0 : index
    %c0_166 = arith.constant 0 : index
    %256 = vector.load %arg13[%c0_164, %c0_165, %c0_166] : memref<1x21x6xf32, #tpu.memory_space<vmem>>, vector<1x21x6xf32>
    %257 = vector.shape_cast %256 : vector<1x21x6xf32> to vector<21x6xf32>
    %258 = vector.shape_cast %255 : vector<21x6xf32> to vector<1x21x6xf32>
    tpu.vector_store %arg13[%c0_164, %c0_165, %c0_166], %258 {strides = array<i32>} : memref<1x21x6xf32, #tpu.memory_space<vmem>>, vector<1x21x6xf32>,
    return
  }
  func.func @transform_0(%arg0: i32) -> (i32, i32, i32) {
    %c0_i32 = arith.constant 0 : i32
    %c0_i32_0 = arith.constant 0 : i32
    %c0_i32_1 = arith.constant 0 : i32
    return %arg0, %c0_i32, %c0_i32_0 : i32, i32, i32
  }
  func.func @transform_1(%arg0: i32) -> (i32, i32, i32) {
    %c0_i32 = arith.constant 0 : i32
    %c0_i32_0 = arith.constant 0 : i32
    %c0_i32_1 = arith.constant 0 : i32
    %c0_i32_2 = arith.constant 0 : i32
    return %c0_i32, %c0_i32_0, %c0_i32_1 : i32, i32, i32
  }
  func.func @transform_2(%arg0: i32) -> (i32, i32) {
    %c0_i32 = arith.constant 0 : i32
    %c0_i32_0 = arith.constant 0 : i32
    %c0_i32_1 = arith.constant 0 : i32
    return %c0_i32, %c0_i32_0 : i32, i32
  }
  func.func @transform_3(%arg0: i32) -> (i32, i32) {
    %c0_i32 = arith.constant 0 : i32
    %c0_i32_0 = arith.constant 0 : i32
    %c0_i32_1 = arith.constant 0 : i32
    return %c0_i32, %c0_i32_0 : i32, i32
  }
  func.func @transform_4(%arg0: i32) -> (i32, i32, i32) {
    %c0_i32 = arith.constant 0 : i32
    %c0_i32_0 = arith.constant 0 : i32
    %c0_i32_1 = arith.constant 0 : i32
    %c0_i32_2 = arith.constant 0 : i32
    return %c0_i32, %c0_i32_0, %c0_i32_1 : i32, i32, i32
  }
  func.func @transform_5(%arg0: i32) -> (i32, i32) {
    %c0_i32 = arith.constant 0 : i32
    %c0_i32_0 = arith.constant 0 : i32
    %c0_i32_1 = arith.constant 0 : i32
    return %c0_i32, %c0_i32_0 : i32, i32
  }
  func.func @transform_6(%arg0: i32) -> (i32, i32) {
    %c0_i32 = arith.constant 0 : i32
    %c0_i32_0 = arith.constant 0 : i32
    %c0_i32_1 = arith.constant 0 : i32
    return %c0_i32, %c0_i32_0 : i32, i32
  }
  func.func @transform_7(%arg0: i32) -> (i32, i32, i32) {
    %c0_i32 = arith.constant 0 : i32
    %c0_i32_0 = arith.constant 0 : i32
    %c0_i32_1 = arith.constant 0 : i32
    %c0_i32_2 = arith.constant 0 : i32
    return %c0_i32, %c0_i32_0, %c0_i32_1 : i32, i32, i32
  }
  func.func @transform_8(%arg0: i32) -> (i32, i32) {
    %c0_i32 = arith.constant 0 : i32
    %c0_i32_0 = arith.constant 0 : i32
    %c0_i32_1 = arith.constant 0 : i32
    return %c0_i32, %c0_i32_0 : i32, i32
  }
  func.func @transform_9(%arg0: i32) -> (i32, i32) {
    %c0_i32 = arith.constant 0 : i32
    %c0_i32_0 = arith.constant 0 : i32
    %c0_i32_1 = arith.constant 0 : i32
    return %c0_i32, %c0_i32_0 : i32, i32
  }
  func.func @transform_10(%arg0: i32) -> (i32, i32) {
    %c0_i32 = arith.constant 0 : i32
    %c0_i32_0 = arith.constant 0 : i32
    %c0_i32_1 = arith.constant 0 : i32
    return %c0_i32, %c0_i32_0 : i32, i32
  }
  func.func @transform_11(%arg0: i32) -> (i32, i32) {
    %c0_i32 = arith.constant 0 : i32
    %c0_i32_0 = arith.constant 0 : i32
    %c0_i32_1 = arith.constant 0 : i32
    return %c0_i32, %c0_i32_0 : i32, i32
  }
  func.func @transform_12(%arg0: i32) -> (i32, i32, i32) {
    %c0_i32 = arith.constant 0 : i32
    %c0_i32_0 = arith.constant 0 : i32
    %c0_i32_1 = arith.constant 0 : i32
    return %arg0, %c0_i32, %c0_i32_0 : i32, i32, i32
  }
}

</mosaic_0001>

<bundles_post_ra>
// kernel: tpu_custom_call.1
= control target key start
LH: loop header
LB: loop body
LE: loop exit
PB: predicated region body
PF: predicated region fallthrough
CT: control target
= control target key end

     0   :  { %s4446_s21 = smov 0   ;;  %s5924_s0 = inlined_call_operand.vmem [shape: f32[2,264,3], index: 0, kind: input, shape index: {}]   ;;  %s5925_s1 = inlined_call_operand.vmem [shape: f32[9,3,10], index: 1, kind: input, shape index: {}]   ;;  %s5926_s2 = inlined_call_operand.vmem [shape: f32[1,10], index: 2, kind: input, shape index: {}]   ;;  %s5927_s3 = inlined_call_operand.vmem [shape: f32[1,10], index: 3, kind: input, shape index: {}]   ;;  %s5928_s4 = inlined_call_operand.vmem [shape: f32[9,10,16], index: 4, kind: input, shape index: {}]   ;;  %s5929_s5 = inlined_call_operand.vmem [shape: f32[1,16], index: 5, kind: input, shape index: {}]   ;;  %s5930_s6 = inlined_call_operand.vmem [shape: f32[1,16], index: 6, kind: input, shape index: {}]   ;;  %s5931_s7 = inlined_call_operand.vmem [shape: f32[9,16,32], index: 7, kind: input, shape index: {}]   ;;  %s5932_s8 = inlined_call_operand.vmem [shape: f32[1,32], index: 8, kind: input, shape index: {}]   ;;  %s5933_s9 = inlined_call_operand.vmem [shape: f32[1,32], index: 9, kind: input, shape index: {}]   ;;  %s5934_s10 = inlined_call_operand.vmem [shape: f32[32,6], index: 10, kind: input, shape index: {}]   ;;  %s5935_s11 = inlined_call_operand.vmem [shape: f32[1,6], index: 11, kind: input, shape index: {}]   ;;  %s5936_s12 = inlined_call_operand.vmem [shape: f32[2,21,6], index: 12, kind: output, shape index: {}]  }
   0x1 LB: > { %s3982_s22 = sadd.s32 4294967295, %s4376_s21   ;;  %p3986_p0 = scmp.ge.s32.totalorder %s4376_s21, 1  ;;  %s4376_s21 = sphi %s4446_s21, %s22_s21  }
   0x2   : > { %p362_p1 = scmp.lt.s32.totalorder %s4376_s21, 3 }
   0x4   : > { %p363_p2 = pnand %p3986_p0, %p362_p1 }
   0x6   : > { %366 = sbr.rel (%p363_p2) target bundleno = 1571 (0x623), region = 68 }
   0xb   : > { %v419_v0 = vld [vmem:[%s5925_s1 + $0x4] sm:$0x7]  ;;  %vm570_vm0 = vcmask 1042432   ;;  %v418_v1 = vld [vmem:[%s5925_s1] sm:$0x7]  ;;  %p404_p3 = scmp.lt.s32.totalorder %s3982_s22, 1 }
   0xc   : > { %3989 = vmatpush.msk.msra.mxu0 %vm570_vm0, %v419_v0  ;;  %4336 = vmatpush.msk.msra.mxu2 %vm570_vm0, %v419_v0  ;;  %v422_v2 = vld [vmem:[%s5925_s1 + $0x10] sm:$0x7]  ;;  %v420_v3 = vld [vmem:[%s5925_s1 + $0x8] sm:$0x7]  ;;  %v421_v4 = vld [vmem:[%s5925_s1 + $0xc] sm:$0x7] }
   0xd   : > { %4018 = vmatpush.msk.msra.mxu1 %vm570_vm0, %v418_v1  ;;  %s6062_s22 = smov (!%p404_p3, %s3982_s22), 1  ;;  %4337 = vmatpush.msk.msra.mxu3 %vm570_vm0, %v418_v1  ;;  %vm485_vm1 = vcmask 23552   ;;  %vm2846_vm2 = vcmask 1041408   ;;  %vm2689_vm4 = vcmask 80896   ;;  %vm414_vm9 = vcmask 79872   ;;  %s4379_s28 = smov 1  }
   0xe   : > { %4105 = vmatpush.msk.msrb.mxu0 %vm570_vm0, %v422_v2  ;;  %4047 = vmatpush.msk.msrb.mxu2 %vm570_vm0, %v420_v3  ;;  %s4338_s15 = smul.u32 264, %s6062_s22  ;;  %s4380_s29 = smov 127  }
   0xf   : > { %4076 = vmatpush.msk.msrb.mxu3 %vm570_vm0, %v421_v4 }
  0x10   : > { %s4482_s18 = scalar_lea.vmem %s5924_s0, %s4338_s15 }
  0x11   : > { %v457_v5 = vld [vmem:[%s4482_s18 + $0x1] sm:$0xff]  ;;  %v483_v6 = vld [vmem:[%s4482_s18 + $0xd1] sm:$0xff]  ;;  %v458_v9 = vld [vmem:[%s4482_s18 + $0x9] sm:$0xff] }
  0x12   : > { %v429_v7 = vld [vmem:[%s4482_s18] sm:$0xff]  ;;  %3990 = vmatmul.msk.f32.vlgmr.msra.gmra.mxu0 %vm485_vm1, %v457_v5  ;;  %4016 = vmatmul.msk.f32.vlgmr.msra.gmra.mxu2 %vm485_vm1, %v483_v6  ;;  %v4491_v8 = vld [vmem:[%s4482_s18 + $0xd8] sm:$0xff]  ;;  %v430_v11 = vld [vmem:[%s4482_s18 + $0x8] sm:$0xff] }
  0x13   : > { %4019 = vmatmul.msk.f32.vlgmr.msra.gmra.mxu1 %vm485_vm1, %v429_v7  ;;  %4046 = vmatmul.msk.f32.vlgmr.msra.gmra.mxu3 %vm485_vm1, %v4491_v8  ;;  %v484_v10 = vld [vmem:[%s4482_s18 + $0xd9] sm:$0xff]  ;;  %v431_v12 = vld [vmem:[%s4482_s18 + $0x10] sm:$0xff]  ;;  %v863_v14 = vld [vmem:[%s4482_s18 + $0x2] sm:$0xff] }
  0x14   : > { %v4504_v13 = vld [vmem:[%s4482_s18 + $0x11] sm:$0xff]  ;;  %v4514_v16 = vld [vmem:[%s4482_s18 + $0x19] sm:$0xff]  ;;  %v4527_v19 = vld [vmem:[%s4482_s18 + $0x21] sm:$0xff] }
  0x15   : > { %v432_v15 = vld [vmem:[%s4482_s18 + $0x18] sm:$0xff]  ;;  %v864_v17 = vld [vmem:[%s4482_s18 + $0xa] sm:$0xff]  ;;  %v4522_v18 = vld [vmem:[%s4482_s18 + $0x20] sm:$0xff] }
  0x16   : > { %v4530_v20 = vld [vmem:[%s4482_s18 + $0x12] sm:$0xff]  ;;  %v4539_v21 = vld [vmem:[%s4482_s18 + $0x28] sm:$0xff]  ;;  %v4547_v23 = vld [vmem:[%s4482_s18 + $0x1a] sm:$0xff] }
  0x17   : > { %v4544_v22 = vld [vmem:[%s4482_s18 + $0x29] sm:$0xff]  ;;  %v4561_v25 = vld [vmem:[%s4482_s18 + $0x31] sm:$0xff]  ;;  %v4578_v28 = vld [vmem:[%s4482_s18 + $0x39] sm:$0xff] }
  0x18   : > { %v4556_v24 = vld [vmem:[%s4482_s18 + $0x30] sm:$0xff]  ;;  %v4564_v26 = vld [vmem:[%s4482_s18 + $0x22] sm:$0xff]  ;;  %v4573_v27 = vld [vmem:[%s4482_s18 + $0x38] sm:$0xff] }
  0x19   : > { %v4581_v29 = vld [vmem:[%s4482_s18 + $0x2a] sm:$0xff]  ;;  %v4590_v30 = vld [vmem:[%s4482_s18 + $0x40] sm:$0xff]  ;;  %v4598_v32 = vld [vmem:[%s4482_s18 + $0x32] sm:$0xff] }
  0x1a   : > { %3991 = vmatmul.msk.f32.gmra.mxu0 %vm485_vm1, %v458_v9  ;;  %4017 = vmatmul.msk.f32.gmra.mxu2 %vm485_vm1, %v484_v10  ;;  %v4595_v31 = vld [vmem:[%s4482_s18 + $0x41] sm:$0xff]  ;;  %v4612_v34 = vld [vmem:[%s4482_s18 + $0x49] sm:$0xff]  ;;  %v4629_v37 = vld [vmem:[%s4482_s18 + $0x51] sm:$0xff] }
  0x1b   : > { %4020 = vmatmul.msk.f32.gmra.mxu1 %vm485_vm1, %v430_v11  ;;  %4077 = vmatmul.msk.f32.vlgmr.msrb.gmra.mxu3 %vm485_vm1, %v431_v12  ;;  %v4607_v33 = vld [vmem:[%s4482_s18 + $0x48] sm:$0xff]  ;;  %v4615_v35 = vld [vmem:[%s4482_s18 + $0x3a] sm:$0xff]  ;;  %v4624_v36 = vld [vmem:[%s4482_s18 + $0x50] sm:$0xff] }
  0x1c   : > { %v4632_v38 = vld [vmem:[%s4482_s18 + $0x42] sm:$0xff]  ;;  %v4641_v39 = vld [vmem:[%s4482_s18 + $0x58] sm:$0xff]  ;;  %v4649_v41 = vld [vmem:[%s4482_s18 + $0x4a] sm:$0xff] }
  0x1d   : > { %v4646_v40 = vld [vmem:[%s4482_s18 + $0x59] sm:$0xff]  ;;  %v4663_v43 = vld [vmem:[%s4482_s18 + $0x61] sm:$0xff]  ;;  %v4680_v46 = vld [vmem:[%s4482_s18 + $0x69] sm:$0xff] }
  0x1e   : > { %v4658_v42 = vld [vmem:[%s4482_s18 + $0x60] sm:$0xff]  ;;  %v4666_v44 = vld [vmem:[%s4482_s18 + $0x52] sm:$0xff]  ;;  %v4675_v45 = vld [vmem:[%s4482_s18 + $0x68] sm:$0xff] }
  0x1f   : > { %v4683_v47 = vld [vmem:[%s4482_s18 + $0x5a] sm:$0xff]  ;;  %v4692_v48 = vld [vmem:[%s4482_s18 + $0x70] sm:$0xff]  ;;  %v4700_v50 = vld [vmem:[%s4482_s18 + $0x62] sm:$0xff] }
  0x20   : > { %v4697_v49 = vld [vmem:[%s4482_s18 + $0x71] sm:$0xff]  ;;  %v4714_v52 = vld [vmem:[%s4482_s18 + $0x79] sm:$0xff]  ;;  %v4731_v56 = vld [vmem:[%s4482_s18 + $0x81] sm:$0xff] }
  0x21   : > { %v4709_v51 = vld [vmem:[%s4482_s18 + $0x78] sm:$0xff]  ;;  %v4717_v53 = vld [vmem:[%s4482_s18 + $0x6a] sm:$0xff]  ;;  %v4726_v54 = vld [vmem:[%s4482_s18 + $0x80] sm:$0xff] }
  0x22   : > { %3992 = vmatmul.msk.f32.gmra.mxu0 %vm485_vm1, %v4504_v13  ;;  %4048 = vmatmul.msk.f32.vlgmr.msrb.gmra.mxu2 %vm485_vm1, %v863_v14  ;;  %5967 = vst [vmem:[#allocation5_spill] sm:$0xff] %v4726_v54  ;;  %v4734_v57 = vld [vmem:[%s4482_s18 + $0x72] sm:$0xff]  ;;  %v4743_v59 = vld [vmem:[%s4482_s18 + $0x88] sm:$0xff]  ;;  %v4753_v63 = vld [vmem:[%s4482_s18 + $0x7a] sm:$0xff] }
  0x23   : > { %4021 = vmatmul.msk.f32.gmra.mxu1 %vm485_vm1, %v431_v12  ;;  %4078 = vmatmul.msk.f32.gmra.mxu3 %vm485_vm1, %v432_v15  ;;  %5968 = vst [vmem:[#allocation6_spill] sm:$0xff] %v4743_v59  ;;  %v4750_v62 = vld [vmem:[%s4482_s18 + $0x89] sm:$0xff]  ;;  %v4769_v6 = vld [vmem:[%s4482_s18 + $0x91] sm:$0xff] }
  0x24   : > { %v4762_v2 = vld [vmem:[%s4482_s18 + $0x90] sm:$0xff]  ;;  %v4772_v7 = vld [vmem:[%s4482_s18 + $0x82] sm:$0xff]  ;;  %v4781_v11 = vld [vmem:[%s4482_s18 + $0x98] sm:$0xff] }
  0x25   : > { %5970 = vst [vmem:[#allocation8_spill] sm:$0xff] %v4762_v2 }
  0x26   : > { %5972 = vst [vmem:[#allocation10_spill] sm:$0xff] %v4781_v11 }
  0x2a   : > { %3993 = vmatmul.msk.f32.gmra.mxu0 %vm485_vm1, %v4514_v16  ;;  %4049 = vmatmul.msk.f32.gmra.mxu2 %vm485_vm1, %v864_v17 }
  0x2b   : > { %4022 = vmatmul.msk.f32.gmra.mxu1 %vm485_vm1, %v432_v15  ;;  %4079 = vmatmul.msk.f32.gmra.mxu3 %vm485_vm1, %v4522_v18 }
  0x32   : > { %3994 = vmatmul.msk.f32.gmra.mxu0 %vm485_vm1, %v4527_v19  ;;  %4050 = vmatmul.msk.f32.gmra.mxu2 %vm485_vm1, %v4530_v20 }
  0x33   : > { %4023 = vmatmul.msk.f32.gmra.mxu1 %vm485_vm1, %v4522_v18  ;;  %4080 = vmatmul.msk.f32.gmra.mxu3 %vm485_vm1, %v4539_v21 }
  0x3a   : > { %3995 = vmatmul.msk.f32.gmra.mxu0 %vm485_vm1, %v4544_v22  ;;  %4051 = vmatmul.msk.f32.gmra.mxu2 %vm485_vm1, %v4547_v23 }
  0x3b   : > { %4024 = vmatmul.msk.f32.gmra.mxu1 %vm485_vm1, %v4539_v21  ;;  %4081 = vmatmul.msk.f32.gmra.mxu3 %vm485_vm1, %v4556_v24 }
  0x42   : > { %3996 = vmatmul.msk.f32.gmra.mxu0 %vm485_vm1, %v4561_v25  ;;  %4052 = vmatmul.msk.f32.gmra.mxu2 %vm485_vm1, %v4564_v26 }
  0x43   : > { %4025 = vmatmul.msk.f32.gmra.mxu1 %vm485_vm1, %v4556_v24  ;;  %4082 = vmatmul.msk.f32.gmra.mxu3 %vm485_vm1, %v4573_v27 }
  0x4a   : > { %3997 = vmatmul.msk.f32.gmra.mxu0 %vm485_vm1, %v4578_v28  ;;  %4053 = vmatmul.msk.f32.gmra.mxu2 %vm485_vm1, %v4581_v29 }
  0x4b   : > { %4026 = vmatmul.msk.f32.gmra.mxu1 %vm485_vm1, %v4573_v27  ;;  %4083 = vmatmul.msk.f32.gmra.mxu3 %vm485_vm1, %v4590_v30 }
  0x52   : > { %3998 = vmatmul.msk.f32.gmra.mxu0 %vm485_vm1, %v4595_v31  ;;  %4054 = vmatmul.msk.f32.gmra.mxu2 %vm485_vm1, %v4598_v32 }
  0x53   : > { %4027 = vmatmul.msk.f32.gmra.mxu1 %vm485_vm1, %v4590_v30  ;;  %4084 = vmatmul.msk.f32.gmra.mxu3 %vm485_vm1, %v4607_v33 }
  0x5a   : > { %3999 = vmatmul.msk.f32.gmra.mxu0 %vm485_vm1, %v4612_v34  ;;  %4055 = vmatmul.msk.f32.gmra.mxu2 %vm485_vm1, %v4615_v35 }
  0x5b   : > { %4028 = vmatmul.msk.f32.gmra.mxu1 %vm485_vm1, %v4607_v33  ;;  %4085 = vmatmul.msk.f32.gmra.mxu3 %vm485_vm1, %v4624_v36 }
  0x62   : > { %4000 = vmatmul.msk.f32.gmra.mxu0 %vm485_vm1, %v4629_v37  ;;  %4056 = vmatmul.msk.f32.gmra.mxu2 %vm485_vm1, %v4632_v38 }
  0x63   : > { %4029 = vmatmul.msk.f32.gmra.mxu1 %vm485_vm1, %v4624_v36  ;;  %4086 = vmatmul.msk.f32.gmra.mxu3 %vm485_vm1, %v4641_v39 }
  0x6a   : > { %4001 = vmatmul.msk.f32.gmra.mxu0 %vm485_vm1, %v4646_v40  ;;  %4057 = vmatmul.msk.f32.gmra.mxu2 %vm485_vm1, %v4649_v41 }
  0x6b   : > { %4030 = vmatmul.msk.f32.gmra.mxu1 %vm485_vm1, %v4641_v39  ;;  %4087 = vmatmul.msk.f32.gmra.mxu3 %vm485_vm1, %v4658_v42 }
  0x72   : > { %4002 = vmatmul.msk.f32.gmra.mxu0 %vm485_vm1, %v4663_v43  ;;  %4058 = vmatmul.msk.f32.gmra.mxu2 %vm485_vm1, %v4666_v44 }
  0x73   : > { %4031 = vmatmul.msk.f32.gmra.mxu1 %vm485_vm1, %v4658_v42  ;;  %4088 = vmatmul.msk.f32.gmra.mxu3 %vm485_vm1, %v4675_v45 }
  0x7a   : > { %4003 = vmatmul.msk.f32.gmra.mxu0 %vm485_vm1, %v4680_v46  ;;  %4059 = vmatmul.msk.f32.gmra.mxu2 %vm485_vm1, %v4683_v47 }
  0x7b   : > { %4032 = vmatmul.msk.f32.gmra.mxu1 %vm485_vm1, %v4675_v45  ;;  %4089 = vmatmul.msk.f32.gmra.mxu3 %vm485_vm1, %v4692_v48 }
  0x82   : > { %4004 = vmatmul.msk.f32.gmra.mxu0 %vm485_vm1, %v4697_v49  ;;  %4060 = vmatmul.msk.f32.gmra.mxu2 %vm485_vm1, %v4700_v50 }
  0x83   : > { %4033 = vmatmul.msk.f32.gmra.mxu1 %vm485_vm1, %v4692_v48  ;;  %4090 = vmatmul.msk.f32.gmra.mxu3 %vm485_vm1, %v4709_v51 }
  0x8a   : > { %4005 = vmatmul.msk.f32.gmra.mxu0 %vm485_vm1, %v4714_v52  ;;  %4061 = vmatmul.msk.f32.gmra.mxu2 %vm485_vm1, %v4717_v53 }
  0x8b   : > { %4034 = vmatmul.msk.f32.gmra.mxu1 %vm485_vm1, %v4709_v51  ;;  %4091 = vmatmul.msk.f32.gmra.mxu3 %vm485_vm1, %v4726_v54 }
  0x8f   : > { %v591_v55 = vpop.f32.mrf.mxu0 }
  0x90   : > { %v779_v58 = vpop.f32.mrf.mxu1 }
  0x91   : > { %v780_v12 = vadd.f32 %v779_v58, %v591_v55  ;;  %v4800_v55 = vld [vmem:[%s4482_s18 + $0xa0] sm:$0xff] }
  0x92   : > { %4006 = vmatmul.msk.f32.gmra.mxu0 %vm485_vm1, %v4731_v56  ;;  %4062 = vmatmul.msk.f32.gmra.mxu2 %vm485_vm1, %v4734_v57  ;;  %5976 = vst [vmem:[#allocation14_spill] sm:$0xff] %v4800_v55 }
  0x93   : > { %4035 = vmatmul.msk.f32.gmra.mxu1 %vm485_vm1, %v4726_v54  ;;  %4092 = vmatmul.msk.f32.gmra.mxu3 %vm485_vm1, %v4743_v59 }
  0x95   : > { %v4747_v60 = vpop.f32.mrf.mxu2 }
  0x96   : > { %5969 = vst [vmem:[#allocation7_spill] sm:$0xff] %v4747_v60  ;;  %v860_v0 = vpop.f32.mrf.mxu3 }
  0x97   : > { %v594_v61 = vpop.f32.mrf.mxu0 }
  0x98   : > { %v782_v1 = vpop.f32.mrf.mxu1 }
  0x99   : > { %v783_v58 = vadd.f32 %v782_v1, %v594_v61  ;;  %v4819_v61 = vld [vmem:[%s4482_s18 + $0xa8] sm:$0xff] }
  0x9a   : > { %4007 = vmatmul.msk.f32.gmra.mxu0 %vm485_vm1, %v4750_v62  ;;  %4063 = vmatmul.msk.f32.gmra.mxu2 %vm485_vm1, %v4753_v63  ;;  %5980 = vst [vmem:[#allocation18_spill] sm:$0xff] %v4819_v61 }
  0x9b   : > { %4036 = vmatmul.msk.f32.gmra.mxu1 %vm485_vm1, %v4743_v59  ;;  %4093 = vmatmul.msk.f32.gmra.mxu3 %vm485_vm1, %v4762_v2 }
  0x9d   : > { %v672_v3 = vpop.f32.mrf.mxu2 }
  0x9e   : > { %v4766_v4 = vadd.f32 %v860_v0, %v672_v3  ;;  %v1239_v9 = vpop.f32.mrf.mxu3  ;;  %v4786_v0 = vld [vmem:[%s4482_s18 + $0x99] sm:$0xff]  ;;  %v4789_v3 = vld [vmem:[%s4482_s18 + $0x8a] sm:$0xff] }
  0x9f   : > { %v597_v5 = vpop.f32.mrf.mxu0  ;;  %5973 = vst [vmem:[#allocation11_spill] sm:$0xff] %v4786_v0 }
  0xa0   : > { %5971 = vst [vmem:[#allocation9_spill] sm:$0xff] %v4766_v4  ;;  %v785_v10 = vpop.f32.mrf.mxu1 }
  0xa1   : > { %5974 = vst [vmem:[#allocation12_spill] sm:$0xff] %v4789_v3  ;;  %v786_v1 = vadd.f32 %v785_v10, %v597_v5  ;;  %v424_v5 = vld [vmem:[%s5925_s1 + $0x18] sm:$0x7]  ;;  %v4841_v10 = vld [vmem:[%s4482_s18 + $0xb0] sm:$0xff] }
  0xa2   : > { %4008 = vmatmul.msk.f32.gmra.mxu0 %vm485_vm1, %v4769_v6  ;;  %4064 = vmatmul.msk.f32.gmra.mxu2 %vm485_vm1, %v4772_v7  ;;  %5984 = vst [vmem:[#allocation22_spill] sm:$0xff] %v4841_v10 }
  0xa3   : > { %4037 = vmatmul.msk.f32.gmra.mxu1 %vm485_vm1, %v4762_v2  ;;  %4094 = vmatmul.msk.f32.gmra.mxu3 %vm485_vm1, %v4781_v11 }
  0xa4   : > { %4163 = vmatpush.msk.msra.mxu2 %vm570_vm0, %v424_v5 }
  0xa5   : > { %v995_v14 = vpop.f32.mrf.mxu2 }
  0xa6   : > { %v1079_v15 = vadd.f32 %v995_v14, %v780_v12  ;;  %v1242_v4 = vpop.f32.mrf.mxu3 }
  0xa7   : > { %v600_v17 = vpop.f32.mrf.mxu0 }
  0xa8   : > { %v788_v60 = vpop.f32.mrf.mxu1  ;;  %v4791_v59 = vadd.f32 %v1239_v9, %v1079_v15  ;;  %v4805_v15 = vld [vmem:[%s4482_s18 + $0xa1] sm:$0xff] }
  0xa9   : > { %5977 = vst [vmem:[#allocation15_spill] sm:$0xff] %v4805_v15 }
  0xaa   : > { %5975 = vst [vmem:[#allocation13_spill] sm:$0xff] %v4791_v59  ;;  %4009 = vmatmul.msk.f32.gmra.mxu0 %vm485_vm1, %v4786_v0  ;;  %4065 = vmatmul.msk.f32.gmra.mxu2 %vm485_vm1, %v4789_v3  ;;  %v4808_v59 = vld [vmem:[%s4482_s18 + $0x92] sm:$0xff] }
  0xab   : > { %4038 = vmatmul.msk.f32.gmra.mxu1 %vm485_vm1, %v4781_v11  ;;  %4095 = vmatmul.msk.f32.gmra.mxu3 %vm485_vm1, %v4800_v55  ;;  %5978 = vst [vmem:[#allocation16_spill] sm:$0xff] %v4808_v59 }
  0xad   : > { %v998_v12 = vpop.f32.mrf.mxu2 }
  0xae   : > { %v1080_v14 = vadd.f32 %v998_v12, %v783_v58  ;;  %v1245_v2 = vpop.f32.mrf.mxu3 }
  0xaf   : > { %v603_v9 = vpop.f32.mrf.mxu0 }
  0xb0   : > { %v791_v0 = vpop.f32.mrf.mxu1  ;;  %v4810_v3 = vadd.f32 %v1242_v4, %v1080_v14  ;;  %v4824_v14 = vld [vmem:[%s4482_s18 + $0xa9] sm:$0xff] }
  0xb1   : > { %5981 = vst [vmem:[#allocation19_spill] sm:$0xff] %v4824_v14 }
  0xb2   : > { %5979 = vst [vmem:[#allocation17_spill] sm:$0xff] %v4810_v3  ;;  %4010 = vmatmul.msk.f32.gmra.mxu0 %vm485_vm1, %v4805_v15  ;;  %4066 = vmatmul.msk.f32.gmra.mxu2 %vm485_vm1, %v4808_v59  ;;  %v4827_v3 = vld [vmem:[%s4482_s18 + $0x9a] sm:$0xff] }
  0xb3   : > { %4039 = vmatmul.msk.f32.gmra.mxu1 %vm485_vm1, %v4800_v55  ;;  %4096 = vmatmul.msk.f32.gmra.mxu3 %vm485_vm1, %v4819_v61  ;;  %5982 = vst [vmem:[#allocation20_spill] sm:$0xff] %v4827_v3  ;;  %v4851_v55 = vld [vmem:[%s4482_s18 + $0xb1] sm:$0xff] }
  0xb4   : > { %5985 = vst [vmem:[#allocation23_spill] sm:$0xff] %v4851_v55 }
  0xb5   : > { %v1001_v58 = vpop.f32.mrf.mxu2 }
  0xb6   : > { %v1081_v12 = vadd.f32 %v1001_v58, %v786_v1  ;;  %v1248_v11 = vpop.f32.mrf.mxu3  ;;  %v789_v1 = vadd.f32 %v788_v60, %v600_v17  ;;  %v4865_v60 = vld [vmem:[%s4482_s18 + $0xb8] sm:$0xff]  ;;  %v426_v17 = vld [vmem:[%s5925_s1 + $0x20] sm:$0x7] }
  0xb7   : > { %v606_v4 = vpop.f32.mrf.mxu0  ;;  %5988 = vst [vmem:[#allocation26_spill] sm:$0xff] %v4865_v60  ;;  %4221 = vmatpush.msk.msra.mxu0 %vm570_vm0, %v426_v17 }
  0xb8   : > { %v794_v15 = vpop.f32.mrf.mxu1  ;;  %v4829_v59 = vadd.f32 %v1245_v2, %v1081_v12  ;;  %v425_v2 = vld [vmem:[%s5925_s1 + $0x1c] sm:$0x7] }
  0xb9   : > { %4192 = vmatpush.msk.msra.mxu3 %vm570_vm0, %v425_v2  ;;  %v792_v2 = vadd.f32 %v791_v0, %v603_v9  ;;  %v4892_v0 = vld [vmem:[%s4482_s18 + $0xc0] sm:$0xff]  ;;  %v795_v9 = vadd.f32 %v794_v15, %v606_v4  ;;  %v4911_v15 = vld [vmem:[%s4482_s18 + $0xc8] sm:$0xff] }
  0xba   : > { %5983 = vst [vmem:[#allocation21_spill] sm:$0xff] %v4829_v59  ;;  %4011 = vmatmul.msk.f32.gmra.mxu0 %vm485_vm1, %v4824_v14  ;;  %4067 = vmatmul.msk.f32.gmra.mxu2 %vm485_vm1, %v4827_v3 }
  0xbb   : > { %4040 = vmatmul.msk.f32.gmra.mxu1 %vm485_vm1, %v4819_v61  ;;  %4097 = vmatmul.msk.f32.gmra.mxu3 %vm485_vm1, %v4841_v10  ;;  %v4854_v61 = vld [vmem:[%s4482_s18 + $0xa2] sm:$0xff]  ;;  %5991 = vst [vmem:[#allocation29_spill] sm:$0xff] %v4892_v0 }
  0xbc   : > { %5986 = vst [vmem:[#allocation24_spill] sm:$0xff] %v4854_v61 }
  0xbd   : > { %v1004_v58 = vpop.f32.mrf.mxu2  ;;  %5995 = vst [vmem:[#allocation33_spill] sm:$0xff] %v4911_v15 }
  0xbe   : > { %v1082_v12 = vadd.f32 %v1004_v58, %v789_v1  ;;  %v1251_v14 = vpop.f32.mrf.mxu3 }
  0xbf   : > { %v609_v59 = vpop.f32.mrf.mxu0 }
  0xc0   : > { %v797_v5 = vpop.f32.mrf.mxu1  ;;  %v4856_v3 = vadd.f32 %v1248_v11, %v1082_v12  ;;  %v423_v11 = vld [vmem:[%s5925_s1 + $0x14] sm:$0x7] }
  0xc1   : > { %4134 = vmatpush.msk.msrb.mxu1 %vm570_vm0, %v423_v11  ;;  %v798_v4 = vadd.f32 %v797_v5, %v609_v59  ;;  %v4930_v59 = vld [vmem:[%s4482_s18 + $0xd0] sm:$0xff] }
  0xc2   : > { %5987 = vst [vmem:[#allocation25_spill] sm:$0xff] %v4856_v3  ;;  %4012 = vmatmul.msk.f32.gmra.mxu0 %vm485_vm1, %v4851_v55  ;;  %4068 = vmatmul.msk.f32.gmra.mxu2 %vm485_vm1, %v4854_v61  ;;  %v4878_v3 = vld [vmem:[%s4482_s18 + $0xb9] sm:$0xff] }
  0xc3   : > { %4041 = vmatmul.msk.f32.gmra.mxu1 %vm485_vm1, %v4841_v10  ;;  %4098 = vmatmul.msk.f32.gmra.mxu3 %vm485_vm1, %v4865_v60  ;;  %5989 = vst [vmem:[#allocation27_spill] sm:$0xff] %v4878_v3  ;;  %v4881_v10 = vld [vmem:[%s4482_s18 + $0xaa] sm:$0xff] }
  0xc5   : > { %v1007_v1 = vpop.f32.mrf.mxu2 }
  0xc6   : > { %v1083_v58 = vadd.f32 %v1007_v1, %v792_v2  ;;  %v1254_v55 = vpop.f32.mrf.mxu3  ;;  %v4897_v2 = vld [vmem:[%s4482_s18 + $0xc1] sm:$0xff]  ;;  %v4900_v1 = vld [vmem:[%s4482_s18 + $0xb2] sm:$0xff] }
  0xc7   : > { %v612_v12 = vpop.f32.mrf.mxu0  ;;  %5992 = vst [vmem:[#allocation30_spill] sm:$0xff] %v4897_v2 }
  0xc8   : > { %v800_v61 = vpop.f32.mrf.mxu1  ;;  %v4883_v54 = vadd.f32 %v1251_v14, %v1083_v58  ;;  %5993 = vst [vmem:[#allocation31_spill] sm:$0xff] %v4900_v1 }
  0xc9   : > { %v801_v5 = vadd.f32 %v800_v61, %v612_v12 }
  0xca   : > { %5990 = vst [vmem:[#allocation28_spill] sm:$0xff] %v4883_v54  ;;  %4013 = vmatmul.msk.f32.gmra.mxu0 %vm485_vm1, %v4878_v3  ;;  %4069 = vmatmul.msk.f32.gmra.mxu2 %vm485_vm1, %v4881_v10 }
  0xcb   : > { %4042 = vmatmul.msk.f32.gmra.mxu1 %vm485_vm1, %v4865_v60  ;;  %4099 = vmatmul.msk.f32.gmra.mxu3 %vm485_vm1, %v4892_v0 }
  0xcd   : > { %v1010_v17 = vpop.f32.mrf.mxu2 }
  0xce   : > { %v1084_v11 = vadd.f32 %v1010_v17, %v795_v9  ;;  %v1257_v58 = vpop.f32.mrf.mxu3 }
  0xcf   : > { %v615_v14 = vpop.f32.mrf.mxu0 }
  0xd0   : > { %v803_v54 = vpop.f32.mrf.mxu1  ;;  %v4902_v3 = vadd.f32 %v1254_v55, %v1084_v11  ;;  %v4916_v11 = vld [vmem:[%s4482_s18 + $0xc9] sm:$0xff] }
  0xd1   : > { %5996 = vst [vmem:[#allocation34_spill] sm:$0xff] %v4916_v11  ;;  %v804_v61 = vadd.f32 %v803_v54, %v615_v14 }
  0xd2   : > { %5994 = vst [vmem:[#allocation32_spill] sm:$0xff] %v4902_v3  ;;  %4014 = vmatmul.msk.f32.gmra.mxu0 %vm485_vm1, %v4897_v2  ;;  %4070 = vmatmul.msk.f32.gmra.mxu2 %vm485_vm1, %v4900_v1  ;;  %v4919_v3 = vld [vmem:[%s4482_s18 + $0xba] sm:$0xff] }
  0xd3   : > { %4043 = vmatmul.msk.f32.gmra.mxu1 %vm485_vm1, %v4892_v0  ;;  %4100 = vmatmul.msk.f32.gmra.mxu3 %vm485_vm1, %v4911_v15 }
  0xd5   : > { %v1013_v9 = vpop.f32.mrf.mxu2 }
  0xd6   : > { %v1085_v17 = vadd.f32 %v1013_v9, %v798_v4  ;;  %v1260_v60 = vpop.f32.mrf.mxu3 }
  0xd7   : > { %v618_v55 = vpop.f32.mrf.mxu0 }
  0xd8   : > { %v806_v2 = vpop.f32.mrf.mxu1  ;;  %v4921_v1 = vadd.f32 %v1257_v58, %v1085_v17  ;;  %v4935_v17 = vld [vmem:[%s4482_s18 + $0xc2] sm:$0xff] }
  0xd9   : > { %5998 = vst [vmem:[#allocation36_spill] sm:$0xff] %v4935_v17 }
  0xda   : > { %5997 = vst [vmem:[#allocation35_spill] sm:$0xff] %v4921_v1  ;;  %4015 = vmatmul.msk.f32.gmra.mxu0 %vm485_vm1, %v4916_v11  ;;  %4071 = vmatmul.msk.f32.gmra.mxu2 %vm485_vm1, %v4919_v3 }
  0xdb   : > { %4044 = vmatmul.msk.f32.gmra.mxu1 %vm485_vm1, %v4911_v15  ;;  %4101 = vmatmul.msk.f32.gmra.mxu3 %vm485_vm1, %v4930_v59  ;;  %v4948_v15 = vld [vmem:[%s4482_s18 + $0xca] sm:$0xff] }
  0xdd   : > { %v1016_v4 = vpop.f32.mrf.mxu2 }
  0xde   : > { %v1086_v9 = vadd.f32 %v1016_v4, %v801_v5  ;;  %v1263_v1 = vpop.f32.mrf.mxu3 }
  0xdf   : > { %v621_v58 = vpop.f32.mrf.mxu0 }
  0xe0   : > { %v809_v0 = vpop.f32.mrf.mxu1  ;;  %v4937_v11 = vadd.f32 %v1260_v60, %v1086_v9 }
  0xe2   : > { %5999 = vst [vmem:[#allocation37_spill] sm:$0xff] %v4937_v11  ;;  %4072 = vmatmul.msk.f32.gmra.mxu2 %vm485_vm1, %v4935_v17  ;;  %4106 = vmatmul.msk.f32.vlgmr.msrb.gmra.mxu0 %vm485_vm1, %v4504_v13  ;;  %v4953_v17 = vld [vmem:[%s4482_s18 + $0xe0] sm:$0xff] }
  0xe3   : > { %4045 = vmatmul.msk.f32.gmra.mxu1 %vm485_vm1, %v4930_v59  ;;  %4102 = vmatmul.msk.f32.gmra.mxu3 %vm485_vm1, %v4491_v8  ;;  %v807_v8 = vadd.f32 %v806_v2, %v618_v55 }
  0xe5   : > { %v1019_v12 = vpop.f32.mrf.mxu2 }
  0xe6   : > { %v1087_v5 = vadd.f32 %v1019_v12, %v804_v61  ;;  %v1266_v60 = vpop.f32.mrf.mxu3 }
  0xe7   : > { %v624_v4 = vpop.f32.mrf.mxu0 }
  0xe8   : > { %v812_v9 = vpop.f32.mrf.mxu1  ;;  %v4950_v11 = vadd.f32 %v1263_v1, %v1087_v5  ;;  %v4964_v1 = vld [vmem:[%s4482_s18 + $0xd2] sm:$0xff] }
  0xea   : > { %6000 = vst [vmem:[#allocation38_spill] sm:$0xff] %v4950_v11  ;;  %4073 = vmatmul.msk.f32.gmra.mxu2 %vm485_vm1, %v4948_v15  ;;  %4107 = vmatmul.msk.f32.gmra.mxu0 %vm485_vm1, %v4514_v16  ;;  %v4969_v11 = vld [vmem:[%s4482_s18 + $0xe8] sm:$0xff]  ;;  %v810_v16 = vadd.f32 %v809_v0, %v621_v58 }
  0xeb   : > { %4135 = vmatmul.msk.f32.vlgmr.msrb.gmra.mxu1 %vm485_vm1, %v4530_v20  ;;  %4103 = vmatmul.msk.f32.gmra.mxu3 %vm485_vm1, %v4953_v17 }
  0xed   : > { %v1022_v13 = vpop.f32.mrf.mxu2 }
  0xee   : > { %v1088_v54 = vadd.f32 %v1022_v13, %v807_v8  ;;  %v1269_v61 = vpop.f32.mrf.mxu3 }
  0xef   : > { %v627_v14 = vpop.f32.mrf.mxu0 }
  0xf0   : > { %v815_v12 = vpop.f32.mrf.mxu1  ;;  %v4966_v5 = vadd.f32 %v1266_v60, %v1088_v54  ;;  %v4980_v60 = vld [vmem:[%s4482_s18 + $0xda] sm:$0xff] }
  0xf2   : > { %6001 = vst [vmem:[#allocation39_spill] sm:$0xff] %v4966_v5  ;;  %4074 = vmatmul.msk.f32.gmra.mxu2 %vm485_vm1, %v4964_v1  ;;  %4108 = vmatmul.msk.f32.gmra.mxu0 %vm485_vm1, %v4527_v19 }
  0xf3   : > { %4136 = vmatmul.msk.f32.gmra.mxu1 %vm485_vm1, %v4547_v23  ;;  %4104 = vmatmul.msk.f32.gmra.mxu3 %vm485_vm1, %v4969_v11  ;;  %v813_v23 = vadd.f32 %v812_v9, %v624_v4 }
  0xf5   : > { %v1025_v20 = vpop.f32.mrf.mxu2 }
  0xf6   : > { %v1089_v2 = vadd.f32 %v1025_v20, %v810_v16  ;;  %v1272_v8 = vpop.f32.mrf.mxu3 }
  0xf7   : > { %v630_v55 = vpop.f32.mrf.mxu0 }
  0xf8   : > { %v818_v13 = vpop.f32.mrf.mxu1  ;;  %v4982_v54 = vadd.f32 %v1269_v61, %v1089_v2 }
  0xfa   : > { %4075 = vmatmul.msk.f32.gmra.mxu2 %vm485_vm1, %v4980_v60  ;;  %4109 = vmatmul.msk.f32.gmra.mxu0 %vm485_vm1, %v4544_v22 }
  0xfb   : > { %4137 = vmatmul.msk.f32.gmra.mxu1 %vm485_vm1, %v4564_v26  ;;  %4193 = vmatmul.msk.f32.vlgmr.msra.gmra.mxu3 %vm485_vm1, %v4527_v19  ;;  %v816_v26 = vadd.f32 %v815_v12, %v627_v14 }
  0xfd   : > { %v1028_v0 = vpop.f32.mrf.mxu2 }
  0xfe   : > { %v1090_v58 = vadd.f32 %v1028_v0, %v813_v23  ;;  %v1275_v20 = vpop.f32.mrf.mxu3 }
  0xff   : > { %v633_v16 = vpop.f32.mrf.mxu0 }
 0x100   : > { %v821_v5 = vpop.f32.mrf.mxu1  ;;  %v4992_v61 = vadd.f32 %v1272_v8, %v1090_v58 }
 0x102   : > { %4110 = vmatmul.msk.f32.gmra.mxu0 %vm485_vm1, %v4561_v25  ;;  %4164 = vmatmul.msk.f32.vlgmr.msra.gmra.mxu2 %vm485_vm1, %v4522_v18  ;;  %v819_v18 = vadd.f32 %v818_v13, %v630_v55 }
 0x103   : > { %4138 = vmatmul.msk.f32.gmra.mxu1 %vm485_vm1, %v4581_v29  ;;  %4194 = vmatmul.msk.f32.gmra.mxu3 %vm485_vm1, %v4544_v22 }
 0x105   : > { %v1031_v19 = vpop.f32.mrf.mxu2 }
 0x106   : > { %v1091_v4 = vadd.f32 %v1031_v19, %v816_v26  ;;  %v1278_v2 = vpop.f32.mrf.mxu3 }
 0x107   : > { %v636_v9 = vpop.f32.mrf.mxu0 }
 0x108   : > { %v824_v23 = vpop.f32.mrf.mxu1  ;;  %v5002_v8 = vadd.f32 %v1275_v20, %v1091_v4 }
 0x10a   : > { %4111 = vmatmul.msk.f32.gmra.mxu0 %vm485_vm1, %v4578_v28  ;;  %4165 = vmatmul.msk.f32.gmra.mxu2 %vm485_vm1, %v4539_v21  ;;  %v822_v21 = vadd.f32 %v821_v5, %v633_v16 }
 0x10b   : > { %4139 = vmatmul.msk.f32.gmra.mxu1 %vm485_vm1, %v4598_v32  ;;  %4195 = vmatmul.msk.f32.gmra.mxu3 %vm485_vm1, %v4561_v25 }
 0x10d   : > { %v1034_v22 = vpop.f32.mrf.mxu2 }
 0x10e   : > { %v1092_v29 = vadd.f32 %v1034_v22, %v819_v18  ;;  %v1281_v12 = vpop.f32.mrf.mxu3 }
 0x10f   : > { %v639_v14 = vpop.f32.mrf.mxu0 }
 0x110   : > { %v827_v0 = vpop.f32.mrf.mxu1  ;;  %v5012_v58 = vadd.f32 %v1278_v2, %v1092_v29 }
 0x112   : > { %4112 = vmatmul.msk.f32.gmra.mxu0 %vm485_vm1, %v4595_v31  ;;  %4166 = vmatmul.msk.f32.gmra.mxu2 %vm485_vm1, %v4556_v24  ;;  %v825_v24 = vadd.f32 %v824_v23, %v636_v9 }
 0x113   : > { %4140 = vmatmul.msk.f32.gmra.mxu1 %vm485_vm1, %v4615_v35  ;;  %4196 = vmatmul.msk.f32.gmra.mxu3 %vm485_vm1, %v4578_v28 }
 0x115   : > { %v1037_v25 = vpop.f32.mrf.mxu2 }
 0x116   : > { %v1093_v32 = vadd.f32 %v1037_v25, %v822_v21  ;;  %v1284_v13 = vpop.f32.mrf.mxu3 }
 0x117   : > { %v642_v55 = vpop.f32.mrf.mxu0 }
 0x118   : > { %v830_v20 = vpop.f32.mrf.mxu1  ;;  %v5022_v26 = vadd.f32 %v1281_v12, %v1093_v32 }
 0x11a   : > { %4113 = vmatmul.msk.f32.gmra.mxu0 %vm485_vm1, %v4612_v34  ;;  %4167 = vmatmul.msk.f32.gmra.mxu2 %vm485_vm1, %v4573_v27  ;;  %v828_v27 = vadd.f32 %v827_v0, %v639_v14 }
 0x11b   : > { %4141 = vmatmul.msk.f32.gmra.mxu1 %vm485_vm1, %v4632_v38  ;;  %4197 = vmatmul.msk.f32.gmra.mxu3 %vm485_vm1, %v4595_v31 }
 0x11d   : > { %v1040_v28 = vpop.f32.mrf.mxu2 }
 0x11e   : > { %v1094_v35 = vadd.f32 %v1040_v28, %v825_v24  ;;  %v1287_v16 = vpop.f32.mrf.mxu3 }
 0x11f   : > { %v645_v5 = vpop.f32.mrf.mxu0 }
 0x120   : > { %v833_v19 = vpop.f32.mrf.mxu1  ;;  %v5032_v4 = vadd.f32 %v1284_v13, %v1094_v35 }
 0x122   : > { %4114 = vmatmul.msk.f32.gmra.mxu0 %vm485_vm1, %v4629_v37  ;;  %4168 = vmatmul.msk.f32.gmra.mxu2 %vm485_vm1, %v4590_v30  ;;  %v831_v30 = vadd.f32 %v830_v20, %v642_v55 }
 0x123   : > { %4142 = vmatmul.msk.f32.gmra.mxu1 %vm485_vm1, %v4649_v41  ;;  %4198 = vmatmul.msk.f32.gmra.mxu3 %vm485_vm1, %v4612_v34 }
 0x125   : > { %v1043_v31 = vpop.f32.mrf.mxu2 }
 0x126   : > { %v1095_v38 = vadd.f32 %v1043_v31, %v828_v27  ;;  %v1290_v2 = vpop.f32.mrf.mxu3 }
 0x127   : > { %v648_v9 = vpop.f32.mrf.mxu0 }
 0x128   : > { %v5042_v23 = vadd.f32 %v1287_v16, %v1095_v38  ;;  %v836_v18 = vpop.f32.mrf.mxu1 }
 0x12a   : > { %4115 = vmatmul.msk.f32.gmra.mxu0 %vm485_vm1, %v4646_v40  ;;  %4169 = vmatmul.msk.f32.gmra.mxu2 %vm485_vm1, %v4607_v33  ;;  %v834_v33 = vadd.f32 %v833_v19, %v645_v5 }
 0x12b   : > { %4143 = vmatmul.msk.f32.gmra.mxu1 %vm485_vm1, %v4666_v44  ;;  %4199 = vmatmul.msk.f32.gmra.mxu3 %vm485_vm1, %v4629_v37 }
 0x12d   : > { %v1046_v34 = vpop.f32.mrf.mxu2 }
 0x12e   : > { %v1096_v41 = vadd.f32 %v1046_v34, %v831_v30  ;;  %v1293_v29 = vpop.f32.mrf.mxu3 }
 0x12f   : > { %v651_v22 = vpop.f32.mrf.mxu0 }
 0x130   : > { %v5052_v14 = vadd.f32 %v1290_v2, %v1096_v41  ;;  %v839_v44 = vpop.f32.mrf.mxu1 }
 0x132   : > { %4116 = vmatmul.msk.f32.gmra.mxu0 %vm485_vm1, %v4663_v43  ;;  %4170 = vmatmul.msk.f32.gmra.mxu2 %vm485_vm1, %v4624_v36  ;;  %v837_v36 = vadd.f32 %v836_v18, %v648_v9 }
 0x133   : > { %4144 = vmatmul.msk.f32.gmra.mxu1 %vm485_vm1, %v4683_v47  ;;  %4200 = vmatmul.msk.f32.gmra.mxu3 %vm485_vm1, %v4646_v40 }
 0x135   : > { %v1049_v37 = vpop.f32.mrf.mxu2 }
 0x136   : > { %v1097_v12 = vadd.f32 %v1049_v37, %v834_v33  ;;  %v1296_v21 = vpop.f32.mrf.mxu3 }
 0x137   : > { %v654_v0 = vpop.f32.mrf.mxu0 }
 0x138   : > { %v5062_v25 = vadd.f32 %v1293_v29, %v1097_v12  ;;  %v842_v47 = vpop.f32.mrf.mxu1 }
 0x13a   : > { %4117 = vmatmul.msk.f32.gmra.mxu0 %vm485_vm1, %v4680_v46  ;;  %4171 = vmatmul.msk.f32.gmra.mxu2 %vm485_vm1, %v4641_v39  ;;  %v840_v39 = vadd.f32 %v839_v44, %v651_v22  ;;  %v6004_v22 = vld [vmem:[#allocation5_spill] sm:$0xff] }
 0x13b   : > { %4145 = vmatmul.msk.f32.gmra.mxu1 %vm485_vm1, %v4700_v50  ;;  %4201 = vmatmul.msk.f32.gmra.mxu3 %vm485_vm1, %v4663_v43 }
 0x13d   : > { %v1052_v40 = vpop.f32.mrf.mxu2 }
 0x13e   : > { %v1098_v32 = vadd.f32 %v1052_v40, %v837_v36  ;;  %v1299_v13 = vpop.f32.mrf.mxu3  ;;  %v6009_v36 = vld [vmem:[#allocation16_spill] sm:$0xff] }
 0x13f   : > { %v657_v55 = vpop.f32.mrf.mxu0 }
 0x140   : > { %v5072_v20 = vadd.f32 %v1296_v21, %v1098_v32  ;;  %v845_v35 = vpop.f32.mrf.mxu1  ;;  %v6008_v21 = vld [vmem:[#allocation6_spill] sm:$0xff] }
 0x142   : > { %4118 = vmatmul.msk.f32.gmra.mxu0 %vm485_vm1, %v4697_v49  ;;  %4172 = vmatmul.msk.f32.gmra.mxu2 %vm485_vm1, %v4658_v42  ;;  %v843_v42 = vadd.f32 %v842_v47, %v654_v0  ;;  %v6007_v0 = vld [vmem:[#allocation11_spill] sm:$0xff] }
 0x143   : > { %4146 = vmatmul.msk.f32.gmra.mxu1 %vm485_vm1, %v4717_v53  ;;  %4202 = vmatmul.msk.f32.gmra.mxu3 %vm485_vm1, %v4680_v46 }
 0x145   : > { %v1055_v43 = vpop.f32.mrf.mxu2 }
 0x146   : > { %v1099_v50 = vadd.f32 %v1055_v43, %v840_v39  ;;  %v1302_v28 = vpop.f32.mrf.mxu3  ;;  %v6011_v43 = vld [vmem:[#allocation15_spill] sm:$0xff] }
 0x147   : > { %v660_v24 = vpop.f32.mrf.mxu0 }
 0x148   : > { %v5082_v5 = vadd.f32 %v1299_v13, %v1099_v50  ;;  %v848_v31 = vpop.f32.mrf.mxu1  ;;  %v6012_v50 = vld [vmem:[#allocation8_spill] sm:$0xff] }
 0x14a   : > { %4119 = vmatmul.msk.f32.gmra.mxu0 %vm485_vm1, %v4714_v52  ;;  %4173 = vmatmul.msk.f32.gmra.mxu2 %vm485_vm1, %v4675_v45  ;;  %v846_v45 = vadd.f32 %v845_v35, %v657_v55 }
 0x14b   : > { %4147 = vmatmul.msk.f32.gmra.mxu1 %vm485_vm1, %v4734_v57  ;;  %4203 = vmatmul.msk.f32.gmra.mxu3 %vm485_vm1, %v4697_v49 }
 0x14d   : > { %v1058_v46 = vpop.f32.mrf.mxu2 }
 0x14e   : > { %v1100_v53 = vadd.f32 %v1058_v46, %v843_v42  ;;  %v1305_v19 = vpop.f32.mrf.mxu3 }
 0x14f   : > { %v663_v16 = vpop.f32.mrf.mxu0 }
 0x150   : > { %v5092_v27 = vadd.f32 %v1302_v28, %v1100_v53  ;;  %v6014_v28 = vld [vmem:[#allocation7_spill] sm:$0xff] }
 0x152   : > { %4120 = vmatmul.msk.f32.gmra.mxu0 %vm485_vm1, %v4731_v56  ;;  %4174 = vmatmul.msk.f32.gmra.mxu2 %vm485_vm1, %v4692_v48  ;;  %v849_v48 = vadd.f32 %v848_v31, %v660_v24  ;;  %v6013_v24 = vld [vmem:[#allocation20_spill] sm:$0xff]  ;;  %v6017_v31 = vld [vmem:[#allocation10_spill] sm:$0xff] }
 0x153   : > { %4148 = vmatmul.msk.f32.gmra.mxu1 %vm485_vm1, %v4753_v63  ;;  %4204 = vmatmul.msk.f32.gmra.mxu3 %vm485_vm1, %v4714_v52  ;;  %v851_v63 = vpop.f32.mrf.mxu1 }
 0x155   : > { %v1061_v49 = vpop.f32.mrf.mxu2 }
 0x156   : > { %v1101_v57 = vadd.f32 %v1061_v49, %v846_v45  ;;  %v1308_v9 = vpop.f32.mrf.mxu3  ;;  %v6018_v49 = vld [vmem:[#allocation24_spill] sm:$0xff] }
 0x157   : > { %v666_v38 = vpop.f32.mrf.mxu0 }
 0x158   : > { %v5102_v2 = vadd.f32 %v1305_v19, %v1101_v57  ;;  %v6016_v19 = vld [vmem:[#allocation19_spill] sm:$0xff] }
 0x15a   : > { %6002 = vst [vmem:[#allocation40_spill] sm:$0xff] %v5102_v2  ;;  %4121 = vmatmul.msk.f32.gmra.mxu0 %vm485_vm1, %v4750_v62  ;;  %4175 = vmatmul.msk.f32.gmra.mxu2 %vm485_vm1, %v4709_v51  ;;  %v6005_v51 = vld [vmem:[#allocation12_spill] sm:$0xff] }
 0x15b   : > { %4149 = vmatmul.msk.f32.gmra.mxu1 %vm485_vm1, %v4772_v7  ;;  %4205 = vmatmul.msk.f32.gmra.mxu3 %vm485_vm1, %v4731_v56  ;;  %v852_v7 = vadd.f32 %v851_v63, %v663_v16  ;;  %v854_v29 = vpop.f32.mrf.mxu1 }
 0x15c   : > { %v855_v40 = vadd.f32 %v854_v29, %v666_v38  ;;  %v6019_v38 = vld [vmem:[#allocation9_spill] sm:$0xff] }
 0x15d   : > { %v1064_v52 = vpop.f32.mrf.mxu2 }
 0x15e   : > { %v1102_v18 = vadd.f32 %v1064_v52, %v849_v48  ;;  %v1311_v34 = vpop.f32.mrf.mxu3 }
 0x15f   : > { %v1483_v30 = vpop.f32.mrf.mxu0 }
 0x160   : > { %v5112_v41 = vadd.f32 %v1308_v9, %v1102_v18  ;;  %v6021_v18 = vld [vmem:[#allocation13_spill] sm:$0xff] }
 0x162   : > { %6003 = vst [vmem:[#allocation41_spill] sm:$0xff] %v5112_v41  ;;  %4122 = vmatmul.msk.f32.gmra.mxu0 %vm485_vm1, %v4769_v6  ;;  %4176 = vmatmul.msk.f32.gmra.mxu2 %vm485_vm1, %v6004_v22  ;;  %v6022_v22 = vld [vmem:[#allocation23_spill] sm:$0xff] }
 0x163   : > { %4150 = vmatmul.msk.f32.gmra.mxu1 %vm485_vm1, %v6005_v51  ;;  %4206 = vmatmul.msk.f32.gmra.mxu3 %vm485_vm1, %v4750_v62  ;;  %v857_v39 = vpop.f32.mrf.mxu1  ;;  %v6023_v51 = vld [vmem:[#allocation14_spill] sm:$0xff] }
 0x164   : > { %v858_v35 = vadd.f32 %v857_v39, %v6014_v28 }
 0x165   : > { %v1067_v56 = vpop.f32.mrf.mxu2 }
 0x166   : > { %v1103_v33 = vadd.f32 %v1067_v56, %v852_v7  ;;  %v1314_v37 = vpop.f32.mrf.mxu3 }
 0x167   : > { %v1486_v44 = vpop.f32.mrf.mxu0 }
 0x168   : > { %v5122_v12 = vadd.f32 %v1311_v34, %v1103_v33  ;;  %v1567_v34 = vadd.f32 %v1483_v30, %v6021_v18 }
 0x16a   : > { %6006 = vst [vmem:[#allocation5_spill] sm:$0xff] %v5122_v12  ;;  %4123 = vmatmul.msk.f32.gmra.mxu0 %vm485_vm1, %v6007_v0  ;;  %4177 = vmatmul.msk.f32.gmra.mxu2 %vm485_vm1, %v6008_v21  ;;  %v6024_v21 = vld [vmem:[#allocation17_spill] sm:$0xff] }
 0x16b   : > { %4151 = vmatmul.msk.f32.gmra.mxu1 %vm485_vm1, %v6009_v36  ;;  %4207 = vmatmul.msk.f32.gmra.mxu3 %vm485_vm1, %v4769_v6  ;;  %v1727_v45 = vpop.f32.mrf.mxu1  ;;  %v1568_v36 = vadd.f32 %v1486_v44, %v6024_v21  ;;  %v6028_v44 = vld [vmem:[#allocation21_spill] sm:$0xff] }
 0x16c   : > { %v1811_v7 = vadd.f32 %v1727_v45, %v1567_v34  ;;  %v6036_v21 = vld [vmem:[#allocation33_spill] sm:$0xff] }
 0x16d   : > { %v1070_v62 = vpop.f32.mrf.mxu2 }
 0x16e   : > { %v1104_v47 = vadd.f32 %v1070_v62, %v855_v40  ;;  %v1317_v55 = vpop.f32.mrf.mxu3  ;;  %v6025_v40 = vld [vmem:[#allocation27_spill] sm:$0xff]  ;;  %v6026_v62 = vld [vmem:[#allocation18_spill] sm:$0xff] }
 0x16f   : > { %v1489_v32 = vpop.f32.mrf.mxu0 }
 0x170   : > { %v5132_v13 = vadd.f32 %v1314_v37, %v1104_v47  ;;  %v1569_v28 = vadd.f32 %v1489_v32, %v6028_v44  ;;  %v1865_v44 = vld [vmem:[%s4482_s18 + $0xf0] sm:$0xff] }
 0x172   : > { %6010 = vst [vmem:[#allocation12_spill] sm:$0xff] %v5132_v13  ;;  %4124 = vmatmul.msk.f32.gmra.mxu0 %vm485_vm1, %v6011_v43  ;;  %4178 = vmatmul.msk.f32.gmra.mxu2 %vm485_vm1, %v6012_v50 }
 0x173   : > { %4152 = vmatmul.msk.f32.gmra.mxu1 %vm485_vm1, %v6013_v24  ;;  %4208 = vmatmul.msk.f32.gmra.mxu3 %vm485_vm1, %v6007_v0  ;;  %v1730_v56 = vpop.f32.mrf.mxu1 }
 0x174   : > { %v1812_v47 = vadd.f32 %v1730_v56, %v1568_v36  ;;  %v1377_v36 = vld [vmem:[%s4482_s18 + $0xe1] sm:$0xff] }
 0x175   : > { %v1073_v6 = vpop.f32.mrf.mxu2 }
 0x176   : > { %v1105_v42 = vadd.f32 %v1073_v6, %v858_v35  ;;  %v1320_v53 = vpop.f32.mrf.mxu3  ;;  %v6029_v35 = vld [vmem:[#allocation30_spill] sm:$0xff] }
 0x177   : > { %v1492_v46 = vpop.f32.mrf.mxu0  ;;  %v6030_v6 = vld [vmem:[#allocation22_spill] sm:$0xff] }
 0x178   : > { %v5143_v16 = vadd.f32 %v1317_v55, %v1105_v42 }
 0x17a   : > { %6015 = vst [vmem:[#allocation11_spill] sm:$0xff] %v5143_v16  ;;  %4125 = vmatmul.msk.f32.gmra.mxu0 %vm485_vm1, %v6016_v19  ;;  %4179 = vmatmul.msk.f32.gmra.mxu2 %vm485_vm1, %v6017_v31 }
 0x17b   : > { %4153 = vmatmul.msk.f32.gmra.mxu1 %vm485_vm1, %v6018_v49  ;;  %4209 = vmatmul.msk.f32.gmra.mxu3 %vm485_vm1, %v6011_v43  ;;  %v1733_v43 = vpop.f32.mrf.mxu1 }
 0x17d   : > { %v1076_v57 = vpop.f32.mrf.mxu2 }
 0x17e   : > { %v1106_v9 = vadd.f32 %v1076_v57, %v6019_v38  ;;  %v2215_v63 = vpop.f32.mrf.mxu3  ;;  %v6031_v57 = vld [vmem:[#allocation25_spill] sm:$0xff] }
 0x17f   : > { %v5154_v48 = vpop.f32.mrf.mxu0  ;;  %v1570_v38 = vadd.f32 %v1492_v46, %v6031_v57  ;;  %v1375_v46 = vld [vmem:[%s4482_s18 + $0xd1] sm:$0xff] }
 0x180   : > { %v5156_v52 = vadd.f32 %v1320_v53, %v1106_v9  ;;  %v1813_v53 = vadd.f32 %v1733_v43, %v1569_v28  ;;  %v6032_v9 = vld [vmem:[#allocation34_spill] sm:$0xff]  ;;  %v2109_v43 = vld [vmem:[%s4482_s18 + $0xf1] sm:$0xff] }
 0x181   : > { %v2329_v28 = vld [vmem:[%s4482_s18 + $0x32] sm:$0xff] }
 0x182   : > { %6020 = vst [vmem:[#allocation6_spill] sm:$0xff] %v5156_v52  ;;  %4126 = vmatmul.msk.f32.gmra.mxu0 %vm485_vm1, %v6022_v22  ;;  %4180 = vmatmul.msk.f32.gmra.mxu2 %vm485_vm1, %v6023_v51 }
 0x183   : > { %4154 = vmatmul.msk.f32.gmra.mxu1 %vm485_vm1, %v4881_v10  ;;  %4210 = vmatmul.msk.f32.gmra.mxu3 %vm485_vm1, %v6016_v19  ;;  %v6027_v10 = vld [vmem:[#allocation31_spill] sm:$0xff]  ;;  %v1736_v49 = vpop.f32.mrf.mxu1 }
 0x184   : > { %v1814_v18 = vadd.f32 %v1736_v49, %v1570_v38  ;;  %v2332_v49 = vld [vmem:[%s4482_s18 + $0x4a] sm:$0xff]  ;;  %v2333_v38 = vld [vmem:[%s4482_s18 + $0x52] sm:$0xff] }
 0x185   : > { %v1971_v29 = vpop.f32.mrf.mxu2 }
 0x186   : > { %v2055_v33 = vadd.f32 %v1971_v29, %v1811_v7  ;;  %v2218_v30 = vpop.f32.mrf.mxu3  ;;  %v6035_v29 = vld [vmem:[#allocation29_spill] sm:$0xff] }
 0x187   : > { %v5167_v37 = vpop.f32.mrf.mxu0 }
 0x188   : > { %v5169_v0 = vadd.f32 %v2215_v63, %v2055_v33  ;;  %v6033_v63 = vld [vmem:[#allocation26_spill] sm:$0xff] }
 0x18a   : > { %4127 = vmatmul.msk.f32.gmra.mxu0 %vm485_vm1, %v6025_v40  ;;  %4181 = vmatmul.msk.f32.gmra.mxu2 %vm485_vm1, %v6026_v62  ;;  %v1862_v62 = vld [vmem:[%s4482_s18 + $0xd8] sm:$0xff] }
 0x18b   : > { %4155 = vmatmul.msk.f32.gmra.mxu1 %vm485_vm1, %v6027_v10  ;;  %4211 = vmatmul.msk.f32.gmra.mxu3 %vm485_vm1, %v6022_v22  ;;  %v5241_v10 = vld [vmem:[%s4482_s18 + $0xe2] sm:$0xff] }
 0x18d   : > { %v1974_v55 = vpop.f32.mrf.mxu2 }
 0x18e   : > { %v2056_v39 = vadd.f32 %v1974_v55, %v1812_v47  ;;  %v2221_v42 = vpop.f32.mrf.mxu3  ;;  %v5252_v47 = vld [vmem:[%s4482_s18 + $0xea] sm:$0xff] }
 0x18f   : > { %v5180_v50 = vpop.f32.mrf.mxu0 }
 0x190   : > { %v5182_v24 = vadd.f32 %v2218_v30, %v2056_v39  ;;  %v1376_v30 = vld [vmem:[%s4482_s18 + $0xd9] sm:$0xff]  ;;  %v2328_v39 = vld [vmem:[%s4482_s18 + $0x2a] sm:$0xff] }
 0x192   : > { %4128 = vmatmul.msk.f32.gmra.mxu0 %vm485_vm1, %v6029_v35  ;;  %4182 = vmatmul.msk.f32.gmra.mxu2 %vm485_vm1, %v6030_v6 }
 0x193   : > { %4156 = vmatmul.msk.f32.gmra.mxu1 %vm485_vm1, %v4919_v3  ;;  %4212 = vmatmul.msk.f32.gmra.mxu3 %vm485_vm1, %v6025_v40  ;;  %v6034_v3 = vld [vmem:[#allocation36_spill] sm:$0xff] }
 0x195   : > { %v1977_v19 = vpop.f32.mrf.mxu2 }
 0x196   : > { %v2057_v31 = vadd.f32 %v1977_v19, %v1813_v53  ;;  %v2224_v22 = vpop.f32.mrf.mxu3  ;;  %v2331_v19 = vld [vmem:[%s4482_s18 + $0x42] sm:$0xff] }
 0x197   : > { %v5193_v45 = vpop.f32.mrf.mxu0 }
 0x198   : > { %v5195_v32 = vadd.f32 %v2221_v42, %v2057_v31  ;;  %v2330_v42 = vld [vmem:[%s4482_s18 + $0x3a] sm:$0xff] }
 0x19a   : > { %4129 = vmatmul.msk.f32.gmra.mxu0 %vm485_vm1, %v6032_v9  ;;  %4183 = vmatmul.msk.f32.gmra.mxu2 %vm485_vm1, %v6033_v63  ;;  %v2806_v63 = vld [vmem:[%s5928_s4 + $0x28] sm:$0x3] }
 0x19b   : > { %4157 = vmatmul.msk.f32.gmra.mxu1 %vm485_vm1, %v6034_v3  ;;  %4213 = vmatmul.msk.f32.gmra.mxu3 %vm485_vm1, %v6029_v35  ;;  %v2110_v35 = vld [vmem:[%s4482_s18 + $0xf9] sm:$0xff] }
 0x19c   : > { %4262 = vmatpush.msk.msrb.mxu3 %vm2846_vm2, %v2806_v63  ;;  %v2804_v3 = vld [vmem:[%s5928_s4 + $0x18] sm:$0x3]  ;;  %v2342_v63 = vld [vmem:[%s4482_s18 + $0x9a] sm:$0xff] }
 0x19d   : > { %v1980_v34 = vpop.f32.mrf.mxu2  ;;  %4250 = vmatpush.msk.msra.mxu1 %vm2846_vm2, %v2804_v3 }
 0x19e   : > { %v2058_v51 = vadd.f32 %v1980_v34, %v1814_v18  ;;  %v2334_v34 = vld [vmem:[%s4482_s18 + $0x5a] sm:$0xff] }
 0x19f   : > { %v5206_v7 = vpop.f32.mrf.mxu0 }
 0x1a0   : > { %v5209_v56 = vadd.f32 %v2224_v22, %v2058_v51  ;;  %v2335_v51 = vld [vmem:[%s4482_s18 + $0x62] sm:$0xff] }
 0x1a2   : > { %4130 = vmatmul.msk.f32.gmra.mxu0 %vm485_vm1, %v1375_v46  ;;  %4184 = vmatmul.msk.f32.gmra.mxu2 %vm485_vm1, %v6035_v29  ;;  %v2336_v29 = vld [vmem:[%s4482_s18 + $0x6a] sm:$0xff] }
 0x1a3   : > { %4158 = vmatmul.msk.f32.gmra.mxu1 %vm485_vm1, %v4948_v15  ;;  %4214 = vmatmul.msk.f32.gmra.mxu3 %vm485_vm1, %v6032_v9  ;;  %v2802_v9 = vld [vmem:[%s5928_s4 + $0x8] sm:$0x3] }
 0x1a4   : > { %4256 = vmatpush.msk.msrb.mxu2 %vm2846_vm2, %v2802_v9 }
 0x1a7   : > { %v5218_v33 = vpop.f32.mrf.mxu0 }
 0x1aa   : > { %4131 = vmatmul.msk.f32.gmra.mxu0 %vm485_vm1, %v1376_v30  ;;  %4185 = vmatmul.msk.f32.gmra.mxu2 %vm485_vm1, %v6036_v21  ;;  %v2337_v21 = vld [vmem:[%s4482_s18 + $0x72] sm:$0xff] }
 0x1ab   : > { %4159 = vmatmul.msk.f32.gmra.mxu1 %vm485_vm1, %v4964_v1  ;;  %4215 = vmatmul.msk.f32.gmra.mxu3 %vm485_vm1, %v1375_v46  ;;  %v1378_v1 = vld [vmem:[%s4482_s18 + $0xe9] sm:$0xff] }
 0x1af   : > { %v5227_v15 = vpop.f32.mrf.mxu0 }
 0x1b2   : > { %4132 = vmatmul.msk.f32.gmra.mxu0 %vm485_vm1, %v1377_v36  ;;  %4186 = vmatmul.msk.f32.gmra.mxu2 %vm485_vm1, %v4930_v59 }
 0x1b3   : > { %4160 = vmatmul.msk.f32.gmra.mxu1 %vm485_vm1, %v4980_v60  ;;  %4216 = vmatmul.msk.f32.gmra.mxu3 %vm485_vm1, %v1376_v30  ;;  %v2327_v60 = vld [vmem:[%s4482_s18 + $0x22] sm:$0xff] }
 0x1b7   : > { %v5236_v40 = vpop.f32.mrf.mxu0 }
 0x1ba   : > { %4133 = vmatmul.msk.f32.gmra.mxu0 %vm485_vm1, %v1378_v1  ;;  %4187 = vmatmul.msk.f32.gmra.mxu2 %vm485_vm1, %v1862_v62 }
 0x1bb   : > { %4161 = vmatmul.msk.f32.gmra.mxu1 %vm485_vm1, %v5241_v10  ;;  %4217 = vmatmul.msk.f32.gmra.mxu3 %vm485_vm1, %v1377_v36 }
 0x1bf   : > { %v5248_v59 = vpop.f32.mrf.mxu0 }
 0x1c2   : > { %4188 = vmatmul.msk.f32.gmra.mxu2 %vm485_vm1, %v4953_v17  ;;  %4222 = vmatmul.msk.f32.vlgmr.msra.gmra.mxu0 %vm485_vm1, %v2327_v60  ;;  %v2339_v60 = vld [vmem:[%s4482_s18 + $0x82] sm:$0xff] }
 0x1c3   : > { %4162 = vmatmul.msk.f32.gmra.mxu1 %vm485_vm1, %v5252_v47  ;;  %4218 = vmatmul.msk.f32.gmra.mxu3 %vm485_vm1, %v1378_v1  ;;  %v2338_v1 = vld [vmem:[%s4482_s18 + $0x7a] sm:$0xff] }
 0x1c7   : > { %v5260_v55 = vpop.f32.mrf.mxu0 }
 0x1ca   : > { %4189 = vmatmul.msk.f32.gmra.mxu2 %vm485_vm1, %v4969_v11  ;;  %4223 = vmatmul.msk.f32.gmra.mxu0 %vm485_vm1, %v2328_v39  ;;  %v1866_v11 = vld [vmem:[%s4482_s18 + $0xf8] sm:$0xff]  ;;  %v1739_v39 = vpop.f32.mrf.mxu1 }
 0x1cb   : > { %4219 = vmatmul.msk.f32.gmra.mxu3 %vm485_vm1, %v2109_v43 }
 0x1cf   : > { %v5268_v17 = vpop.f32.mrf.mxu0 }
 0x1d2   : > { %4190 = vmatmul.msk.f32.gmra.mxu2 %vm485_vm1, %v1865_v44  ;;  %4224 = vmatmul.msk.f32.gmra.mxu0 %vm485_vm1, %v2329_v28  ;;  %v2340_v44 = vld [vmem:[%s4482_s18 + $0x8a] sm:$0xff]  ;;  %v1983_v28 = vpop.f32.mrf.mxu2 }
 0x1d3   : > { %4220 = vmatmul.msk.f32.gmra.mxu3 %vm485_vm1, %v2110_v35  ;;  %v5333_v35 = vpop.f32.mrf.mxu3 }
 0x1d7   : > { %v5276_v6 = vpop.f32.mrf.mxu0 }
 0x1da   : > { %4191 = vmatmul.msk.f32.gmra.mxu2 %vm485_vm1, %v1866_v11  ;;  %4225 = vmatmul.msk.f32.gmra.mxu0 %vm485_vm1, %v2330_v42  ;;  %v2341_v42 = vld [vmem:[%s4482_s18 + $0x92] sm:$0xff] }
 0x1df   : > { %v5282_v53 = vpop.f32.mrf.mxu0 }
 0x1e2   : > { %4226 = vmatmul.msk.f32.gmra.mxu0 %vm485_vm1, %v2331_v19  ;;  %v5339_v19 = vpop.f32.mrf.mxu1 }
 0x1e7   : > { %v5286_v31 = vpop.f32.mrf.mxu0 }
 0x1ea   : > { %4227 = vmatmul.msk.f32.gmra.mxu0 %vm485_vm1, %v2332_v49  ;;  %v5341_v49 = vpop.f32.mrf.mxu2  ;;  %v5350_v3 = vpop.f32.mrf.mxu1 }
 0x1ef   : > { %v5290_v57 = vpop.f32.mrf.mxu0 }
 0x1f2   : > { %4228 = vmatmul.msk.f32.gmra.mxu0 %vm485_vm1, %v2333_v38  ;;  %v5344_v38 = vpop.f32.mrf.mxu3 }
 0x1f7   : > { %v5305_v18 = vpop.f32.mrf.mxu0 }
 0x1fa   : > { %4229 = vmatmul.msk.f32.gmra.mxu0 %vm485_vm1, %v2334_v34  ;;  %v5352_v34 = vpop.f32.mrf.mxu2 }
 0x1ff   : > { %v5310_v22 = vpop.f32.mrf.mxu0 }
 0x202   : > { %4230 = vmatmul.msk.f32.gmra.mxu0 %vm485_vm1, %v2335_v51  ;;  %v5354_v51 = vpop.f32.mrf.mxu3  ;;  %v5373_v52 = vpop.f32.mrf.mxu2 }
 0x207   : > { %v5314_v46 = vpop.f32.mrf.mxu0 }
 0x20a   : > { %4231 = vmatmul.msk.f32.gmra.mxu0 %vm485_vm1, %v2336_v29  ;;  %v5359_v29 = vld [vmem:[%s5926_s2] ss:$0 sm:$0xff]  ;;  %v5377_v16 = vpop.f32.mrf.mxu3 }
 0x20f   : > { %v5318_v30 = vpop.f32.mrf.mxu0 }
 0x210   : > { %6037 = vst [vmem:[#allocation16_spill] sm:$0xff] %v5318_v30 }
 0x212   : > { %4232 = vmatmul.msk.f32.gmra.mxu0 %vm485_vm1, %v2337_v21 }
 0x217   : > { %v5322_v36 = vpop.f32.mrf.mxu0 }
 0x218   : > { %6038 = vst [vmem:[#allocation15_spill] sm:$0xff] %v5322_v36  ;;  %v2346_v36 = vld [vmem:[%s4482_s18 + $0xba] sm:$0xff] }
 0x21a   : > { %4233 = vmatmul.msk.f32.gmra.mxu0 %vm485_vm1, %v2338_v1  ;;  %v2343_v1 = vld [vmem:[%s4482_s18 + $0xa2] sm:$0xff] }
 0x21f   : > { %v5326_v62 = vpop.f32.mrf.mxu0 }
 0x220   : > { %6039 = vst [vmem:[#allocation8_spill] sm:$0xff] %v5326_v62 }
 0x222   : > { %4234 = vmatmul.msk.f32.gmra.mxu0 %vm485_vm1, %v2339_v60 }
 0x227   : > { %v5330_v43 = vpop.f32.mrf.mxu0 }
 0x228   : > { %6040 = vst [vmem:[#allocation20_spill] sm:$0xff] %v5330_v43 }
 0x22a   : > { %4235 = vmatmul.msk.f32.gmra.mxu0 %vm485_vm1, %v2340_v44  ;;  %v5366_v44 = vld [vmem:[%s5927_s3] ss:$0 sm:$0xff] }
 0x22f   : > { %v5336_v11 = vpop.f32.mrf.mxu0 }
 0x230   : > { %6041 = vst [vmem:[#allocation7_spill] sm:$0xff] %v5336_v11 }
 0x232   : > { %4236 = vmatmul.msk.f32.gmra.mxu0 %vm485_vm1, %v2341_v42 }
 0x237   : > { %v5346_v9 = vpop.f32.mrf.mxu0 }
 0x238   : > { %6042 = vst [vmem:[#allocation19_spill] sm:$0xff] %v5346_v9  ;;  %v5371_v9 = vpop.f32.mrf.mxu1 }
 0x23a   : > { %4237 = vmatmul.msk.f32.gmra.mxu0 %vm485_vm1, %v2342_v63 }
 0x23f   : > { %v2459_v21 = vpop.f32.mrf.mxu0 }
 0x240   : > { %v2543_v60 = vadd.f32 %v2459_v21, %v5169_v0  ;;  %v2344_v21 = vld [vmem:[%s4482_s18 + $0xaa] sm:$0xff]  ;;  %v5383_v62 = vpop.f32.mrf.mxu1 }
 0x242   : > { %v2574_v42 = vadd.f32 %v5359_v29, %v2543_v60  ;;  %4238 = vmatmul.msk.f32.gmra.mxu0 %vm485_vm1, %v2343_v1 }
 0x244   : > { %vm2602_vm3 = vcmp.gt.f32.partialorder %v2574_v42, 0.0  ;;  %v2633_v63 = vmul.f32 %v5366_v44, %v2574_v42 }
 0x246   : > { %v2661_v11 = vsel %vm2602_vm3, %v2574_v42, %v2633_v63  ;;  %v2345_v42 = vld [vmem:[%s4482_s18 + $0xb2] sm:$0xff]  ;;  %v5387_v63 = vpop.f32.mrf.mxu2 }
 0x247   : > { %2690 = vst.msk [vmem:[#allocation2] sm:$0xff] %vm2689_vm4, %v2661_v11  ;;  %v2462_v0 = vpop.f32.mrf.mxu0 }
 0x248   : > { %v2544_v60 = vadd.f32 %v2462_v0, %v5182_v24  ;;  %v5390_v24 = vpop.f32.mrf.mxu3 }
 0x24a   : > { %v2575_v1 = vadd.f32 %v5359_v29, %v2544_v60  ;;  %4239 = vmatmul.msk.f32.gmra.mxu0 %vm485_vm1, %v2344_v21  ;;  %v6043_v21 = vld [vmem:[#allocation28_spill] sm:$0xff] }
 0x24b   : > { %v1571_v60 = vadd.f32 %v5154_v48, %v6043_v21 }
 0x24c   : > { %vm2603_vm5 = vcmp.gt.f32.partialorder %v2575_v1, 0.0  ;;  %v2634_v43 = vmul.f32 %v5366_v44, %v2575_v1 }
 0x24d   : > { %v1815_v41 = vadd.f32 %v1739_v39, %v1571_v60 }
 0x24e   : > { %v2662_v13 = vsel %vm2603_vm5, %v2575_v1, %v2634_v43  ;;  %v5402_v30 = vpop.f32.mrf.mxu2 }
 0x24f   : > { %2691 = vst.msk [vmem:[#allocation2 + $0x8] sm:$0xff] %vm2689_vm4, %v2662_v13  ;;  %v2465_v11 = vpop.f32.mrf.mxu0 }
 0x250   : > { %v2545_v12 = vadd.f32 %v2465_v11, %v5195_v32  ;;  %v5400_v11 = vpop.f32.mrf.mxu1  ;;  %v5406_v2 = vpop.f32.mrf.mxu3 }
 0x252   : > { %v2576_v0 = vadd.f32 %v5359_v29, %v2545_v12  ;;  %4240 = vmatmul.msk.f32.gmra.mxu0 %vm485_vm1, %v2345_v42  ;;  %v2059_v12 = vadd.f32 %v1983_v28, %v1815_v41  ;;  %v2347_v28 = vld [vmem:[%s4482_s18 + $0xc2] sm:$0xff] }
 0x254   : > { %vm2604_vm6 = vcmp.gt.f32.partialorder %v2576_v0, 0.0  ;;  %v2635_v43 = vmul.f32 %v5366_v44, %v2576_v0  ;;  %v2303_v39 = vadd.f32 %v5333_v35, %v2059_v12 }
 0x256   : > { %v2663_v1 = vsel %vm2604_vm6, %v2576_v0, %v2635_v43  ;;  %v6044_v0 = vld [vmem:[#allocation32_spill] sm:$0xff]  ;;  %v2720_v12 = vld [vmem:[#allocation2 + $0x1] ss:$2 sm:$0x7f] }
 0x257   : > { %2692 = vst.msk [vmem:[#allocation2 + $0x10] sm:$0xff] %vm2689_vm4, %v2663_v1  ;;  %v2468_v13 = vpop.f32.mrf.mxu0  ;;  %v1572_v43 = vadd.f32 %v5167_v37, %v6044_v0  ;;  %v5420_v37 = vpop.f32.mrf.mxu2 }
 0x258   : > { %v2546_v32 = vadd.f32 %v2468_v13, %v5209_v56  ;;  %v5418_v13 = vpop.f32.mrf.mxu1 }
 0x259   : > { %v1816_v21 = vadd.f32 %v5339_v19, %v1572_v43 }
 0x25a   : > { %v2577_v42 = vadd.f32 %v5359_v29, %v2546_v32  ;;  %4241 = vmatmul.msk.f32.gmra.mxu0 %vm485_vm1, %v2346_v36  ;;  %v2718_v32 = vld [vmem:[#allocation2] ss:$2 sm:$0x7f] }
 0x25b   : > { %v2060_v36 = vadd.f32 %v5341_v49, %v1816_v21  ;;  %v5427_v49 = vpop.f32.mrf.mxu3 }
 0x25c   : > { %vm2605_vm7 = vcmp.gt.f32.partialorder %v2577_v42, 0.0  ;;  %v2636_v48 = vmul.f32 %v5366_v44, %v2577_v42 }
 0x25d   : > { %v2304_v0 = vadd.f32 %v5344_v38, %v2060_v36  ;;  %v2803_v38 = vld [vmem:[%s5928_s4 + $0x10] sm:$0xff] }
 0x25e   : > { %v2664_v56 = vsel %vm2605_vm7, %v2577_v42, %v2636_v48  ;;  %v2348_v42 = vld [vmem:[%s4482_s18 + $0xca] sm:$0xff]  ;;  %2865 = vmatpush.msra.mxu1 %v2803_v38 }
 0x25f   : > { %2693 = vst.msk [vmem:[#allocation2 + $0x18] sm:$0xff] %vm2689_vm4, %v2664_v56  ;;  %v2471_v41 = vpop.f32.mrf.mxu0  ;;  %v6045_v48 = vld [vmem:[#allocation35_spill] sm:$0xff] }
 0x260   : > { %v2547_v60 = vadd.f32 %v2471_v41, %v2303_v39  ;;  %v1573_v19 = vadd.f32 %v5180_v50, %v6045_v48  ;;  %v2805_v50 = vld [vmem:[%s5928_s4 + $0x20] sm:$0xff] }
 0x261   : > { %2970 = vmatpush.msrb.mxu3 %v2805_v50 }
 0x262   : > { %v2578_v1 = vadd.f32 %v5359_v29, %v2547_v60  ;;  %4242 = vmatmul.msk.f32.gmra.mxu0 %vm485_vm1, %v2347_v28  ;;  %v2801_v60 = vld [vmem:[%s5928_s4] sm:$0xff]  ;;  %v1817_v36 = vadd.f32 %v5350_v3, %v1573_v19 }
 0x263   : > { %2915 = vmatpush.msrb.mxu2 %v2801_v60  ;;  %v6046_v3 = vld [vmem:[#allocation37_spill] sm:$0xff] }
 0x264   : > { %vm2606_vm8 = vcmp.gt.f32.partialorder %v2578_v1, 0.0  ;;  %v2637_v35 = vmul.f32 %v5366_v44, %v2578_v1  ;;  %v1574_v19 = vadd.f32 %v5193_v45, %v6046_v3 }
 0x266   : > { %v2722_v43 = vld [vmem:[#allocation2 + $0x10] ss:$2 sm:$0x7f]  ;;  %v2725_v39 = vld [vmem:[#allocation2 + $0x11] ss:$2 sm:$0x7f]  ;;  %v2665_v56 = vsel %vm2606_vm8, %v2578_v1, %v2637_v35 }
 0x267   : > { %v2723_v41 = vmax.f32 %v2718_v32, %v2722_v43  ;;  %v2726_v28 = vmax.f32 %v2720_v12, %v2725_v39  ;;  %2694 = vst.msk [vmem:[#allocation2 + $0x20] sm:$0xff] %vm2689_vm4, %v2665_v56  ;;  %v2474_v21 = vpop.f32.mrf.mxu0  ;;  %v2061_v32 = vadd.f32 %v5352_v34, %v1817_v36  ;;  %v5445_v43 = vpop.f32.mrf.mxu1 }
 0x268   : > { %v2548_v1 = vadd.f32 %v2474_v21, %v2304_v0  ;;  %v5450_v39 = vpop.f32.mrf.mxu2 }
 0x269   : > { %v2727_v35 = vmax.f32 %v2723_v41, %v2726_v28  ;;  %v2305_v0 = vadd.f32 %v5354_v51, %v2061_v32  ;;  %v1818_v41 = vadd.f32 %v5371_v9, %v1574_v19  ;;  %v5455_v28 = vpop.f32.mrf.mxu3  ;;  %v6047_v51 = vld [vmem:[#allocation38_spill] sm:$0xff]  ;;  %v2350_v32 = vld [vmem:[%s4482_s18 + $0xda] sm:$0xff] }
 0x26a   : > { %v2579_v12 = vadd.f32 %v5359_v29, %v2548_v1  ;;  %4243 = vmatmul.msk.f32.gmra.mxu0 %vm485_vm1, %v2348_v42  ;;  %v2349_v42 = vld [vmem:[%s4482_s18 + $0xd2] sm:$0xff]  ;;  %v1575_v38 = vadd.f32 %v5206_v7, %v6047_v51 }
 0x26b   : > { %2728 = vst.msk [vmem:[#allocation3] sm:$0x7f] %vm414_vm9, %v2727_v35  ;;  %v2062_v60 = vadd.f32 %v5373_v52, %v1818_v41 }
 0x26c   : > { %vm2607_vm10 = vcmp.gt.f32.partialorder %v2579_v12, 0.0  ;;  %v2638_v48 = vmul.f32 %v5366_v44, %v2579_v12  ;;  %v1819_v52 = vadd.f32 %v5383_v62, %v1575_v38 }
 0x26d   : > { %v2306_v36 = vadd.f32 %v5377_v16, %v2062_v60 }
 0x26e   : > { %v2666_v56 = vsel %vm2607_vm10, %v2579_v12, %v2638_v48  ;;  %v2063_v3 = vadd.f32 %v5387_v63, %v1819_v52 }
 0x26f   : > { %2695 = vst.msk [vmem:[#allocation2 + $0x28] sm:$0xff] %vm2689_vm4, %v2666_v56  ;;  %v2477_v34 = vpop.f32.mrf.mxu0  ;;  %v5464_v35 = vpop.f32.mrf.mxu1 }
 0x270   : > { %v2549_v21 = vadd.f32 %v2477_v34, %v2305_v0  ;;  %v5469_v12 = vpop.f32.mrf.mxu2  ;;  %v6048_v0 = vld [vmem:[#allocation39_spill] sm:$0xff]  ;;  %v2307_v34 = vadd.f32 %v5390_v24, %v2063_v3 }
 0x271   : > { %v5472_v19 = vpop.f32.mrf.mxu3  ;;  %v1576_v56 = vadd.f32 %v5218_v33, %v6048_v0 }
 0x272   : > { %v2580_v50 = vadd.f32 %v5359_v29, %v2549_v21  ;;  %4244 = vmatmul.msk.f32.gmra.mxu0 %vm485_vm1, %v2349_v42 }
 0x273   : > { %v1820_v63 = vadd.f32 %v5400_v11, %v1576_v56  ;;  %v1577_v11 = vadd.f32 %v5227_v15, %v4982_v54 }
 0x274   : > { %vm2608_vm11 = vcmp.gt.f32.partialorder %v2580_v50, 0.0  ;;  %v2639_v45 = vmul.f32 %v5366_v44, %v2580_v50 }
 0x275   : > { %v2064_v60 = vadd.f32 %v5402_v30, %v1820_v63 }
 0x276   : > { %v2667_v1 = vsel %vm2608_vm11, %v2580_v50, %v2639_v45  ;;  %v2730_v51 = vld [vmem:[#allocation2 + $0x20] ss:$2 sm:$0x7f]  ;;  %v2732_v38 = vld [vmem:[#allocation2 + $0x21] ss:$2 sm:$0x7f] }
 0x277   : > { %2696 = vst.msk [vmem:[#allocation2 + $0x30] sm:$0xff] %vm2689_vm4, %v2667_v1  ;;  %v2480_v9 = vpop.f32.mrf.mxu0  ;;  %v5482_v21 = vpop.f32.mrf.mxu1 }
 0x278   : > { %v2550_v48 = vadd.f32 %v2480_v9, %v2306_v36  ;;  %v5485_v50 = vpop.f32.mrf.mxu2  ;;  %v2308_v36 = vadd.f32 %v5406_v2, %v2064_v60 }
 0x279   : > { %v5490_v33 = vpop.f32.mrf.mxu3 }
 0x27a   : > { %v2581_v7 = vadd.f32 %v5359_v29, %v2550_v48  ;;  %4245 = vmatmul.msk.f32.gmra.mxu0 %vm485_vm1, %v2350_v32  ;;  %v1821_v48 = vadd.f32 %v5418_v13, %v1577_v11  ;;  %v1578_v13 = vadd.f32 %v5236_v40, %v4992_v61 }
 0x27c   : > { %vm2609_vm12 = vcmp.gt.f32.partialorder %v2581_v7, 0.0  ;;  %v2640_v16 = vmul.f32 %v5366_v44, %v2581_v7 }
 0x27e   : > { %v2668_v62 = vsel %vm2609_vm12, %v2581_v7, %v2640_v16  ;;  %v2065_v16 = vadd.f32 %v5420_v37, %v1821_v48 }
 0x27f   : > { %2697 = vst.msk [vmem:[#allocation2 + $0x38] sm:$0xff] %vm2689_vm4, %v2668_v62  ;;  %v2483_v42 = vpop.f32.mrf.mxu0  ;;  %v5502_v54 = vpop.f32.mrf.mxu1  ;;  %v2353_v62 = vld [vmem:[%s4482_s18 + $0xf2] sm:$0xff] }
 0x280   : > { %v2551_v41 = vadd.f32 %v2483_v42, %v2307_v34  ;;  %v5505_v2 = vpop.f32.mrf.mxu2  ;;  %v2309_v56 = vadd.f32 %v5427_v49, %v2065_v16  ;;  %v1822_v42 = vadd.f32 %v5445_v43, %v1578_v13 }
 0x281   : > { %v5511_v37 = vpop.f32.mrf.mxu3 }
 0x282   : > { %v2582_v45 = vadd.f32 %v5359_v29, %v2551_v41  ;;  %4246 = vmatmul.msk.f32.gmra.mxu0 %vm485_vm1, %v5241_v10  ;;  %v2066_v41 = vadd.f32 %v5450_v39, %v1822_v42  ;;  %v1579_v39 = vadd.f32 %v5248_v59, %v5002_v8  ;;  %v1580_v59 = vadd.f32 %v5260_v55, %v5012_v58 }
 0x284   : > { %vm2610_vm13 = vcmp.gt.f32.partialorder %v2582_v45, 0.0  ;;  %v2641_v24 = vmul.f32 %v5366_v44, %v2582_v45 }
 0x286   : > { %v2734_v30 = vld [vmem:[#allocation2 + $0x30] ss:$2 sm:$0x7f]  ;;  %v2737_v1 = vld [vmem:[#allocation2 + $0x31] ss:$2 sm:$0x7f]  ;;  %v2669_v9 = vsel %vm2610_vm13, %v2582_v45, %v2641_v24  ;;  %v2310_v24 = vadd.f32 %v5455_v28, %v2066_v41 }
 0x287   : > { %v2735_v32 = vmax.f32 %v2730_v51, %v2734_v30  ;;  %v2738_v52 = vmax.f32 %v2732_v38, %v2737_v1  ;;  %2698 = vst.msk [vmem:[#allocation2 + $0x40] sm:$0xff] %vm2689_vm4, %v2669_v9  ;;  %v2486_v10 = vpop.f32.mrf.mxu0  ;;  %v1772_v43 = vpop.f32.mrf.mxu1  ;;  %v1823_v30 = vadd.f32 %v5464_v35, %v1579_v39 }
 0x288   : > { %v2552_v3 = vadd.f32 %v2486_v10, %v2308_v36  ;;  %v2016_v51 = vpop.f32.mrf.mxu2  ;;  %v2354_v36 = vld [vmem:[%s4482_s18 + $0xfa] sm:$0xff]  ;;  %s4339_s18 = smul.u32 24, %s6062_s22 }
 0x289   : > { %v2739_v7 = vmax.f32 %v2735_v32, %v2738_v52  ;;  %v5529_v1 = vpop.f32.mrf.mxu3  ;;  %v2067_v32 = vadd.f32 %v5469_v12, %v1823_v30 }
 0x28a   : > { %v2583_v0 = vadd.f32 %v5359_v29, %v2552_v3  ;;  %4247 = vmatmul.msk.f32.gmra.mxu0 %vm485_vm1, %v5252_v47  ;;  %v1824_v3 = vadd.f32 %v5482_v21, %v1580_v59  ;;  %s413_s14 = scalar_lea.vmem %s5936_s12, %s4339_s18 }
 0x28b   : > { %2740 = vst.msk [vmem:[#allocation3 + $0x7] sm:$0x7f] %vm414_vm9, %v2739_v7  ;;  %v2311_v28 = vadd.f32 %v5472_v19, %v2067_v32  ;;  %v1581_v19 = vadd.f32 %v5268_v17, %v5022_v26 }
 0x28c   : > { %vm2611_vm14 = vcmp.gt.f32.partialorder %v2583_v0, 0.0  ;;  %v2642_v15 = vmul.f32 %v5366_v44, %v2583_v0  ;;  %v2068_v16 = vadd.f32 %v5485_v50, %v1824_v3 }
 0x28e   : > { %v2670_v34 = vsel %vm2611_vm14, %v2583_v0, %v2642_v15 }
 0x28f   : > { %2699 = vst.msk [vmem:[#allocation2 + $0x48] sm:$0xff] %vm2689_vm4, %v2670_v34  ;;  %v2489_v47 = vpop.f32.mrf.mxu0  ;;  %v1775_v48 = vpop.f32.mrf.mxu1 }
 0x290   : > { %v2553_v63 = vadd.f32 %v2489_v47, %v2309_v56  ;;  %v2019_v12 = vpop.f32.mrf.mxu2  ;;  %v2312_v56 = vadd.f32 %v5490_v33, %v2068_v16 }
 0x291   : > { %v2263_v0 = vpop.f32.mrf.mxu3 }
 0x292   : > { %v2584_v60 = vadd.f32 %v5359_v29, %v2553_v63  ;;  %4248 = vmatmul.msk.f32.gmra.mxu0 %vm485_vm1, %v2353_v62  ;;  %v2826_v61 = vld [vmem:[#allocation3 + $0x1] sm:$0xff]  ;;  %v1825_v63 = vadd.f32 %v5502_v54, %v1581_v19 }
 0x293   : > { %v2821_v40 = vld [vmem:[#allocation3] sm:$0xff]  ;;  %4251 = vmatmul.msk.f32.vlgmr.msra.gmra.mxu1 %vm2689_vm4, %v2826_v61 }
 0x294   : > { %v2932_v49 = vld [vmem:[#allocation3 + $0x2] sm:$0xff]  ;;  %4257 = vmatmul.msk.f32.vlgmr.msrb.gmra.mxu2 %vm2689_vm4, %v2821_v40  ;;  %vm2612_vm15 = vcmp.gt.f32.partialorder %v2584_v60, 0.0  ;;  %v2643_v45 = vmul.f32 %v5366_v44, %v2584_v60  ;;  %v2069_v40 = vadd.f32 %v5505_v2, %v1825_v63 }
 0x295   : > { %4263 = vmatmul.msk.f32.vlgmr.msrb.gmra.mxu3 %vm2689_vm4, %v2932_v49 }
 0x296   : > { %v2671_v38 = vsel %vm2612_vm15, %v2584_v60, %v2643_v45  ;;  %v2742_v58 = vld [vmem:[#allocation2 + $0x40] ss:$2 sm:$0x7f]  ;;  %v2744_v55 = vld [vmem:[#allocation2 + $0x41] ss:$2 sm:$0x7f]  ;;  %v1582_v45 = vadd.f32 %v5276_v6, %v5032_v4  ;;  %v2313_v39 = vadd.f32 %v5511_v37, %v2069_v40  ;;  %v1583_v37 = vadd.f32 %v5282_v53, %v5042_v23 }
 0x297   : > { %2700 = vst.msk [vmem:[#allocation2 + $0x50] sm:$0xff] %vm2689_vm4, %v2671_v38  ;;  %v2492_v11 = vpop.f32.mrf.mxu0  ;;  %v1778_v60 = vpop.f32.mrf.mxu1 }
 0x298   : > { %v2554_v9 = vadd.f32 %v2492_v11, %v2310_v24  ;;  %v2022_v49 = vpop.f32.mrf.mxu2  ;;  %v1826_v38 = vadd.f32 %v1772_v43, %v1582_v45 }
 0x299   : > { %v2266_v17 = vpop.f32.mrf.mxu3 }
 0x29a   : > { %v2585_v52 = vadd.f32 %v5359_v29, %v2554_v9  ;;  %4249 = vmatmul.msk.f32.gmra.mxu0 %vm485_vm1, %v2354_v36  ;;  %v2070_v11 = vadd.f32 %v2016_v51, %v1826_v38 }
 0x29c   : > { %vm2613_vm0 = vcmp.gt.f32.partialorder %v2585_v52, 0.0  ;;  %v2644_v8 = vmul.f32 %v5366_v44, %v2585_v52  ;;  %v2314_v43 = vadd.f32 %v5529_v1, %v2070_v11 }
 0x29e   : > { %v2672_v10 = vsel %vm2613_vm0, %v2585_v52, %v2644_v8 }
 0x29f   : > { %2701 = vst.msk [vmem:[#allocation2 + $0x58] sm:$0xff] %vm2689_vm4, %v2672_v10  ;;  %v2495_v35 = vpop.f32.mrf.mxu0  ;;  %v1781_v52 = vpop.f32.mrf.mxu1 }
 0x2a0   : > { %v2555_v7 = vadd.f32 %v2495_v35, %v2311_v28  ;;  %v2025_v4 = vpop.f32.mrf.mxu2  ;;  %v1827_v28 = vadd.f32 %v1775_v48, %v1583_v37  ;;  %v1587_v37 = vadd.f32 %v5310_v22, %v5082_v5  ;;  %v2808_v5 = vld [vmem:[%s5928_s4 + $0x38] sm:$0x3] }
 0x2a1   : > { %v2269_v51 = vpop.f32.mrf.mxu3  ;;  %4268 = vmatpush.msk.msrb.mxu1 %vm2846_vm2, %v2808_v5 }
 0x2a2   : > { %v2586_v15 = vadd.f32 %v5359_v29, %v2555_v7  ;;  %v2071_v35 = vadd.f32 %v2019_v12, %v1827_v28  ;;  %v2812_v28 = vld [vmem:[%s5928_s4 + $0x58] sm:$0x3] }
 0x2a3   : > { %4280 = vmatpush.msk.msra.mxu3 %vm2846_vm2, %v2812_v28  ;;  %v6053_v28 = vld [vmem:[#allocation5_spill] sm:$0xff] }
 0x2a4   : > { %vm2614_vm1 = vcmp.gt.f32.partialorder %v2586_v15, 0.0  ;;  %v2645_v13 = vmul.f32 %v5366_v44, %v2586_v15  ;;  %v2315_v23 = vadd.f32 %v2263_v0, %v2071_v35 }
 0x2a6   : > { %v2746_v34 = vld [vmem:[#allocation2 + $0x50] ss:$2 sm:$0x7f]  ;;  %v2749_v47 = vld [vmem:[#allocation2 + $0x51] ss:$2 sm:$0x7f]  ;;  %v2673_v21 = vsel %vm2614_vm1, %v2586_v15, %v2645_v13  ;;  %v1584_v15 = vadd.f32 %v5286_v31, %v5052_v14  ;;  %v1585_v14 = vadd.f32 %v5290_v57, %v5062_v25  ;;  %v1586_v57 = vadd.f32 %v5305_v18, %v5072_v20 }
 0x2a7   : > { %2702 = vst.msk [vmem:[#allocation2 + $0x60] sm:$0xff] %vm2689_vm4, %v2673_v21  ;;  %v2498_v62 = vpop.f32.mrf.mxu0  ;;  %v2747_v50 = vmax.f32 %v2742_v58, %v2746_v34  ;;  %v2750_v42 = vmax.f32 %v2744_v55, %v2749_v47  ;;  %v1784_v16 = vpop.f32.mrf.mxu1 }
 0x2a8   : > { %v2556_v41 = vadd.f32 %v2498_v62, %v2312_v56  ;;  %v2028_v53 = vpop.f32.mrf.mxu2  ;;  %v1828_v58 = vadd.f32 %v1778_v60, %v1584_v15  ;;  %v1829_v60 = vadd.f32 %v1781_v52, %v1585_v14  ;;  %v6049_v14 = vld [vmem:[#allocation40_spill] sm:$0xff] }
 0x2a9   : > { %v2751_v61 = vmax.f32 %v2747_v50, %v2750_v42  ;;  %v2272_v55 = vpop.f32.mrf.mxu3 }
 0x2aa   : > { %v2587_v26 = vadd.f32 %v5359_v29, %v2556_v41  ;;  %v2072_v19 = vadd.f32 %v2022_v49, %v1828_v58 }
 0x2ab   : > { %2752 = vst.msk [vmem:[#allocation3 + $0xe] sm:$0x7f] %vm414_vm9, %v2751_v61 }
 0x2ac   : > { %vm2615_vm3 = vcmp.gt.f32.partialorder %v2587_v26, 0.0  ;;  %v2646_v33 = vmul.f32 %v5366_v44, %v2587_v26  ;;  %v2316_v31 = vadd.f32 %v2266_v17, %v2072_v19 }
 0x2ae   : > { %v2674_v54 = vsel %vm2615_vm3, %v2587_v26, %v2646_v33  ;;  %v2073_v26 = vadd.f32 %v2025_v4, %v1829_v60 }
 0x2af   : > { %2703 = vst.msk [vmem:[#allocation2 + $0x68] sm:$0xff] %vm2689_vm4, %v2674_v54  ;;  %v2501_v24 = vpop.f32.mrf.mxu0  ;;  %v1787_v50 = vpop.f32.mrf.mxu1 }
 0x2b0   : > { %v2557_v2 = vadd.f32 %v2501_v24, %v2313_v39  ;;  %v2031_v61 = vpop.f32.mrf.mxu2  ;;  %v2317_v17 = vadd.f32 %v2269_v51, %v2073_v26  ;;  %v1830_v24 = vadd.f32 %v1784_v16, %v1586_v57 }
 0x2b1   : > { %v2275_v33 = vpop.f32.mrf.mxu3 }
 0x2b2   : > { %v2588_v36 = vadd.f32 %v5359_v29, %v2557_v2  ;;  %v5557_v30 = vld [vmem:[#allocation3 + $0x9] sm:$0xff]  ;;  %v2074_v11 = vadd.f32 %v2028_v53, %v1830_v24 }
 0x2b3   : > { %v5559_v9 = vld [vmem:[#allocation3 + $0x8] sm:$0xff]  ;;  %4252 = vmatmul.msk.f32.gmra.mxu1 %vm2689_vm4, %v5557_v30 }
 0x2b4   : > { %v2933_v32 = vld [vmem:[#allocation3 + $0xa] sm:$0xff]  ;;  %4258 = vmatmul.msk.f32.gmra.mxu2 %vm2689_vm4, %v5559_v9  ;;  %vm2616_vm5 = vcmp.gt.f32.partialorder %v2588_v36, 0.0  ;;  %v2647_v6 = vmul.f32 %v5366_v44, %v2588_v36 }
 0x2b5   : > { %4264 = vmatmul.msk.f32.gmra.mxu3 %vm2689_vm4, %v2933_v32 }
 0x2b6   : > { %v2675_v8 = vsel %vm2616_vm5, %v2588_v36, %v2647_v6  ;;  %v2754_v34 = vld [vmem:[#allocation2 + $0x60] ss:$2 sm:$0x7f]  ;;  %v2756_v47 = vld [vmem:[#allocation2 + $0x61] ss:$2 sm:$0x7f] }
 0x2b7   : > { %2704 = vst.msk [vmem:[#allocation2 + $0x70] sm:$0xff] %vm2689_vm4, %v2675_v8  ;;  %v2504_v59 = vpop.f32.mrf.mxu0  ;;  %v1790_v2 = vpop.f32.mrf.mxu1  ;;  %vm416_vm5 = vcmask 126976  }
 0x2b8   : > { %v2558_v10 = vadd.f32 %v2504_v59, %v2314_v43  ;;  %v2034_v36 = vpop.f32.mrf.mxu2  ;;  %v2318_v43 = vadd.f32 %v2272_v55, %v2074_v11  ;;  %v2810_v59 = vld [vmem:[%s5928_s4 + $0x48] sm:$0x3] }
 0x2b9   : > { %v2278_v20 = vpop.f32.mrf.mxu3  ;;  %4274 = vmatpush.msk.msra.mxu2 %vm2846_vm2, %v2810_v59 }
 0x2ba   : > { %v2589_v3 = vadd.f32 %v5359_v29, %v2558_v10  ;;  %v1831_v10 = vadd.f32 %v1787_v50, %v1587_v37 }
 0x2bc   : > { %vm2617_vm6 = vcmp.gt.f32.partialorder %v2589_v3, 0.0  ;;  %v2648_v7 = vmul.f32 %v5366_v44, %v2589_v3  ;;  %v2075_v22 = vadd.f32 %v2031_v61, %v1831_v10  ;;  %v6054_v10 = vld [vmem:[#allocation8_spill] sm:$0xff] }
 0x2be   : > { %v2676_v1 = vsel %vm2617_vm6, %v2589_v3, %v2648_v7  ;;  %v2319_v53 = vadd.f32 %v2275_v33, %v2075_v22 }
 0x2bf   : > { %2705 = vst.msk [vmem:[#allocation2 + $0x78] sm:$0xff] %vm2689_vm4, %v2676_v1  ;;  %v2507_v13 = vpop.f32.mrf.mxu0  ;;  %v1793_v7 = vpop.f32.mrf.mxu1 }
 0x2c0   : > { %v2559_v48 = vadd.f32 %v2507_v13, %v2315_v23  ;;  %v2037_v16 = vpop.f32.mrf.mxu2  ;;  %v1588_v23 = vadd.f32 %v5314_v46, %v5092_v27 }
 0x2c1   : > { %v2281_v1 = vpop.f32.mrf.mxu3 }
 0x2c2   : > { %v2590_v12 = vadd.f32 %v5359_v29, %v2559_v48  ;;  %v1832_v55 = vadd.f32 %v1790_v2, %v1588_v23 }
 0x2c4   : > { %vm2618_vm7 = vcmp.gt.f32.partialorder %v2590_v12, 0.0  ;;  %v2649_v56 = vmul.f32 %v5366_v44, %v2590_v12  ;;  %v2076_v19 = vadd.f32 %v2034_v36, %v1832_v55 }
 0x2c6   : > { %v2758_v0 = vld [vmem:[#allocation2 + $0x70] ss:$2 sm:$0x7f]  ;;  %v2761_v21 = vld [vmem:[#allocation2 + $0x71] ss:$2 sm:$0x7f]  ;;  %v2677_v62 = vsel %vm2618_vm7, %v2590_v12, %v2649_v56 }
 0x2c7   : > { %2706 = vst.msk [vmem:[#allocation2 + $0x80] sm:$0xff] %vm2689_vm4, %v2677_v62  ;;  %v2510_v42 = vpop.f32.mrf.mxu0  ;;  %v2759_v63 = vmax.f32 %v2754_v34, %v2758_v0  ;;  %v2762_v41 = vmax.f32 %v2756_v47, %v2761_v21  ;;  %v2809_v56 = vld [vmem:[%s5928_s4 + $0x40] sm:$0xff]  ;;  %v1796_v27 = vpop.f32.mrf.mxu1  ;;  %v2320_v21 = vadd.f32 %v2278_v20, %v2076_v19 }
 0x2c8   : > { %v2560_v40 = vadd.f32 %v2510_v42, %v2316_v31  ;;  %3090 = vmatpush.msra.mxu2 %v2809_v56  ;;  %v6050_v31 = vld [vmem:[#allocation16_spill] sm:$0xff]  ;;  %v2040_v62 = vpop.f32.mrf.mxu2 }
 0x2c9   : > { %v2763_v49 = vmax.f32 %v2759_v63, %v2762_v41  ;;  %v1589_v0 = vadd.f32 %v6050_v31, %v6049_v14  ;;  %v6056_v56 = vld [vmem:[#allocation20_spill] sm:$0xff] }
 0x2ca   : > { %v2591_v45 = vadd.f32 %v5359_v29, %v2560_v40 }
 0x2cb   : > { %2764 = vst.msk [vmem:[#allocation3 + $0x15] sm:$0x7f] %vm414_vm9, %v2763_v49  ;;  %v1833_v40 = vadd.f32 %v1793_v7, %v1589_v0  ;;  %v2284_v49 = vpop.f32.mrf.mxu3  ;;  %v2811_v7 = vld [vmem:[%s5928_s4 + $0x50] sm:$0xff] }
 0x2cc   : > { %vm2619_vm8 = vcmp.gt.f32.partialorder %v2591_v45, 0.0  ;;  %v2650_v25 = vmul.f32 %v5366_v44, %v2591_v45  ;;  %3150 = vmatpush.msra.mxu3 %v2811_v7 }
 0x2ce   : > { %v2678_v39 = vsel %vm2619_vm8, %v2591_v45, %v2650_v25  ;;  %v2077_v45 = vadd.f32 %v2037_v16, %v1833_v40  ;;  %v2807_v16 = vld [vmem:[%s5928_s4 + $0x30] sm:$0xff] }
 0x2cf   : > { %2707 = vst.msk [vmem:[#allocation2 + $0x88] sm:$0xff] %vm2689_vm4, %v2678_v39  ;;  %v2513_v54 = vpop.f32.mrf.mxu0  ;;  %v6052_v39 = vld [vmem:[#allocation15_spill] sm:$0xff]  ;;  %v1799_v2 = vpop.f32.mrf.mxu1  ;;  %3030 = vmatpush.msrb.mxu1 %v2807_v16 }
 0x2d0   : > { %v2561_v38 = vadd.f32 %v2513_v54, %v2317_v17  ;;  %v6051_v17 = vld [vmem:[#allocation41_spill] sm:$0xff]  ;;  %v2321_v24 = vadd.f32 %v2281_v1, %v2077_v45 }
 0x2d1   : > { %v1590_v54 = vadd.f32 %v6052_v39, %v6051_v17 }
 0x2d2   : > { %v2592_v32 = vadd.f32 %v5359_v29, %v2561_v38  ;;  %v5588_v52 = vld [vmem:[#allocation3 + $0x11] sm:$0xff] }
 0x2d3   : > { %v5590_v4 = vld [vmem:[#allocation3 + $0x10] sm:$0xff]  ;;  %4253 = vmatmul.msk.f32.gmra.mxu1 %vm2689_vm4, %v5588_v52  ;;  %v1834_v36 = vadd.f32 %v1796_v27, %v1590_v54  ;;  %v2818_v54 = vld [vmem:[%s5928_s4 + $0x88] sm:$0x3] }
 0x2d4   : > { %v2934_v6 = vld [vmem:[#allocation3 + $0x12] sm:$0xff]  ;;  %4259 = vmatmul.msk.f32.gmra.mxu2 %vm2689_vm4, %v5590_v4  ;;  %vm2620_vm10 = vcmp.gt.f32.partialorder %v2592_v32, 0.0  ;;  %v2651_v18 = vmul.f32 %v5366_v44, %v2592_v32  ;;  %4298 = vmatpush.msk.msrb.mxu3 %vm2846_vm2, %v2818_v54 }
 0x2d5   : > { %4265 = vmatmul.msk.f32.gmra.mxu3 %vm2689_vm4, %v2934_v6  ;;  %v2078_v20 = vadd.f32 %v2040_v62, %v1834_v36 }
 0x2d6   : > { %v2679_v51 = vsel %vm2620_vm10, %v2592_v32, %v2651_v18  ;;  %v2766_v46 = vld [vmem:[#allocation2 + $0x80] ss:$2 sm:$0x7f]  ;;  %v2768_v47 = vld [vmem:[#allocation2 + $0x81] ss:$2 sm:$0x7f]  ;;  %v2043_v32 = vpop.f32.mrf.mxu2  ;;  %v2287_v18 = vpop.f32.mrf.mxu3 }
 0x2d7   : > { %2708 = vst.msk [vmem:[#allocation2 + $0x90] sm:$0xff] %vm2689_vm4, %v2679_v51  ;;  %v2516_v8 = vpop.f32.mrf.mxu0  ;;  %v2322_v5 = vadd.f32 %v2284_v49, %v2078_v20  ;;  %v2817_v20 = vld [vmem:[%s5928_s4 + $0x80] sm:$0xff] }
 0x2d8   : > { %v2562_v35 = vadd.f32 %v2516_v8, %v2318_v43  ;;  %3330 = vmatpush.msrb.mxu3 %v2817_v20 }
 0x2da   : > { %v2593_v3 = vadd.f32 %v5359_v29, %v2562_v35  ;;  %v1591_v35 = vadd.f32 %v6054_v10, %v6053_v28  ;;  %v6060_v28 = vld [vmem:[#allocation19_spill] sm:$0xff] }
 0x2dc   : > { %vm2621_vm11 = vcmp.gt.f32.partialorder %v2593_v3, 0.0  ;;  %v2652_v15 = vmul.f32 %v5366_v44, %v2593_v3 }
 0x2de   : > { %v2680_v13 = vsel %vm2621_vm11, %v2593_v3, %v2652_v15  ;;  %v1835_v15 = vadd.f32 %v1799_v2, %v1591_v35  ;;  %v2814_v2 = vld [vmem:[%s5928_s4 + $0x68] sm:$0x3]  ;;  %vm3383_vm11 = vcmask 124928  }
 0x2df   : > { %2709 = vst.msk [vmem:[#allocation2 + $0x98] sm:$0xff] %vm2689_vm4, %v2680_v13  ;;  %v2519_v58 = vpop.f32.mrf.mxu0  ;;  %v2046_v13 = vpop.f32.mrf.mxu2  ;;  %4286 = vmatpush.msk.msra.mxu1 %vm2846_vm2, %v2814_v2 }
 0x2e0   : > { %v2563_v48 = vadd.f32 %v2519_v58, %v2319_v53  ;;  %v1802_v53 = vpop.f32.mrf.mxu1  ;;  %v2079_v1 = vadd.f32 %v2043_v32, %v1835_v15 }
 0x2e2   : > { %v2594_v12 = vadd.f32 %v5359_v29, %v2563_v48  ;;  %v2290_v48 = vpop.f32.mrf.mxu3  ;;  %v2323_v27 = vadd.f32 %v2287_v18, %v2079_v1 }
 0x2e4   : > { %vm2622_vm12 = vcmp.gt.f32.partialorder %v2594_v12, 0.0  ;;  %v2653_v34 = vmul.f32 %v5366_v44, %v2594_v12 }
 0x2e6   : > { %v2770_v50 = vld [vmem:[#allocation2 + $0x90] ss:$2 sm:$0x7f]  ;;  %v2773_v42 = vld [vmem:[#allocation2 + $0x91] ss:$2 sm:$0x7f]  ;;  %v2681_v63 = vsel %vm2622_vm12, %v2594_v12, %v2653_v34 }
 0x2e7   : > { %2710 = vst.msk [vmem:[#allocation2 + $0xa0] sm:$0xff] %vm2689_vm4, %v2681_v63  ;;  %v2522_v41 = vpop.f32.mrf.mxu0  ;;  %v2771_v60 = vmax.f32 %v2766_v46, %v2770_v50  ;;  %v2774_v61 = vmax.f32 %v2768_v47, %v2773_v42  ;;  %v6055_v12 = vld [vmem:[#allocation12_spill] sm:$0xff]  ;;  %v2049_v50 = vpop.f32.mrf.mxu2 }
 0x2e8   : > { %v2564_v26 = vadd.f32 %v2522_v41, %v2320_v21  ;;  %v1592_v34 = vadd.f32 %v6056_v56, %v6055_v12  ;;  %v1805_v62 = vpop.f32.mrf.mxu1 }
 0x2e9   : > { %v2775_v33 = vmax.f32 %v2771_v60, %v2774_v61  ;;  %v6057_v60 = vld [vmem:[#allocation11_spill] sm:$0xff] }
 0x2ea   : > { %v2595_v25 = vadd.f32 %v5359_v29, %v2564_v26  ;;  %v1836_v14 = vadd.f32 %v1802_v53, %v1592_v34  ;;  %v6058_v61 = vld [vmem:[#allocation7_spill] sm:$0xff]  ;;  %v2293_v26 = vpop.f32.mrf.mxu3 }
 0x2eb   : > { %2776 = vst.msk [vmem:[#allocation3 + $0x1c] sm:$0x7f] %vm414_vm9, %v2775_v33  ;;  %v1593_v40 = vadd.f32 %v6058_v61, %v6057_v60 }
 0x2ec   : > { %vm2623_vm13 = vcmp.gt.f32.partialorder %v2595_v25, 0.0  ;;  %v2654_v57 = vmul.f32 %v5366_v44, %v2595_v25  ;;  %v2080_v0 = vadd.f32 %v2046_v13, %v1836_v14 }
 0x2ee   : > { %v2682_v38 = vsel %vm2623_vm13, %v2595_v25, %v2654_v57  ;;  %v2324_v49 = vadd.f32 %v2290_v48, %v2080_v0  ;;  %v2992_v0 = vld [vmem:[#allocation3 + $0x7] sm:$0xff]  ;;  %vm3794_vm13 = vcmask 261120  }
 0x2ef   : > { %2711 = vst.msk [vmem:[#allocation2 + $0xa8] sm:$0xff] %vm2689_vm4, %v2682_v38  ;;  %v2525_v11 = vpop.f32.mrf.mxu0 }
 0x2f0   : > { %v2565_v6 = vadd.f32 %v2525_v11, %v2321_v24  ;;  %v1837_v24 = vadd.f32 %v1805_v62, %v1593_v40 }
 0x2f2   : > { %v2596_v37 = vadd.f32 %v5359_v29, %v2565_v6  ;;  %v5633_v43 = vld [vmem:[#allocation3 + $0x19] sm:$0xff]  ;;  %v2081_v36 = vadd.f32 %v2049_v50, %v1837_v24  ;;  %v2815_v6 = vld [vmem:[%s5928_s4 + $0x70] sm:$0xff]  ;;  %v2296_v16 = vpop.f32.mrf.mxu3 }
 0x2f3   : > { %v5635_v51 = vld [vmem:[#allocation3 + $0x18] sm:$0xff]  ;;  %4254 = vmatmul.msk.f32.gmra.mxu1 %vm2689_vm4, %v5633_v43  ;;  %v2825_v55 = vld [vmem:[#allocation3 + $0x20] sm:$0x7] }
 0x2f4   : > { %v2935_v8 = vld [vmem:[#allocation3 + $0x1a] sm:$0xff]  ;;  %4260 = vmatmul.msk.f32.gmra.mxu2 %vm2689_vm4, %v5635_v51  ;;  %vm2624_vm14 = vcmp.gt.f32.partialorder %v2596_v37, 0.0  ;;  %v2655_v59 = vmul.f32 %v5366_v44, %v2596_v37  ;;  %v2325_v35 = vadd.f32 %v2293_v26, %v2081_v36 }
 0x2f5   : > { %4266 = vmatmul.msk.f32.gmra.mxu3 %vm2689_vm4, %v2935_v8  ;;  %v4378_v8 = vmov 0.0   ;;  %v3173_v54 = vld [vmem:[#allocation3 + $0x16] sm:$0xff] }
 0x2f6   : > { %v2683_v22 = vsel %vm2624_vm14, %v2596_v37, %v2655_v59  ;;  %v2778_v63 = vld [vmem:[#allocation2 + $0xa0] ss:$2 sm:$0x7f]  ;;  %v2780_v41 = vld [vmem:[#allocation2 + $0xa1] ss:$2 sm:$0x7f]  ;;  %v1808_v37 = vpop.f32.mrf.mxu1 }
 0x2f7   : > { %2712 = vst.msk [vmem:[#allocation2 + $0xb0] sm:$0xff] %vm2689_vm4, %v2683_v22  ;;  %v2528_v3 = vpop.f32.mrf.mxu0  ;;  %v6059_v59 = vld [vmem:[#allocation6_spill] sm:$0xff] }
 0x2f8   : > { %v2566_v23 = vadd.f32 %v2528_v3, %v2322_v5  ;;  %415 = vst.msk [vmem:[#allocation3 + $0x31] sm:$0x7f] %vm414_vm9, %v4378_v8  ;;  %v1594_v10 = vadd.f32 %v6060_v28, %v6059_v59  ;;  %v2052_v5 = vpop.f32.mrf.mxu2 }
 0x2f9   : > { %417 = vst.msk [vmem:[#allocation4 + $0x23] sm:$0x1f] %vm416_vm5, %v4378_v8 }
 0x2fa   : > { %v2597_v58 = vadd.f32 %v5359_v29, %v2566_v23  ;;  %v1838_v7 = vadd.f32 %v1808_v37, %v1594_v10  ;;  %v2813_v23 = vld [vmem:[%s5928_s4 + $0x60] sm:$0xff] }
 0x2fb   : > { %3210 = vmatpush.msra.mxu1 %v2813_v23 }
 0x2fc   : > { %4261 = vmatmul.msk.f32.gmra.mxu2 %vm2689_vm4, %v2825_v55  ;;  %vm2625_vm15 = vcmp.gt.f32.partialorder %v2597_v58, 0.0  ;;  %v2656_v19 = vmul.f32 %v5366_v44, %v2597_v58  ;;  %v2082_v53 = vadd.f32 %v2052_v5, %v1838_v7 }
 0x2fe   : > { %v2684_v46 = vsel %vm2625_vm15, %v2597_v58, %v2656_v19  ;;  %v2326_v48 = vadd.f32 %v2296_v16, %v2082_v53 }
 0x2ff   : > { %2713 = vst.msk [vmem:[#allocation2 + $0xb8] sm:$0xff] %vm2689_vm4, %v2684_v46  ;;  %v2531_v47 = vpop.f32.mrf.mxu0 }
 0x300   : > { %v2567_v31 = vadd.f32 %v2531_v47, %v2323_v27 }
 0x302   : > { %v2598_v21 = vadd.f32 %v5359_v29, %v2567_v31 }
 0x304   : > { %4275 = vmatmul.msk.f32.vlgmr.msra.gmra.mxu2 %vm2689_vm4, %v5559_v9  ;;  %vm2626_vm0 = vcmp.gt.f32.partialorder %v2598_v21, 0.0  ;;  %v2657_v42 = vmul.f32 %v5366_v44, %v2598_v21  ;;  %v2816_v9 = vld [vmem:[%s5928_s4 + $0x78] sm:$0x3] }
 0x305   : > { %4292 = vmatpush.msk.msrb.mxu2 %vm2846_vm2, %v2816_v9  ;;  %v3172_v9 = vld [vmem:[#allocation3 + $0xe] sm:$0xff] }
 0x306   : > { %v2782_v33 = vld [vmem:[#allocation2 + $0xb0] ss:$2 sm:$0x7f]  ;;  %v2785_v45 = vld [vmem:[#allocation2 + $0xb1] ss:$2 sm:$0x7f]  ;;  %v2685_v25 = vsel %vm2626_vm0, %v2598_v21, %v2657_v42 }
 0x307   : > { %2714 = vst.msk [vmem:[#allocation2 + $0xc0] sm:$0xff] %vm2689_vm4, %v2685_v25  ;;  %v2534_v57 = vpop.f32.mrf.mxu0  ;;  %v2783_v17 = vmax.f32 %v2778_v63, %v2782_v33  ;;  %v2786_v39 = vmax.f32 %v2780_v41, %v2785_v45  ;;  %3270 = vmatpush.msrb.mxu2 %v2815_v6  ;;  %v2993_v42 = vld [vmem:[#allocation3 + $0xf] sm:$0xff] }
 0x308   : > { %v2568_v38 = vadd.f32 %v2534_v57, %v2324_v49  ;;  %v2994_v49 = vld [vmem:[#allocation3 + $0x17] sm:$0xff] }
 0x309   : > { %v2787_v11 = vmax.f32 %v2783_v17, %v2786_v39 }
 0x30a   : > { %v2599_v32 = vadd.f32 %v5359_v29, %v2568_v38 }
 0x30b   : > { %2788 = vst.msk [vmem:[#allocation3 + $0x23] sm:$0x7f] %vm414_vm9, %v2787_v11 }
 0x30c   : > { %4276 = vmatmul.msk.f32.gmra.mxu2 %vm2689_vm4, %v5590_v4  ;;  %vm2627_vm1 = vcmp.gt.f32.partialorder %v2599_v32, 0.0  ;;  %v2658_v18 = vmul.f32 %v5366_v44, %v2599_v32 }
 0x30e   : > { %v2686_v22 = vsel %vm2627_vm1, %v2599_v32, %v2658_v18 }
 0x30f   : > { %2715 = vst.msk [vmem:[#allocation2 + $0xc8] sm:$0xff] %vm2689_vm4, %v2686_v22  ;;  %v2537_v3 = vpop.f32.mrf.mxu0 }
 0x310   : > { %v2569_v15 = vadd.f32 %v2537_v3, %v2325_v35  ;;  %v2867_v12 = vpop.f32.mrf.mxu1 }
 0x312   : > { %v2600_v1 = vadd.f32 %v5359_v29, %v2569_v15  ;;  %v2830_v13 = vld [vmem:[#allocation3 + $0x21] sm:$0x7]  ;;  %v2996_v39 = vld [vmem:[#allocation3 + $0x27] sm:$0x7] }
 0x313   : > { %v2936_v58 = vld [vmem:[#allocation3 + $0x22] sm:$0x7]  ;;  %4255 = vmatmul.msk.f32.gmra.mxu1 %vm2689_vm4, %v2830_v13  ;;  %v3386_v15 = vld [vmem:[%s5931_s7 + $0x8] sm:$0xff] }
 0x314   : > { %4267 = vmatmul.msk.f32.gmra.mxu3 %vm2689_vm4, %v2936_v58  ;;  %vm2628_vm2 = vcmp.gt.f32.partialorder %v2600_v1, 0.0  ;;  %v2659_v55 = vmul.f32 %v5366_v44, %v2600_v1  ;;  %4277 = vmatmul.msk.f32.gmra.mxu2 %vm2689_vm4, %v5635_v51  ;;  %v3055_v21 = vld [vmem:[#allocation3 + $0x20] sm:$0xff]  ;;  %v3390_v13 = vld [vmem:[%s5931_s7 + $0x28] sm:$0xff]  ;;  %v3388_v58 = vld [vmem:[%s5931_s7 + $0x18] sm:$0xff] }
 0x315   : > { %v3174_v24 = vld [vmem:[#allocation3 + $0x1e] sm:$0xff]  ;;  %3469 = vmatpush.msra.mxu2 %v3386_v15 }
 0x316   : > { %v2687_v19 = vsel %vm2628_vm2, %v2600_v1, %v2659_v55  ;;  %v2792_v63 = vld [vmem:[#allocation2 + $0xc1] ss:$2 sm:$0x7f] }
 0x317   : > { %v2917_v56 = vpop.f32.mrf.mxu2  ;;  %2716 = vst.msk [vmem:[#allocation2 + $0xd0] sm:$0xff] %vm2689_vm4, %v2687_v19  ;;  %v2540_v27 = vpop.f32.mrf.mxu0 }
 0x318   : > { %v2918_v34 = vadd.f32 %v2917_v56, %v2867_v12  ;;  %v2972_v46 = vpop.f32.mrf.mxu3  ;;  %v2570_v47 = vadd.f32 %v2540_v27, %v2326_v48 }
 0x31a   : > { %v5703_v14 = vadd.f32 %v2972_v46, %v2918_v34  ;;  %v2601_v31 = vadd.f32 %v5359_v29, %v2570_v47  ;;  %v2790_v29 = vld [vmem:[#allocation2 + $0xc0] ss:$2 sm:$0x7f] }
 0x31b   : > { %4269 = vmatmul.msk.f32.vlgmr.msrb.gmra.mxu1 %vm2689_vm4, %v2992_v0  ;;  %v3385_v47 = vld [vmem:[%s5931_s7] sm:$0xff]  ;;  %v3387_v0 = vld [vmem:[%s5931_s7 + $0x10] sm:$0xff] }
 0x31c   : > { %4281 = vmatmul.msk.f32.vlgmr.msra.gmra.mxu3 %vm2689_vm4, %v5557_v30  ;;  %vm2629_vm3 = vcmp.gt.f32.partialorder %v2601_v31, 0.0  ;;  %v2660_v62 = vmul.f32 %v5366_v44, %v2601_v31  ;;  %4278 = vmatmul.msk.f32.gmra.mxu2 %vm2689_vm4, %v3055_v21  ;;  %v2995_v44 = vld [vmem:[#allocation3 + $0x1f] sm:$0xff] }
 0x31d   : > { %3507 = vmatpush.msra.mxu3 %v3390_v13  ;;  %3434 = vmatpush.msrb.mxu1 %v3388_v58 }
 0x31e   : > { %v2688_v50 = vsel %vm2629_vm3, %v2601_v31, %v2660_v62  ;;  %v3389_v31 = vld [vmem:[%s5931_s7 + $0x20] sm:$0xff]  ;;  %3470 = vmatpush.msra.mxu2 %v3385_v47 }
 0x31f   : > { %2717 = vst.msk [vmem:[#allocation2 + $0xd8] sm:$0xff] %vm2689_vm4, %v2688_v50  ;;  %3508 = vmatpush.msra.mxu3 %v3389_v31  ;;  %3435 = vmatpush.msrb.mxu1 %v3387_v0 }
 0x323   : > { %4270 = vmatmul.msk.f32.gmra.mxu1 %vm2689_vm4, %v2993_v42 }
 0x324   : > { %4282 = vmatmul.msk.f32.gmra.mxu3 %vm2689_vm4, %v5588_v52  ;;  %v3115_v52 = vld [vmem:[#allocation3 + $0x21] sm:$0xff] }
 0x326   : > { %v2794_v41 = vld [vmem:[#allocation2 + $0xd0] ss:$2 sm:$0x7f]  ;;  %v2797_v60 = vld [vmem:[#allocation2 + $0xd1] ss:$2 sm:$0x7f] }
 0x327   : > { %v2795_v61 = vmax.f32 %v2790_v29, %v2794_v41  ;;  %v2798_v30 = vmax.f32 %v2792_v63, %v2797_v60 }
 0x329   : > { %v2799_v40 = vmax.f32 %v2795_v61, %v2798_v30  ;;  %v3394_v61 = vld [vmem:[%s5931_s7 + $0x48] sm:$0xff] }
 0x32b   : > { %4271 = vmatmul.msk.f32.gmra.mxu1 %vm2689_vm4, %v2994_v49  ;;  %2800 = vst.msk [vmem:[#allocation3 + $0x2a] sm:$0x7f] %vm414_vm9, %v2799_v40  ;;  %vm3378_vm9 = vcmask 130048  }
 0x32c   : > { %4283 = vmatmul.msk.f32.gmra.mxu3 %vm2689_vm4, %v5633_v43 }
 0x330   : > { %v2870_v33 = vpop.f32.mrf.mxu1 }
 0x332   : > { %v3056_v26 = vld [vmem:[#allocation3 + $0x28] sm:$0x7]  ;;  %v3236_v20 = vld [vmem:[#allocation3 + $0x2f] sm:$0x7] }
 0x333   : > { %4272 = vmatmul.msk.f32.gmra.mxu1 %vm2689_vm4, %v2995_v44  ;;  %4279 = vmatmul.msk.f32.gmra.mxu2 %vm2689_vm4, %v3056_v26  ;;  %v3116_v43 = vld [vmem:[#allocation3 + $0x29] sm:$0x7]  ;;  %v3176_v18 = vld [vmem:[#allocation3 + $0x2e] sm:$0x7] }
 0x334   : > { %4284 = vmatmul.msk.f32.gmra.mxu3 %vm2689_vm4, %v3115_v52  ;;  %v3235_v38 = vld [vmem:[#allocation3 + $0x27] sm:$0xff]  ;;  %v3296_v37 = vld [vmem:[#allocation3 + $0x30] sm:$0x7] }
 0x335   : > { %v3175_v6 = vld [vmem:[#allocation3 + $0x26] sm:$0xff] }
 0x337   : > { %v2920_v45 = vpop.f32.mrf.mxu2 }
 0x338   : > { %v2921_v25 = vadd.f32 %v2920_v45, %v2870_v33  ;;  %v2975_v57 = vpop.f32.mrf.mxu3 }
 0x33a   : > { %v5722_v17 = vadd.f32 %v2975_v57, %v2921_v25  ;;  %v3396_v25 = vld [vmem:[%s5931_s7 + $0x58] sm:$0xff] }
 0x33b   : > { %4273 = vmatmul.msk.f32.gmra.mxu1 %vm2689_vm4, %v2996_v39  ;;  %4293 = vmatmul.msk.f32.vlgmr.msrb.gmra.mxu2 %vm2689_vm4, %v2993_v42  ;;  %v3392_v57 = vld [vmem:[%s5931_s7 + $0x38] sm:$0xff] }
 0x33c   : > { %4285 = vmatmul.msk.f32.gmra.mxu3 %vm2689_vm4, %v3116_v43  ;;  %3589 = vmatpush.msrb.mxu2 %v3394_v61  ;;  %v5794_v43 = vld [vmem:[%s5930_s6] ss:$0 sm:$0xff] }
 0x33d   : > { %v3397_v61 = vld [vmem:[%s5931_s7 + $0x60] sm:$0xff] }
 0x343   : > { %4287 = vmatmul.msk.f32.vlgmr.msra.gmra.mxu1 %vm2689_vm4, %v3172_v9  ;;  %4294 = vmatmul.msk.f32.gmra.mxu2 %vm2689_vm4, %v2994_v49 }
 0x344   : > { %4299 = vmatmul.msk.f32.vlgmr.msrb.gmra.mxu3 %vm2689_vm4, %v5590_v4  ;;  %3548 = vmatpush.msra.mxu1 %v3392_v57 }
 0x345   : > { %3630 = vmatpush.msrb.mxu3 %v3396_v25 }
 0x34b   : > { %4288 = vmatmul.msk.f32.gmra.mxu1 %vm2689_vm4, %v3173_v54  ;;  %4295 = vmatmul.msk.f32.gmra.mxu2 %vm2689_vm4, %v2995_v44 }
 0x34c   : > { %4300 = vmatmul.msk.f32.gmra.mxu3 %vm2689_vm4, %v5635_v51  ;;  %v3295_v51 = vld [vmem:[#allocation3 + $0x28] sm:$0xff] }
 0x350   : > { %v2873_v2 = vpop.f32.mrf.mxu1 }
 0x353   : > { %4289 = vmatmul.msk.f32.gmra.mxu1 %vm2689_vm4, %v3174_v24  ;;  %4296 = vmatmul.msk.f32.gmra.mxu2 %vm2689_vm4, %v3235_v38 }
 0x354   : > { %4301 = vmatmul.msk.f32.gmra.mxu3 %vm2689_vm4, %v3055_v21 }
 0x357   : > { %v2923_v11 = vpop.f32.mrf.mxu2 }
 0x358   : > { %v2924_v36 = vadd.f32 %v2923_v11, %v2873_v2  ;;  %v2978_v4 = vpop.f32.mrf.mxu3 }
 0x35a   : > { %v5738_v32 = vadd.f32 %v2978_v4, %v2924_v36 }
 0x35b   : > { %4290 = vmatmul.msk.f32.gmra.mxu1 %vm2689_vm4, %v3175_v6  ;;  %4297 = vmatmul.msk.f32.gmra.mxu2 %vm2689_vm4, %v3236_v20  ;;  %v3393_v6 = vld [vmem:[%s5931_s7 + $0x40] sm:$0xff] }
 0x35c   : > { %4302 = vmatmul.msk.f32.gmra.mxu3 %vm2689_vm4, %v3295_v51  ;;  %3590 = vmatpush.msrb.mxu2 %v3393_v6  ;;  %v3391_v51 = vld [vmem:[%s5931_s7 + $0x30] sm:$0xff] }
 0x35d   : > { %3549 = vmatpush.msra.mxu1 %v3391_v51 }
 0x363   : > { %4291 = vmatmul.msk.f32.gmra.mxu1 %vm2689_vm4, %v3176_v18 }
 0x364   : > { %4303 = vmatmul.msk.f32.gmra.mxu3 %vm2689_vm4, %v3296_v37 }
 0x370   : > { %v2876_v59 = vpop.f32.mrf.mxu1 }
 0x377   : > { %v2926_v28 = vpop.f32.mrf.mxu2 }
 0x378   : > { %v2927_v10 = vadd.f32 %v2926_v28, %v2876_v59  ;;  %v2981_v35 = vpop.f32.mrf.mxu3 }
 0x37a   : > { %v5745_v5 = vadd.f32 %v2981_v35, %v2927_v10 }
 0x37f   : > { %v2929_v22 = vpop.f32.mrf.mxu2 }
 0x387   : > { %v3092_v3 = vpop.f32.mrf.mxu2 }
 0x38f   : > { %v3095_v55 = vpop.f32.mrf.mxu2 }
 0x390   : > { %v2879_v7 = vpop.f32.mrf.mxu1 }
 0x391   : > { %v2930_v16 = vadd.f32 %v2929_v22, %v2879_v7  ;;  %v3400_v7 = vld [vmem:[%s5931_s7 + $0x78] sm:$0xff] }
 0x397   : > { %v2984_v23 = vpop.f32.mrf.mxu3  ;;  %v3098_v12 = vpop.f32.mrf.mxu2 }
 0x398   : > { %v5750_v53 = vadd.f32 %v2984_v23, %v2930_v16  ;;  %v3032_v1 = vpop.f32.mrf.mxu1 }
 0x399   : > { %v3047_v29 = vadd.f32 %v3032_v1, %v5703_v14  ;;  %v5783_v14 = vld [vmem:[%s5929_s5] ss:$0 sm:$0xff] }
 0x39b   : > { %v3107_v63 = vadd.f32 %v3092_v3, %v3047_v29 }
 0x39f   : > { %v3152_v48 = vpop.f32.mrf.mxu3  ;;  %v5758_v27 = vpop.f32.mrf.mxu2 }
 0x3a0   : > { %v3035_v19 = vpop.f32.mrf.mxu1  ;;  %v3167_v30 = vadd.f32 %v3152_v48, %v3107_v63 }
 0x3a1   : > { %v3048_v49 = vadd.f32 %v3035_v19, %v5722_v17 }
 0x3a3   : > { %v3108_v26 = vadd.f32 %v3095_v55, %v3048_v49 }
 0x3a7   : > { %v3155_v56 = vpop.f32.mrf.mxu3 }
 0x3a8   : > { %v3038_v34 = vpop.f32.mrf.mxu1  ;;  %v3168_v39 = vadd.f32 %v3155_v56, %v3108_v26 }
 0x3a9   : > { %v3049_v54 = vadd.f32 %v3038_v34, %v5738_v32  ;;  %v3395_v32 = vld [vmem:[%s5931_s7 + $0x50] sm:$0xff]  ;;  %v3402_v34 = vld [vmem:[%s5931_s7 + $0x88] sm:$0xff] }
 0x3aa   : > { %3631 = vmatpush.msrb.mxu3 %v3395_v32 }
 0x3ab   : > { %v3109_v11 = vadd.f32 %v3098_v12, %v3049_v54 }
 0x3af   : > { %v3158_v46 = vpop.f32.mrf.mxu3 }
 0x3b0   : > { %v3041_v21 = vpop.f32.mrf.mxu1  ;;  %v3169_v18 = vadd.f32 %v3158_v46, %v3109_v11 }
 0x3b1   : > { %v3050_v10 = vadd.f32 %v3041_v21, %v5745_v5 }
 0x3b3   : > { %v3110_v16 = vadd.f32 %v5758_v27, %v3050_v10  ;;  %v3398_v27 = vld [vmem:[%s5931_s7 + $0x68] sm:$0xff] }
 0x3b6   : > { %v5769_v62 = vpop.f32.mrf.mxu2 }
 0x3b7   : > { %v3161_v50 = vpop.f32.mrf.mxu3 }
 0x3b8   : > { %v5771_v42 = vpop.f32.mrf.mxu1  ;;  %v3170_v5 = vadd.f32 %v3161_v50, %v3110_v16  ;;  %v3788_v16 = vld [vmem:[%s5934_s10 + $0x10] sm:$0xff] }
 0x3b9   : > { %v3051_v55 = vadd.f32 %v5771_v42, %v5750_v53 }
 0x3bb   : > { %v3111_v46 = vadd.f32 %v5769_v62, %v3051_v55  ;;  %v3399_v62 = vld [vmem:[%s5931_s7 + $0x70] sm:$0xff] }
 0x3be   : > { %v3272_v41 = vpop.f32.mrf.mxu2 }
 0x3bf   : > { %v5774_v60 = vpop.f32.mrf.mxu3 }
 0x3c0   : > { %v3212_v40 = vpop.f32.mrf.mxu1  ;;  %v3171_v42 = vadd.f32 %v5774_v60, %v3111_v46 }
 0x3c1   : > { %v3227_v44 = vadd.f32 %v3212_v40, %v3167_v30 }
 0x3c3   : > { %v3287_v52 = vadd.f32 %v3272_v41, %v3227_v44  ;;  %v3401_v41 = vld [vmem:[%s5931_s7 + $0x80] sm:$0xff] }
 0x3c6   : > { %v3275_v33 = vpop.f32.mrf.mxu2 }
 0x3c7   : > { %v3332_v45 = vpop.f32.mrf.mxu3 }
 0x3c8   : > { %v3347_v17 = vadd.f32 %v3332_v45, %v3287_v52  ;;  %v3215_v9 = vpop.f32.mrf.mxu1 }
 0x3c9   : > { %v3228_v38 = vadd.f32 %v3215_v9, %v3168_v39 }
 0x3ca   : > { %v3355_v24 = vadd.f32 %v5783_v14, %v3347_v17 }
 0x3cb   : > { %v3288_v4 = vadd.f32 %v3275_v33, %v3228_v38 }
 0x3cc   : > { %vm3360_vm4 = vcmp.gt.f32.partialorder %v3355_v24, 0.0  ;;  %v3368_v2 = vmul.f32 %v5794_v43, %v3355_v24 }
 0x3ce   : > { %v3373_v36 = vsel %vm3360_vm4, %v3355_v24, %v3368_v2  ;;  %v3278_v28 = vpop.f32.mrf.mxu2 }
 0x3cf   : > { %3379 = vst.msk [vmem:[#allocation4] sm:$0xff] %vm3378_vm9, %v3373_v36  ;;  %v3335_v20 = vpop.f32.mrf.mxu3 }
 0x3d0   : > { %v3348_v37 = vadd.f32 %v3335_v20, %v3288_v4  ;;  %v3218_v59 = vpop.f32.mrf.mxu1 }
 0x3d1   : > { %v3229_v22 = vadd.f32 %v3218_v59, %v3169_v18 }
 0x3d2   : > { %v3356_v35 = vadd.f32 %v5783_v14, %v3348_v37 }
 0x3d3   : > { %v3289_v23 = vadd.f32 %v3278_v28, %v3229_v22 }
 0x3d4   : > { %vm3361_vm6 = vcmp.gt.f32.partialorder %v3356_v35, 0.0  ;;  %v3369_v3 = vmul.f32 %v5794_v43, %v3356_v35 }
 0x3d6   : > { %v3374_v15 = vsel %vm3361_vm6, %v3356_v35, %v3369_v3  ;;  %v3405_v1 = vld [vmem:[#allocation4] sm:$0xff]  ;;  %v3281_v12 = vpop.f32.mrf.mxu2 }
 0x3d7   : > { %3380 = vst.msk [vmem:[#allocation4 + $0x8] sm:$0xff] %vm3378_vm9, %v3374_v15  ;;  %v3338_v8 = vpop.f32.mrf.mxu3  ;;  %4307 = vmatmul.msk.f32.vlgmr.msra.gmra.mxu2 %vm3378_vm9, %v3405_v1 }
 0x3d8   : > { %v3349_v13 = vadd.f32 %v3338_v8, %v3289_v23  ;;  %v3221_v58 = vpop.f32.mrf.mxu1  ;;  %3712 = vmatpush.msra.mxu2 %v3400_v7  ;;  %v3789_v7 = vld [vmem:[%s5934_s10 + $0x18] sm:$0xff]  ;;  %v3787_v8 = vld [vmem:[%s5934_s10 + $0x8] sm:$0xff] }
 0x3d9   : > { %v3230_v19 = vadd.f32 %v3221_v58, %v3170_v5 }
 0x3da   : > { %v3357_v48 = vadd.f32 %v5783_v14, %v3349_v13  ;;  %3713 = vmatpush.msra.mxu2 %v3399_v62 }
 0x3db   : > { %v3290_v31 = vadd.f32 %v3281_v12, %v3230_v19 }
 0x3dc   : > { %vm3362_vm7 = vcmp.gt.f32.partialorder %v3357_v48, 0.0  ;;  %v3370_v56 = vmul.f32 %v5794_v43, %v3357_v48 }
 0x3de   : > { %v3375_v47 = vsel %vm3362_vm7, %v3357_v48, %v3370_v56  ;;  %v3408_v53 = vld [vmem:[#allocation4 + $0x1] sm:$0xff]  ;;  %v3284_v49 = vpop.f32.mrf.mxu2 }
 0x3df   : > { %v3406_v0 = vld [vmem:[#allocation4 + $0x8] sm:$0xff]  ;;  %3381 = vst.msk [vmem:[#allocation4 + $0x10] sm:$0xff] %vm3378_vm9, %v3375_v47  ;;  %v3341_v50 = vpop.f32.mrf.mxu3  ;;  %4304 = vmatmul.msk.f32.vlgmr.msrb.gmra.mxu1 %vm3378_vm9, %v3408_v53 }
 0x3e0   : > { %v3481_v21 = vld [vmem:[#allocation4 + $0x2] sm:$0xff]  ;;  %4308 = vmatmul.msk.f32.gmra.mxu2 %vm3378_vm9, %v3406_v0  ;;  %v3350_v29 = vadd.f32 %v3341_v50, %v3290_v31  ;;  %v3224_v63 = vpop.f32.mrf.mxu1  ;;  %3671 = vmatpush.msrb.mxu1 %v3398_v27 }
 0x3e1   : > { %4310 = vmatmul.msk.f32.vlgmr.msra.gmra.mxu3 %vm3378_vm9, %v3481_v21  ;;  %v3231_v30 = vadd.f32 %v3224_v63, %v3171_v42  ;;  %v3522_v38 = vld [vmem:[#allocation4 + $0x7] sm:$0xff] }
 0x3e2   : > { %3753 = vmatpush.msra.mxu3 %v3402_v34  ;;  %v3358_v60 = vadd.f32 %v5783_v14, %v3350_v29  ;;  %3672 = vmatpush.msrb.mxu1 %v3397_v61  ;;  %v3786_v48 = vld [vmem:[%s5934_s10] sm:$0xff] }
 0x3e3   : > { %v3291_v26 = vadd.f32 %v3284_v49, %v3231_v30 }
 0x3e4   : > { %3754 = vmatpush.msra.mxu3 %v3401_v41  ;;  %vm3363_vm8 = vcmp.gt.f32.partialorder %v3358_v60, 0.0  ;;  %v3371_v40 = vmul.f32 %v5794_v43, %v3358_v60 }
 0x3e6   : > { %v3376_v44 = vsel %vm3363_vm8, %v3358_v60, %v3371_v40  ;;  %v3409_v52 = vld [vmem:[#allocation4 + $0x9] sm:$0xff]  ;;  %v3410_v54 = vld [vmem:[#allocation4 + $0x11] sm:$0x1f]  ;;  %v4355_v40 = vld [vmem:[%s5932_s8] ss:$0 sm:$0xff] }
 0x3e7   : > { %v3407_v33 = vld [vmem:[#allocation4 + $0x10] sm:$0x1f]  ;;  %3382 = vst.msk [vmem:[#allocation4 + $0x18] sm:$0xff] %vm3378_vm9, %v3376_v44  ;;  %v3344_v25 = vpop.f32.mrf.mxu3  ;;  %4305 = vmatmul.msk.f32.gmra.mxu1 %vm3378_vm9, %v3409_v52 }
 0x3e8   : > { %v3482_v45 = vld [vmem:[#allocation4 + $0xa] sm:$0xff]  ;;  %4309 = vmatmul.msk.f32.gmra.mxu2 %vm3378_vm9, %v3407_v33  ;;  %v3351_v57 = vadd.f32 %v3344_v25, %v3291_v26  ;;  %v3483_v24 = vld [vmem:[#allocation4 + $0x12] sm:$0x1f]  ;;  %v4356_v33 = vld [vmem:[%s5933_s9] ss:$0 sm:$0xff] }
 0x3e9   : > { %4311 = vmatmul.msk.f32.gmra.mxu3 %vm3378_vm9, %v3482_v45  ;;  %v3564_v2 = vld [vmem:[#allocation4 + $0x10] sm:$0xff] }
 0x3ea   : > { %v3359_v39 = vadd.f32 %v5783_v14, %v3351_v57  ;;  %v3523_v14 = vld [vmem:[#allocation4 + $0xf] sm:$0xff] }
 0x3eb   : > { %v3645_v6 = vld [vmem:[#allocation4 + $0xe] sm:$0xff] }
 0x3ec   : > { %vm3364_vm10 = vcmp.gt.f32.partialorder %v3359_v39, 0.0  ;;  %v3372_v17 = vmul.f32 %v5794_v43, %v3359_v39 }
 0x3ee   : > { %v3377_v9 = vsel %vm3364_vm10, %v3359_v39, %v3372_v17  ;;  %v3565_v43 = vld [vmem:[#allocation4 + $0x18] sm:$0x1f] }
 0x3ef   : > { %3384 = vst.msk [vmem:[#allocation4 + $0x20] sm:$0x7] %vm3383_vm11, %v3377_v9  ;;  %4306 = vmatmul.msk.f32.gmra.mxu1 %vm3378_vm9, %v3410_v54  ;;  %v3605_v11 = vld [vmem:[#allocation4 + $0x11] sm:$0xff]  ;;  %v3606_v4 = vld [vmem:[#allocation4 + $0x19] sm:$0x1f] }
 0x3f0   : > { %4316 = vmatmul.msk.f32.vlgmr.msrb.gmra.mxu2 %vm3378_vm9, %v3406_v0  ;;  %v3524_v36 = vld [vmem:[#allocation4 + $0x17] sm:$0x1f] }
 0x3f1   : > { %4312 = vmatmul.msk.f32.gmra.mxu3 %vm3378_vm9, %v3483_v24  ;;  %v3687_v20 = vld [vmem:[#allocation4 + $0x17] sm:$0xff] }
 0x3f2   : > { %v3646_v32 = vld [vmem:[#allocation4 + $0x16] sm:$0xff] }
 0x3f3   : > { %v3728_v18 = vld [vmem:[#allocation4 + $0x18] sm:$0xff] }
 0x3f6   : > { %v3688_v51 = vld [vmem:[#allocation4 + $0x1f] sm:$0x1f] }
 0x3f7   : > { %4313 = vmatmul.msk.f32.vlgmr.msra.gmra.mxu1 %vm3378_vm9, %v3522_v38  ;;  %v3647_v37 = vld [vmem:[#allocation4 + $0x1e] sm:$0x1f] }
 0x3f8   : > { %4317 = vmatmul.msk.f32.gmra.mxu2 %vm3378_vm9, %v3564_v2  ;;  %v3729_v59 = vld [vmem:[#allocation4 + $0x20] sm:$0x1f]  ;;  %3816 = vmatpush.msra.mxu1 %v3789_v7 }
 0x3f9   : > { %4319 = vmatmul.msk.f32.vlgmr.msrb.gmra.mxu3 %vm3378_vm9, %v3409_v52 }
 0x3fa   : > { %3817 = vmatpush.msra.mxu1 %v3788_v16 }
 0x3fc   : > { %3818 = vmatpush.msra.mxu1 %v3787_v8 }
 0x3fe   : > { %3819 = vmatpush.msra.mxu1 %v3786_v48 }
 0x3ff   : > { %4314 = vmatmul.msk.f32.gmra.mxu1 %vm3378_vm9, %v3523_v14 }
 0x400   : > { %4318 = vmatmul.msk.f32.gmra.mxu2 %vm3378_vm9, %v3565_v43 }
 0x401   : > { %4320 = vmatmul.msk.f32.gmra.mxu3 %vm3378_vm9, %v3605_v11 }
 0x407   : > { %4315 = vmatmul.msk.f32.gmra.mxu1 %vm3378_vm9, %v3524_v36 }
 0x408   : > { %4325 = vmatmul.msk.f32.vlgmr.msra.gmra.mxu2 %vm3378_vm9, %v3523_v14 }
 0x409   : > { %4321 = vmatmul.msk.f32.gmra.mxu3 %vm3378_vm9, %v3606_v4 }
 0x40f   : > { %4322 = vmatmul.msk.f32.vlgmr.msrb.gmra.mxu1 %vm3378_vm9, %v3645_v6 }
 0x410   : > { %4326 = vmatmul.msk.f32.gmra.mxu2 %vm3378_vm9, %v3687_v20 }
 0x411   : > { %4328 = vmatmul.msk.f32.vlgmr.msra.gmra.mxu3 %vm3378_vm9, %v3564_v2 }
 0x417   : > { %4323 = vmatmul.msk.f32.gmra.mxu1 %vm3378_vm9, %v3646_v32 }
 0x418   : > { %4327 = vmatmul.msk.f32.gmra.mxu2 %vm3378_vm9, %v3688_v51 }
 0x419   : > { %4329 = vmatmul.msk.f32.gmra.mxu3 %vm3378_vm9, %v3728_v18 }
 0x41f   : > { %4324 = vmatmul.msk.f32.gmra.mxu1 %vm3378_vm9, %v3647_v37 }
 0x421   : > { %4330 = vmatmul.msk.f32.gmra.mxu3 %vm3378_vm9, %v3729_v59 }
 0x45a   : > { %v3472_v28 = vpop.f32.mrf.mxu2 }
 0x45c   : > { %v3437_v10 = vpop.f32.mrf.mxu1 }
 0x45d   : > { %v3473_v56 = vadd.f32 %v3472_v28, %v3437_v10 }
 0x463   : > { %v3475_v35 = vpop.f32.mrf.mxu2 }
 0x464   : > { %v3510_v22 = vpop.f32.mrf.mxu3  ;;  %v3440_v3 = vpop.f32.mrf.mxu1 }
 0x465   : > { %v3519_v46 = vadd.f32 %v3510_v22, %v3473_v56  ;;  %v3476_v53 = vadd.f32 %v3475_v35, %v3440_v3  ;;  %v4357_v35 = vld [vmem:[%s5935_s11] ss:$0 sm:$0xff] }
 0x46b   : > { %v3478_v15 = vpop.f32.mrf.mxu2 }
 0x46c   : > { %v3513_v23 = vpop.f32.mrf.mxu3  ;;  %v3443_v1 = vpop.f32.mrf.mxu1 }
 0x46d   : > { %v3520_v50 = vadd.f32 %v3513_v23, %v3476_v53  ;;  %v3479_v61 = vadd.f32 %v3478_v15, %v3443_v1 }
 0x473   : > { %v3592_v5 = vpop.f32.mrf.mxu2 }
 0x474   : > { %v3516_v13 = vpop.f32.mrf.mxu3  ;;  %v3551_v58 = vpop.f32.mrf.mxu1 }
 0x475   : > { %v3560_v31 = vadd.f32 %v3551_v58, %v3519_v46  ;;  %v3521_v44 = vadd.f32 %v3516_v13, %v3479_v61 }
 0x477   : > { %v3601_v0 = vadd.f32 %v3592_v5, %v3560_v31 }
 0x47b   : > { %v3595_v55 = vpop.f32.mrf.mxu2 }
 0x47c   : > { %v3633_v19 = vpop.f32.mrf.mxu3  ;;  %v3554_v12 = vpop.f32.mrf.mxu1 }
 0x47d   : > { %v3642_v42 = vadd.f32 %v3633_v19, %v3601_v0  ;;  %v3561_v62 = vadd.f32 %v3554_v12, %v3520_v50 }
 0x47f   : > { %v3602_v60 = vadd.f32 %v3595_v55, %v3561_v62 }
 0x483   : > { %v3598_v34 = vpop.f32.mrf.mxu2 }
 0x484   : > { %v3636_v27 = vpop.f32.mrf.mxu3  ;;  %v3557_v47 = vpop.f32.mrf.mxu1 }
 0x485   : > { %v3643_v26 = vadd.f32 %v3636_v27, %v3602_v60  ;;  %v3562_v25 = vadd.f32 %v3557_v47, %v3521_v44 }
 0x487   : > { %v3603_v54 = vadd.f32 %v3598_v34, %v3562_v25 }
 0x48b   : > { %v3715_v63 = vpop.f32.mrf.mxu2 }
 0x48c   : > { %v3639_v21 = vpop.f32.mrf.mxu3  ;;  %v3674_v29 = vpop.f32.mrf.mxu1 }
 0x48d   : > { %v3683_v41 = vadd.f32 %v3674_v29, %v3642_v42  ;;  %v3644_v14 = vadd.f32 %v3639_v21, %v3603_v54 }
 0x48f   : > { %v3724_v30 = vadd.f32 %v3715_v63, %v3683_v41 }
 0x493   : > { %v3718_v17 = vpop.f32.mrf.mxu2 }
 0x494   : > { %v3756_v49 = vpop.f32.mrf.mxu3  ;;  %v3677_v45 = vpop.f32.mrf.mxu1 }
 0x495   : > { %v3765_v52 = vadd.f32 %v3756_v49, %v3724_v30  ;;  %v3684_v39 = vadd.f32 %v3677_v45, %v3643_v26 }
 0x497   : > { %v3771_v57 = vadd.f32 %v4355_v40, %v3765_v52  ;;  %v3725_v38 = vadd.f32 %v3718_v17, %v3684_v39 }
 0x499   : > { %vm3774_vm12 = vcmp.gt.f32.partialorder %v3771_v57, 0.0  ;;  %v3780_v9 = vmul.f32 %v4356_v33, %v3771_v57 }
 0x49b   : > { %v3783_v24 = vsel %vm3774_vm12, %v3771_v57, %v3780_v9  ;;  %v3721_v20 = vpop.f32.mrf.mxu2  ;;  %vm3914_vm12 = vcmask 7168  }
 0x49c   : > { %v3759_v2 = vpop.f32.mrf.mxu3  ;;  %4331 = vmatmul.msk.f32.vlgmr.msra.gmra.mxu1 %vm3794_vm13, %v3783_v24  ;;  %v3680_v11 = vpop.f32.mrf.mxu1 }
 0x49d   : > { %v3766_v43 = vadd.f32 %v3759_v2, %v3725_v38  ;;  %v3685_v4 = vadd.f32 %v3680_v11, %v3644_v14 }
 0x49f   : > { %v3772_v36 = vadd.f32 %v4355_v40, %v3766_v43  ;;  %v3726_v32 = vadd.f32 %v3721_v20, %v3685_v4 }
 0x4a1   : > { %v3781_v6 = vmul.f32 %v4356_v33, %v3772_v36  ;;  %vm3775_vm14 = vcmp.gt.f32.partialorder %v3772_v36, 0.0 }
 0x4a3   : > { %v3784_v51 = vsel %vm3775_vm14, %v3772_v36, %v3781_v6  ;;  %vm3922_vm14 = vcmask 48128  }
 0x4a4   : > { %v3762_v18 = vpop.f32.mrf.mxu3  ;;  %4332 = vmatmul.msk.f32.gmra.mxu1 %vm3794_vm13, %v3784_v51 }
 0x4a5   : > { %v3767_v37 = vadd.f32 %v3762_v18, %v3726_v32 }
 0x4a7   : > { %v3773_v59 = vadd.f32 %v4355_v40, %v3767_v37 }
 0x4a9   : > { %v3782_v28 = vmul.f32 %v4356_v33, %v3773_v59  ;;  %vm3776_vm15 = vcmp.gt.f32.partialorder %v3773_v59, 0.0 }
 0x4ab   : > { %v3785_v10 = vsel %vm3776_vm15, %v3773_v59, %v3782_v28  ;;  %vm3925_vm15 = vcmask 45056  }
 0x4ac   : > { %4333 = vmatmul.msk.f32.gmra.mxu1 %vm3794_vm13, %v3785_v10  ;;  %vm3918_vm13 = vcmask 15360  }
 0x519   : > { %v3821_v22 = vpop.f32.mrf.mxu1 }
 0x51a   : > { %v5896_v3 = vadd.f32 %v4357_v35, %v3821_v22 }
 0x51c   : > { %3833 = vrot.lane.b32.xlu0 %v5896_v3, %s4379_s28 }
 0x521   : > { %v3824_v7 = vpop.f32.mrf.mxu1 }
 0x522   : > { %v5899_v16 = vadd.f32 %v4357_v35, %v3824_v7 }
 0x524   : > { %3835 = vrot.lane.b32.xlu0 %v5899_v16, %s4379_s28 }
 0x529   : > { %v3827_v15 = vpop.f32.mrf.mxu1 }
 0x52a   : > { %v5902_v23 = vadd.f32 %v4357_v35, %v3827_v15 }
 0x52c   : > { %3837 = vrot.lane.b32.xlu1 %v5902_v23, %s4379_s28 }
 0x58e   : > { %v3834_v1 = vpop.permute.xlu0 %3833 }
 0x58f   : > { %v3842_v8 = vsub.f32 %v5896_v3, %v3834_v1 }
 0x591   : > { %v3845_v5 = vmul.f32 1.442695, %v3842_v8 }
 0x593   : > { %4358 = vpow2.f32 %v3845_v5 }
 0x596   : > { %v3836_v13 = vpop.permute.xlu0 %3835 }
 0x597   : > { %v3843_v58 = vsub.f32 %v5899_v16, %v3836_v13 }
 0x599   : > { %v4359_v55 = vpop.eup %4358  ;;  %v3847_v48 = vmul.f32 1.442695, %v3843_v58 }
 0x59a   : > { %v3851_v19 = vadd.f32 1.0, %v4359_v55 }
 0x59b   : > { %4360 = vpow2.f32 %v3847_v48 }
 0x59c   : > { %4362 = vrcp.f32 %v3851_v19  ;;  %v3865_v0 = vand.u32 2147483648, %v3851_v19  ;;  %v3863_v50 = vand.u32 2147483647, %v3851_v19  ;;  %vm3859_vm1 = vweird.f32 %v3851_v19 }
 0x59e   : > { %v3838_v12 = vpop.permute.xlu1 %3837  ;;  %v3866_v41 = vor.u32 1.1754944e-38, %v3865_v0  ;;  %vm3864_vm3 = vcmp.eq.f32.partialorder %v3863_v50, 8.507059e+37 }
 0x59f   : > { %v3844_v56 = vsub.f32 %v5902_v23, %v3838_v12 }
 0x5a1   : > { %v4361_v34 = vpop.eup %4360  ;;  %v3849_v27 = vmul.f32 1.442695, %v3844_v56 }
 0x5a2   : > { %v4363_v46 = vpop.eup %4362  ;;  %v3852_v47 = vadd.f32 1.0, %v4361_v34 }
 0x5a3   : > { %4364 = vpow2.f32 %v3849_v27  ;;  %v3855_v31 = vmul.f32 %v4363_v46, %v3851_v19  ;;  %vm3860_vm0 = vweird.f32 %v4363_v46 }
 0x5a4   : > { %4366 = vrcp.f32 %v3852_v47  ;;  %vm3861_vm2 = vmor %vm3859_vm1, %vm3860_vm0  ;;  %v3880_v49 = vand.u32 2147483648, %v3852_v47  ;;  %v3878_v26 = vand.u32 2147483647, %v3852_v47  ;;  %vm3874_vm9 = vweird.f32 %v3852_v47 }
 0x5a5   : > { %v3856_v53 = vsub.f32 1.0, %v3855_v31 }
 0x5a6   : > { %v3881_v45 = vor.u32 1.1754944e-38, %v3880_v49  ;;  %vm3879_vm6 = vcmp.eq.f32.partialorder %v3878_v26, 8.507059e+37 }
 0x5a7   : > { %v3857_v21 = vmul.f32 %v4363_v46, %v3856_v53 }
 0x5a9   : > { %v4365_v42 = vpop.eup %4364  ;;  %v3858_v29 = vadd.f32 %v4363_v46, %v3857_v21 }
 0x5aa   : > { %v4367_v63 = vpop.eup %4366  ;;  %v3853_v62 = vadd.f32 1.0, %v4365_v42 }
 0x5ab   : > { %v3862_v61 = vsel %vm3861_vm2, %v4363_v46, %v3858_v29  ;;  %v3870_v60 = vmul.f32 %v4367_v63, %v3852_v47  ;;  %vm3875_vm4 = vweird.f32 %v4367_v63 }
 0x5ac   : > { %4368 = vrcp.f32 %v3853_v62  ;;  %v3867_v30 = vsel %vm3864_vm3, %v3866_v41, %v3862_v61  ;;  %vm3876_vm5 = vmor %vm3874_vm9, %vm3875_vm4  ;;  %v3895_v9 = vand.u32 2147483648, %v3853_v62  ;;  %v3893_v24 = vand.u32 2147483647, %v3853_v62 }
 0x5ad   : > { %3905 = vrot.lane.b32.xlu1 %v3867_v30, %s4380_s29  ;;  %v3871_v40 = vsub.f32 1.0, %v3870_v60  ;;  %vm3889_vm8 = vweird.f32 %v3853_v62  ;;  %v3899_v37 = vsub.f32 1.0, %v3867_v30 }
 0x5ae   : > { %v3896_v2 = vor.u32 1.1754944e-38, %v3895_v9  ;;  %vm3894_vm11 = vcmp.eq.f32.partialorder %v3893_v24, 8.507059e+37 }
 0x5af   : > { %v3872_v44 = vmul.f32 %v4367_v63, %v3871_v40 }
 0x5b1   : > { %v3873_v52 = vadd.f32 %v4367_v63, %v3872_v44 }
 0x5b2   : > { %v4369_v33 = vpop.eup %4368 }
 0x5b3   : > { %v3877_v25 = vsel %vm3876_vm5, %v4367_v63, %v3873_v52  ;;  %v3885_v57 = vmul.f32 %v4369_v33, %v3853_v62  ;;  %vm3890_vm7 = vweird.f32 %v4369_v33 }
 0x5b4   : > { %v3882_v39 = vsel %vm3879_vm6, %v3881_v45, %v3877_v25  ;;  %vm3891_vm10 = vmor %vm3889_vm8, %vm3890_vm7 }
 0x5b5   : > { %3907 = vrot.lane.b32.xlu2 %v3882_v39, %s4380_s29  ;;  %v3886_v17 = vsub.f32 1.0, %v3885_v57  ;;  %v3900_v11 = vsub.f32 1.0, %v3882_v39 }
 0x5b7   : > { %v3887_v54 = vmul.f32 %v4369_v33, %v3886_v17 }
 0x5b9   : > { %v3888_v38 = vadd.f32 %v4369_v33, %v3887_v54 }
 0x5bb   : > { %v3892_v14 = vsel %vm3891_vm10, %v4369_v33, %v3888_v38 }
 0x5bc   : > { %v3897_v43 = vsel %vm3894_vm11, %v3896_v2, %v3892_v14 }
 0x5bd   : > { %3909 = vrot.lane.b32.xlu2 %v3897_v43, %s4380_s29  ;;  %v3901_v20 = vsub.f32 1.0, %v3897_v43 }
 0x60f   : > { %v3908_v36 = vpop.permute.xlu2 %3907 }
 0x610   : > { %v3916_v4 = vsel %vm3914_vm12, %v3908_v36, %v3900_v11 }
 0x611   : > { %v3920_v6 = vsel %vm3918_vm13, %v3916_v4, %v5899_v16 }
 0x612   : > { %3924 = vst.msk [vmem:[%s413_s14 + $0x8] sm:$0xff] %vm3922_vm14, %v3920_v6 }
 0x617   : > { %v3910_v32 = vpop.permute.xlu2 %3909 }
 0x618   : > { %v3917_v51 = vsel %vm3914_vm12, %v3910_v32, %v3901_v20 }
 0x619   : > { %v3921_v18 = vsel %vm3918_vm13, %v3917_v51, %v5902_v23 }
 0x61a   : > { %3926 = vst.msk [vmem:[%s413_s14 + $0x10] sm:$0x1f] %vm3925_vm15, %v3921_v18 }
 0x61f   : > { %v3906_v59 = vpop.permute.xlu1 %3905 }
 0x620   : > { %v3915_v28 = vsel %vm3914_vm12, %v3906_v59, %v3899_v37 }
 0x621   : > { %v3919_v10 = vsel %vm3918_vm13, %v3915_v28, %v5896_v3 }
 0x622   : > { %3923 = vst.msk [vmem:[%s413_s14] sm:$0xff] %vm3922_vm14, %v3919_v10 }
 0x623 PF: > { %s22_s21 = sadd.s32 1, %s4376_s21  }
 0x624   : > { %p19_p4 = scmp.ge.s32.totalorder %s22_s21, 4  }
 0x626   :  { %21 = sbr.rel (!%p19_p4) target bundleno = 1 (0x1), region = 125 }

</bundles_post_ra>
